<compile_context>
chip_gen: v6e
topology: v6e:2x2x1
jax: 0.10.0
libtpu: 0.0.40
codegen_flags: <defaults>
</compile_context>

<pallas_src>
import jax
import jax.numpy as jnp
from jax import lax
from jax.experimental import pallas as pl
from jax.experimental.pallas import tpu as pltpu


def _round_up(a, b):
    return ((a + b - 1) // b) * b


# --------------------------- host-side weight prep ---------------------------

def _prep_params(params):
    """Re-layout PyTorch-style weights into banded-matmul form (host side, tiny)."""
    w1, b1, w2, b2, fw1, fb1, fw2, fb2 = params
    f32 = jnp.float32

    # conv1 (1->9, 5x5) as 5 banded matmuls, one per kernel row kh:
    #   h1[i*TB+n, col1] = sum_kh  x[n, i+kh, :] @ W1[kh]
    # output column order col1(j, c) = (j%2)*108 + c*12 + (j//2) so the w-pool is
    # just max(cols[:108], cols[108:]).
    p = jnp.arange(28)[:, None]                 # input w
    j = jnp.arange(24)[None, :]                 # output w
    kw = p - j
    valid = ((kw >= 0) & (kw < 5)).astype(f32)
    kw_c = jnp.clip(kw, 0, 4)
    w1_t = w1.reshape(9, 5, 5).transpose(1, 2, 0)            # (kh, kw, c)
    W1 = w1_t[:, kw_c, :] * valid[None, :, :, None]          # (5, 28, 24, 9) [kh,p,j,c]
    W1 = W1.reshape(5, 28, 12, 2, 9).transpose(0, 1, 3, 4, 2).reshape(5, 28, 216)
    b1v = jnp.tile(jnp.repeat(b1, 12), 2).reshape(1, 216)

    # conv2 (9->16, 5x5) on the pooled 12x12x9 activations (rows c*12+q),
    # output column order col2(j, o) = (j%2)*64 + o*4 + (j//2)  -> 128 dense lanes.
    q = jnp.arange(12)[:, None]
    j = jnp.arange(8)[None, :]
    kw = q - j
    valid = ((kw >= 0) & (kw < 5)).astype(f32)
    kw_c = jnp.clip(kw, 0, 4)
    w2_t = w2.transpose(2, 3, 1, 0)                          # (kh, kw, c, o)
    W2 = w2_t[:, kw_c] * valid[None, :, :, None, None]       # (5, 12, 8, 9, 16)
    W2 = (W2.reshape(5, 12, 4, 2, 9, 16)
            .transpose(0, 4, 1, 3, 5, 2)
            .reshape(5, 108, 128))
    b2v = jnp.tile(jnp.repeat(b2, 4), 2).reshape(1, 128)

    # fc1 decomposed over the 4 pooled rows h; p2 columns are o*4 + w.
    fw1_r = fw1.reshape(120, 16, 4, 4).transpose(2, 1, 3, 0).reshape(4, 64, 120)
    fb1_r = fb1.reshape(1, 120)
    fw2_r = fw2.T                                            # (120, 60)
    fb2_r = fb2.reshape(1, 60)
    return W1, b1v, W2, b2v, fw1_r, fb1_r, fw2_r, fb2_r


# ------------------------------------ kernel ----------------------------------

def _net_kernel(x_ref, w1_ref, b1_ref, w2_ref, b2_ref,
                fw1_ref, fb1_ref, fw2_ref, fb2_ref, o_ref):
    f32 = jnp.float32
    tb = x_ref.shape[1]                       # samples in this batch tile

    x = x_ref[...]                            # (28, TB, 28)  [h, n, w]

    # ---- conv1 + bias + ReLU: (24*TB, 216), row = i*TB + n ----
    acc1 = jnp.dot(x[0:24].reshape(24 * tb, 28), w1_ref[0],
                   preferred_element_type=f32)
    for kh in range(1, 5):
        lhs = x[kh:kh + 24].reshape(24 * tb, 28)
        acc1 = acc1 + jnp.dot(lhs, w1_ref[kh], preferred_element_type=f32)
    h1 = jnp.maximum(acc1 + b1_ref[...], 0.0)

    # ---- 2x2 max-pool -> (12*TB, 108), cols = c*12 + w' ----
    h1 = h1.reshape(12, 2 * tb, 216)
    h1 = jnp.maximum(h1[:, :tb, :], h1[:, tb:, :])           # pool along h
    h1 = h1.reshape(12 * tb, 216)
    p1 = jnp.maximum(h1[:, :108], h1[:, 108:])               # pool along w

    # ---- conv2 + bias + ReLU: (8*TB, 128), cols = (j%2)*64 + o*4 + j//2 ----
    acc2 = jnp.dot(p1[0:8 * tb, :], w2_ref[0], preferred_element_type=f32)
    for kh in range(1, 5):
        acc2 = acc2 + jnp.dot(p1[kh * tb:(kh + 8) * tb, :], w2_ref[kh],
                              preferred_element_type=f32)
    h2 = jnp.maximum(acc2 + b2_ref[...], 0.0)

    # ---- 2x2 max-pool -> (4*TB, 64), row = h*TB + n, cols = o*4 + w ----
    h2 = h2.reshape(4, 2 * tb, 128)
    h2 = jnp.maximum(h2[:, :tb, :], h2[:, tb:, :])
    h2 = h2.reshape(4 * tb, 128)
    p2 = jnp.maximum(h2[:, :64], h2[:, 64:])

    # ---- fc1 + ReLU: (TB, 120) ----
    acc3 = jnp.dot(p2[0:tb, :], fw1_ref[0], preferred_element_type=f32)
    for h in range(1, 4):
        acc3 = acc3 + jnp.dot(p2[h * tb:(h + 1) * tb, :], fw1_ref[h],
                              preferred_element_type=f32)
    emb = jnp.maximum(acc3 + fb1_ref[...], 0.0)

    # ---- fc2 + ReLU + log_softmax: (TB, 60) ----
    t = jnp.dot(emb, fw2_ref[...], preferred_element_type=f32) + fb2_ref[...]
    t = jnp.maximum(t, 0.0)
    m = jnp.max(t, axis=-1, keepdims=True)
    z = t - m
    lse = jnp.log(jnp.sum(jnp.exp(z), axis=-1, keepdims=True))
    o_ref[...] = z - lse


# ----------------------------------- wrapper ----------------------------------

def net_forward(x, params, *, block_batch=64):
    """x: (N, 1, 28, 28) float32, params in PyTorch layout.  Returns (N, 60)."""
    n = x.shape[0]
    tb = _round_up(min(block_batch, _round_up(n, 8)), 8)
    n_pad = _round_up(n, tb)

    x2 = x.reshape(n, 28, 28)
    if n_pad != n:
        x2 = jnp.pad(x2, ((0, n_pad - n), (0, 0), (0, 0)))
    x_t = x2.transpose(1, 0, 2)                              # (28, n_pad, 28) [h,n,w]

    W1, b1v, W2, b2v, fw1_r, fb1_r, fw2_r, fb2_r = _prep_params(params)

    out = pl.pallas_call(
        _net_kernel,
        out_shape=jax.ShapeDtypeStruct((n_pad, 60), jnp.float32),
        grid=(n_pad // tb,),
        in_specs=[
            pl.BlockSpec((28, tb, 28), lambda i: (0, i, 0)),
            pl.BlockSpec((5, 28, 216), lambda i: (0, 0, 0)),
            pl.BlockSpec((1, 216), lambda i: (0, 0)),
            pl.BlockSpec((5, 108, 128), lambda i: (0, 0, 0)),
            pl.BlockSpec((1, 128), lambda i: (0, 0)),
            pl.BlockSpec((4, 64, 120), lambda i: (0, 0, 0)),
            pl.BlockSpec((1, 120), lambda i: (0, 0)),
            pl.BlockSpec((120, 60), lambda i: (0, 0)),
            pl.BlockSpec((1, 60), lambda i: (0, 0)),
        ],
        out_specs=pl.BlockSpec((tb, 60), lambda i: (i, 0)),
        compiler_params=pltpu.CompilerParams(
            dimension_semantics=("parallel",),
            vmem_limit_bytes=48 * 1024 * 1024),
    )(x_t, W1, b1v, W2, b2v, fw1_r, fb1_r, fw2_r, fb2_r)
    return out[:n]


# ----------------------------- params / reference -----------------------------

def init_params(key):
    def uniform(k, shape, fan_in):
        bound = 1.0 / jnp.sqrt(float(fan_in))
        return jax.random.uniform(k, shape, jnp.float32, -bound, bound)

    ks = jax.random.split(key, 8)
    w1 = uniform(ks[0], (9, 1, 5, 5), 1 * 5 * 5)
    b1 = uniform(ks[1], (9,), 1 * 5 * 5)
    w2 = uniform(ks[2], (16, 9, 5, 5), 9 * 5 * 5)
    b2 = uniform(ks[3], (16,), 9 * 5 * 5)
    fw1 = uniform(ks[4], (120, 256), 256)
    fb1 = uniform(ks[5], (120,), 256)
    fw2 = uniform(ks[6], (60, 120), 120)
    fb2 = uniform(ks[7], (60,), 120)
    return (w1, b1, w2, b2, fw1, fb1, fw2, fb2)


def reference_forward(x, params):
    w1, b1, w2, b2, fw1, fb1, fw2, fb2 = params
    dn = ('NCHW', 'OIHW', 'NCHW')

    def pool(t):
        return lax.reduce_window(t, -jnp.inf, lax.max,
                                 (1, 1, 2, 2), (1, 1, 2, 2), 'VALID')

    t = lax.conv_general_dilated(x, w1, (1, 1), 'VALID', dimension_numbers=dn)
    t = jax.nn.relu(t + b1[None, :, None, None])
    t = pool(t)
    t = lax.conv_general_dilated(t, w2, (1, 1), 'VALID', dimension_numbers=dn)
    t = jax.nn.relu(t + b2[None, :, None, None])
    t = pool(t)
    t = t.reshape(-1, 256)
    t = jax.nn.relu(t @ fw1.T + fb1)
    t = jax.nn.relu(t @ fw2.T + fb2)
    return jax.nn.log_softmax(t, axis=1)


# ------------------------------------ main -------------------------------------

if __name__ == "__main__":
    key = jax.random.PRNGKey(0)
    kp, kx = jax.random.split(key)
    params = init_params(kp)

    # MNIST-like input: the flatten to 256 (=16*4*4) implies 28x28 spatial.
    x = jax.random.normal(kx, (2, 1, 28, 28), dtype=jnp.float32)

    fwd = jax.jit(net_forward)
    out = jax.block_until_ready(fwd(x, params))

    ref = jax.block_until_ready(reference_forward(x, params))
    assert out.shape == (2, 60)
    assert jnp.allclose(out, ref, atol=1e-4, rtol=1e-4), "mismatch vs reference"

    print("KERNEL_OK")
</pallas_src>

<mosaic_0001>
module attributes {stable_mosaic.version = 11 : i64} {
  func.func @_net_kernel(%arg0: i32, %arg1: memref<28x8x28xf32, #tpu.memory_space<vmem>>, %arg2: memref<5x28x216xf32, #tpu.memory_space<vmem>>, %arg3: memref<1x216xf32, #tpu.memory_space<vmem>>, %arg4: memref<5x108x128xf32, #tpu.memory_space<vmem>>, %arg5: memref<1x128xf32, #tpu.memory_space<vmem>>, %arg6: memref<4x64x120xf32, #tpu.memory_space<vmem>>, %arg7: memref<1x120xf32, #tpu.memory_space<vmem>>, %arg8: memref<120x60xf32, #tpu.memory_space<vmem>>, %arg9: memref<1x60xf32, #tpu.memory_space<vmem>>, %arg10: memref<8x60xf32, #tpu.memory_space<vmem>>) attributes {dimension_semantics = [#tpu.dimension_semantics<parallel>], iteration_bounds = array<i64: 1>, scalar_prefetch = 0 : i64, scratch_operands = 0 : i64, tpu.core_type = #tpu.core_type<tc>, window_params = [{transform_indices = @transform_0, window_bounds = array<i64: 28, 8, 28>}, {pipeline_mode = #tpu.pipeline_mode<synchronous>, transform_indices = @transform_1, window_bounds = array<i64: 5, 28, 216>}, {pipeline_mode = #tpu.pipeline_mode<synchronous>, transform_indices = @transform_2, window_bounds = array<i64: 1, 216>}, {pipeline_mode = #tpu.pipeline_mode<synchronous>, transform_indices = @transform_3, window_bounds = array<i64: 5, 108, 128>}, {pipeline_mode = #tpu.pipeline_mode<synchronous>, transform_indices = @transform_4, window_bounds = array<i64: 1, 128>}, {pipeline_mode = #tpu.pipeline_mode<synchronous>, transform_indices = @transform_5, window_bounds = array<i64: 4, 64, 120>}, {pipeline_mode = #tpu.pipeline_mode<synchronous>, transform_indices = @transform_6, window_bounds = array<i64: 1, 120>}, {pipeline_mode = #tpu.pipeline_mode<synchronous>, transform_indices = @transform_7, window_bounds = array<i64: 120, 60>}, {pipeline_mode = #tpu.pipeline_mode<synchronous>, transform_indices = @transform_8, window_bounds = array<i64: 1, 60>}, {transform_indices = @transform_9, window_bounds = array<i64: 8, 60>}]} {
    %c0 = arith.constant 0 : index
    %c0_0 = arith.constant 0 : index
    %c0_1 = arith.constant 0 : index
    %0 = vector.load %arg1[%c0, %c0_0, %c0_1] : memref<28x8x28xf32, #tpu.memory_space<vmem>>, vector<28x8x28xf32>
    %1 = vector.extract_strided_slice %0 {offsets = [0, 0, 0], sizes = [24, 8, 28], strides = [1, 1, 1]} : vector<28x8x28xf32> to vector<24x8x28xf32>
    %2 = vector.shape_cast %1 : vector<24x8x28xf32> to vector<192x28xf32>
    %c0_2 = arith.constant 0 : index
    %c0_3 = arith.constant 0 : index
    %c0_4 = arith.constant 0 : index
    %3 = vector.load %arg2[%c0_2, %c0_3, %c0_4] : memref<5x28x216xf32, #tpu.memory_space<vmem>>, vector<1x28x216xf32>
    %4 = vector.shape_cast %3 : vector<1x28x216xf32> to vector<28x216xf32>
    %cst = arith.constant dense<0.000000e+00> : vector<192x216xf32>
    %5 = tpu.matmul %2, %4, %cst {dimension_numbers = #tpu.dot_dimension_numbers<[1], [0], [0], [1], [0, 0, 1, 1], [], []>} : vector<192x28xf32>, vector<28x216xf32>, vector<192x216xf32> -> vector<192x216xf32>
    %6 = vector.extract_strided_slice %0 {offsets = [1, 0, 0], sizes = [24, 8, 28], strides = [1, 1, 1]} : vector<28x8x28xf32> to vector<24x8x28xf32>
    %7 = vector.shape_cast %6 : vector<24x8x28xf32> to vector<192x28xf32>
    %c1 = arith.constant 1 : index
    %c0_5 = arith.constant 0 : index
    %c0_6 = arith.constant 0 : index
    %8 = vector.load %arg2[%c1, %c0_5, %c0_6] : memref<5x28x216xf32, #tpu.memory_space<vmem>>, vector<1x28x216xf32>
    %9 = vector.shape_cast %8 : vector<1x28x216xf32> to vector<28x216xf32>
    %cst_7 = arith.constant dense<0.000000e+00> : vector<192x216xf32>
    %10 = tpu.matmul %7, %9, %cst_7 {dimension_numbers = #tpu.dot_dimension_numbers<[1], [0], [0], [1], [0, 0, 1, 1], [], []>} : vector<192x28xf32>, vector<28x216xf32>, vector<192x216xf32> -> vector<192x216xf32>
    %11 = arith.addf %5, %10 : vector<192x216xf32>
    %12 = vector.extract_strided_slice %0 {offsets = [2, 0, 0], sizes = [24, 8, 28], strides = [1, 1, 1]} : vector<28x8x28xf32> to vector<24x8x28xf32>
    %13 = vector.shape_cast %12 : vector<24x8x28xf32> to vector<192x28xf32>
    %c2 = arith.constant 2 : index
    %c0_8 = arith.constant 0 : index
    %c0_9 = arith.constant 0 : index
    %14 = vector.load %arg2[%c2, %c0_8, %c0_9] : memref<5x28x216xf32, #tpu.memory_space<vmem>>, vector<1x28x216xf32>
    %15 = vector.shape_cast %14 : vector<1x28x216xf32> to vector<28x216xf32>
    %cst_10 = arith.constant dense<0.000000e+00> : vector<192x216xf32>
    %16 = tpu.matmul %13, %15, %cst_10 {dimension_numbers = #tpu.dot_dimension_numbers<[1], [0], [0], [1], [0, 0, 1, 1], [], []>} : vector<192x28xf32>, vector<28x216xf32>, vector<192x216xf32> -> vector<192x216xf32>
    %17 = arith.addf %11, %16 : vector<192x216xf32>
    %18 = vector.extract_strided_slice %0 {offsets = [3, 0, 0], sizes = [24, 8, 28], strides = [1, 1, 1]} : vector<28x8x28xf32> to vector<24x8x28xf32>
    %19 = vector.shape_cast %18 : vector<24x8x28xf32> to vector<192x28xf32>
    %c3 = arith.constant 3 : index
    %c0_11 = arith.constant 0 : index
    %c0_12 = arith.constant 0 : index
    %20 = vector.load %arg2[%c3, %c0_11, %c0_12] : memref<5x28x216xf32, #tpu.memory_space<vmem>>, vector<1x28x216xf32>
    %21 = vector.shape_cast %20 : vector<1x28x216xf32> to vector<28x216xf32>
    %cst_13 = arith.constant dense<0.000000e+00> : vector<192x216xf32>
    %22 = tpu.matmul %19, %21, %cst_13 {dimension_numbers = #tpu.dot_dimension_numbers<[1], [0], [0], [1], [0, 0, 1, 1], [], []>} : vector<192x28xf32>, vector<28x216xf32>, vector<192x216xf32> -> vector<192x216xf32>
    %23 = arith.addf %17, %22 : vector<192x216xf32>
    %24 = vector.extract_strided_slice %0 {offsets = [4, 0, 0], sizes = [24, 8, 28], strides = [1, 1, 1]} : vector<28x8x28xf32> to vector<24x8x28xf32>
    %25 = vector.shape_cast %24 : vector<24x8x28xf32> to vector<192x28xf32>
    %c4 = arith.constant 4 : index
    %c0_14 = arith.constant 0 : index
    %c0_15 = arith.constant 0 : index
    %26 = vector.load %arg2[%c4, %c0_14, %c0_15] : memref<5x28x216xf32, #tpu.memory_space<vmem>>, vector<1x28x216xf32>
    %27 = vector.shape_cast %26 : vector<1x28x216xf32> to vector<28x216xf32>
    %cst_16 = arith.constant dense<0.000000e+00> : vector<192x216xf32>
    %28 = tpu.matmul %25, %27, %cst_16 {dimension_numbers = #tpu.dot_dimension_numbers<[1], [0], [0], [1], [0, 0, 1, 1], [], []>} : vector<192x28xf32>, vector<28x216xf32>, vector<192x216xf32> -> vector<192x216xf32>
    %29 = arith.addf %23, %28 : vector<192x216xf32>
    %c0_17 = arith.constant 0 : index
    %c0_18 = arith.constant 0 : index
    %30 = vector.load %arg3[%c0_17, %c0_18] : memref<1x216xf32, #tpu.memory_space<vmem>>, vector<1x216xf32>
    %31 = vector.broadcast %30 : vector<1x216xf32> to vector<192x216xf32>
    %32 = arith.addf %29, %31 : vector<192x216xf32>
    %cst_19 = arith.constant 0.000000e+00 : f32
    %33 = vector.broadcast %cst_19 : f32 to vector<192x216xf32>
    %34 = arith.maximumf %32, %33 : vector<192x216xf32>
    %35 = vector.shape_cast %34 : vector<192x216xf32> to vector<12x16x216xf32>
    %36 = vector.extract_strided_slice %35 {offsets = [0, 0, 0], sizes = [12, 8, 216], strides = [1, 1, 1]} : vector<12x16x216xf32> to vector<12x8x216xf32>
    %37 = vector.extract_strided_slice %35 {offsets = [0, 8, 0], sizes = [12, 8, 216], strides = [1, 1, 1]} : vector<12x16x216xf32> to vector<12x8x216xf32>
    %38 = arith.maximumf %36, %37 : vector<12x8x216xf32>
    %39 = vector.shape_cast %38 : vector<12x8x216xf32> to vector<96x216xf32>
    %40 = vector.extract_strided_slice %39 {offsets = [0, 0], sizes = [96, 108], strides = [1, 1]} : vector<96x216xf32> to vector<96x108xf32>
    %41 = vector.extract_strided_slice %39 {offsets = [0, 108], sizes = [96, 108], strides = [1, 1]} : vector<96x216xf32> to vector<96x108xf32>
    %42 = arith.maximumf %40, %41 : vector<96x108xf32>
    %43 = vector.extract_strided_slice %42 {offsets = [0, 0], sizes = [64, 108], strides = [1, 1]} : vector<96x108xf32> to vector<64x108xf32>
    %c0_20 = arith.constant 0 : index
    %c0_21 = arith.constant 0 : index
    %c0_22 = arith.constant 0 : index
    %44 = vector.load %arg4[%c0_20, %c0_21, %c0_22] : memref<5x108x128xf32, #tpu.memory_space<vmem>>, vector<1x108x128xf32>
    %45 = vector.shape_cast %44 : vector<1x108x128xf32> to vector<108x128xf32>
    %cst_23 = arith.constant dense<0.000000e+00> : vector<64x128xf32>
    %46 = tpu.matmul %43, %45, %cst_23 {dimension_numbers = #tpu.dot_dimension_numbers<[1], [0], [0], [1], [0, 0, 1, 1], [], []>} : vector<64x108xf32>, vector<108x128xf32>, vector<64x128xf32> -> vector<64x128xf32>
    %47 = vector.extract_strided_slice %42 {offsets = [8, 0], sizes = [64, 108], strides = [1, 1]} : vector<96x108xf32> to vector<64x108xf32>
    %c1_24 = arith.constant 1 : index
    %c0_25 = arith.constant 0 : index
    %c0_26 = arith.constant 0 : index
    %48 = vector.load %arg4[%c1_24, %c0_25, %c0_26] : memref<5x108x128xf32, #tpu.memory_space<vmem>>, vector<1x108x128xf32>
    %49 = vector.shape_cast %48 : vector<1x108x128xf32> to vector<108x128xf32>
    %cst_27 = arith.constant dense<0.000000e+00> : vector<64x128xf32>
    %50 = tpu.matmul %47, %49, %cst_27 {dimension_numbers = #tpu.dot_dimension_numbers<[1], [0], [0], [1], [0, 0, 1, 1], [], []>} : vector<64x108xf32>, vector<108x128xf32>, vector<64x128xf32> -> vector<64x128xf32>
    %51 = arith.addf %46, %50 : vector<64x128xf32>
    %52 = vector.extract_strided_slice %42 {offsets = [16, 0], sizes = [64, 108], strides = [1, 1]} : vector<96x108xf32> to vector<64x108xf32>
    %c2_28 = arith.constant 2 : index
    %c0_29 = arith.constant 0 : index
    %c0_30 = arith.constant 0 : index
    %53 = vector.load %arg4[%c2_28, %c0_29, %c0_30] : memref<5x108x128xf32, #tpu.memory_space<vmem>>, vector<1x108x128xf32>
    %54 = vector.shape_cast %53 : vector<1x108x128xf32> to vector<108x128xf32>
    %cst_31 = arith.constant dense<0.000000e+00> : vector<64x128xf32>
    %55 = tpu.matmul %52, %54, %cst_31 {dimension_numbers = #tpu.dot_dimension_numbers<[1], [0], [0], [1], [0, 0, 1, 1], [], []>} : vector<64x108xf32>, vector<108x128xf32>, vector<64x128xf32> -> vector<64x128xf32>
    %56 = arith.addf %51, %55 : vector<64x128xf32>
    %57 = vector.extract_strided_slice %42 {offsets = [24, 0], sizes = [64, 108], strides = [1, 1]} : vector<96x108xf32> to vector<64x108xf32>
    %c3_32 = arith.constant 3 : index
    %c0_33 = arith.constant 0 : index
    %c0_34 = arith.constant 0 : index
    %58 = vector.load %arg4[%c3_32, %c0_33, %c0_34] : memref<5x108x128xf32, #tpu.memory_space<vmem>>, vector<1x108x128xf32>
    %59 = vector.shape_cast %58 : vector<1x108x128xf32> to vector<108x128xf32>
    %cst_35 = arith.constant dense<0.000000e+00> : vector<64x128xf32>
    %60 = tpu.matmul %57, %59, %cst_35 {dimension_numbers = #tpu.dot_dimension_numbers<[1], [0], [0], [1], [0, 0, 1, 1], [], []>} : vector<64x108xf32>, vector<108x128xf32>, vector<64x128xf32> -> vector<64x128xf32>
    %61 = arith.addf %56, %60 : vector<64x128xf32>
    %62 = vector.extract_strided_slice %42 {offsets = [32, 0], sizes = [64, 108], strides = [1, 1]} : vector<96x108xf32> to vector<64x108xf32>
    %c4_36 = arith.constant 4 : index
    %c0_37 = arith.constant 0 : index
    %c0_38 = arith.constant 0 : index
    %63 = vector.load %arg4[%c4_36, %c0_37, %c0_38] : memref<5x108x128xf32, #tpu.memory_space<vmem>>, vector<1x108x128xf32>
    %64 = vector.shape_cast %63 : vector<1x108x128xf32> to vector<108x128xf32>
    %cst_39 = arith.constant dense<0.000000e+00> : vector<64x128xf32>
    %65 = tpu.matmul %62, %64, %cst_39 {dimension_numbers = #tpu.dot_dimension_numbers<[1], [0], [0], [1], [0, 0, 1, 1], [], []>} : vector<64x108xf32>, vector<108x128xf32>, vector<64x128xf32> -> vector<64x128xf32>
    %66 = arith.addf %61, %65 : vector<64x128xf32>
    %c0_40 = arith.constant 0 : index
    %c0_41 = arith.constant 0 : index
    %67 = vector.load %arg5[%c0_40, %c0_41] : memref<1x128xf32, #tpu.memory_space<vmem>>, vector<1x128xf32>
    %68 = vector.broadcast %67 : vector<1x128xf32> to vector<64x128xf32>
    %69 = arith.addf %66, %68 : vector<64x128xf32>
    %cst_42 = arith.constant 0.000000e+00 : f32
    %70 = vector.broadcast %cst_42 : f32 to vector<64x128xf32>
    %71 = arith.maximumf %69, %70 : vector<64x128xf32>
    %72 = vector.shape_cast %71 : vector<64x128xf32> to vector<4x16x128xf32>
    %73 = vector.extract_strided_slice %72 {offsets = [0, 0, 0], sizes = [4, 8, 128], strides = [1, 1, 1]} : vector<4x16x128xf32> to vector<4x8x128xf32>
    %74 = vector.extract_strided_slice %72 {offsets = [0, 8, 0], sizes = [4, 8, 128], strides = [1, 1, 1]} : vector<4x16x128xf32> to vector<4x8x128xf32>
    %75 = arith.maximumf %73, %74 : vector<4x8x128xf32>
    %76 = vector.shape_cast %75 : vector<4x8x128xf32> to vector<32x128xf32>
    %77 = vector.extract_strided_slice %76 {offsets = [0, 0], sizes = [32, 64], strides = [1, 1]} : vector<32x128xf32> to vector<32x64xf32>
    %78 = vector.extract_strided_slice %76 {offsets = [0, 64], sizes = [32, 64], strides = [1, 1]} : vector<32x128xf32> to vector<32x64xf32>
    %79 = arith.maximumf %77, %78 : vector<32x64xf32>
    %80 = vector.extract_strided_slice %79 {offsets = [0, 0], sizes = [8, 64], strides = [1, 1]} : vector<32x64xf32> to vector<8x64xf32>
    %c0_43 = arith.constant 0 : index
    %c0_44 = arith.constant 0 : index
    %c0_45 = arith.constant 0 : index
    %81 = vector.load %arg6[%c0_43, %c0_44, %c0_45] : memref<4x64x120xf32, #tpu.memory_space<vmem>>, vector<1x64x120xf32>
    %82 = vector.shape_cast %81 : vector<1x64x120xf32> to vector<64x120xf32>
    %cst_46 = arith.constant dense<0.000000e+00> : vector<8x120xf32>
    %83 = tpu.matmul %80, %82, %cst_46 {dimension_numbers = #tpu.dot_dimension_numbers<[1], [0], [0], [1], [0, 0, 1, 1], [], []>} : vector<8x64xf32>, vector<64x120xf32>, vector<8x120xf32> -> vector<8x120xf32>
    %84 = vector.extract_strided_slice %79 {offsets = [8, 0], sizes = [8, 64], strides = [1, 1]} : vector<32x64xf32> to vector<8x64xf32>
    %c1_47 = arith.constant 1 : index
    %c0_48 = arith.constant 0 : index
    %c0_49 = arith.constant 0 : index
    %85 = vector.load %arg6[%c1_47, %c0_48, %c0_49] : memref<4x64x120xf32, #tpu.memory_space<vmem>>, vector<1x64x120xf32>
    %86 = vector.shape_cast %85 : vector<1x64x120xf32> to vector<64x120xf32>
    %cst_50 = arith.constant dense<0.000000e+00> : vector<8x120xf32>
    %87 = tpu.matmul %84, %86, %cst_50 {dimension_numbers = #tpu.dot_dimension_numbers<[1], [0], [0], [1], [0, 0, 1, 1], [], []>} : vector<8x64xf32>, vector<64x120xf32>, vector<8x120xf32> -> vector<8x120xf32>
    %88 = arith.addf %83, %87 : vector<8x120xf32>
    %89 = vector.extract_strided_slice %79 {offsets = [16, 0], sizes = [8, 64], strides = [1, 1]} : vector<32x64xf32> to vector<8x64xf32>
    %c2_51 = arith.constant 2 : index
    %c0_52 = arith.constant 0 : index
    %c0_53 = arith.constant 0 : index
    %90 = vector.load %arg6[%c2_51, %c0_52, %c0_53] : memref<4x64x120xf32, #tpu.memory_space<vmem>>, vector<1x64x120xf32>
    %91 = vector.shape_cast %90 : vector<1x64x120xf32> to vector<64x120xf32>
    %cst_54 = arith.constant dense<0.000000e+00> : vector<8x120xf32>
    %92 = tpu.matmul %89, %91, %cst_54 {dimension_numbers = #tpu.dot_dimension_numbers<[1], [0], [0], [1], [0, 0, 1, 1], [], []>} : vector<8x64xf32>, vector<64x120xf32>, vector<8x120xf32> -> vector<8x120xf32>
    %93 = arith.addf %88, %92 : vector<8x120xf32>
    %94 = vector.extract_strided_slice %79 {offsets = [24, 0], sizes = [8, 64], strides = [1, 1]} : vector<32x64xf32> to vector<8x64xf32>
    %c3_55 = arith.constant 3 : index
    %c0_56 = arith.constant 0 : index
    %c0_57 = arith.constant 0 : index
    %95 = vector.load %arg6[%c3_55, %c0_56, %c0_57] : memref<4x64x120xf32, #tpu.memory_space<vmem>>, vector<1x64x120xf32>
    %96 = vector.shape_cast %95 : vector<1x64x120xf32> to vector<64x120xf32>
    %cst_58 = arith.constant dense<0.000000e+00> : vector<8x120xf32>
    %97 = tpu.matmul %94, %96, %cst_58 {dimension_numbers = #tpu.dot_dimension_numbers<[1], [0], [0], [1], [0, 0, 1, 1], [], []>} : vector<8x64xf32>, vector<64x120xf32>, vector<8x120xf32> -> vector<8x120xf32>
    %98 = arith.addf %93, %97 : vector<8x120xf32>
    %c0_59 = arith.constant 0 : index
    %c0_60 = arith.constant 0 : index
    %99 = vector.load %arg7[%c0_59, %c0_60] : memref<1x120xf32, #tpu.memory_space<vmem>>, vector<1x120xf32>
    %100 = vector.broadcast %99 : vector<1x120xf32> to vector<8x120xf32>
    %101 = arith.addf %98, %100 : vector<8x120xf32>
    %cst_61 = arith.constant 0.000000e+00 : f32
    %102 = vector.broadcast %cst_61 : f32 to vector<8x120xf32>
    %103 = arith.maximumf %101, %102 : vector<8x120xf32>
    %c0_62 = arith.constant 0 : index
    %c0_63 = arith.constant 0 : index
    %104 = vector.load %arg8[%c0_62, %c0_63] : memref<120x60xf32, #tpu.memory_space<vmem>>, vector<120x60xf32>
    %cst_64 = arith.constant dense<0.000000e+00> : vector<8x60xf32>
    %105 = tpu.matmul %103, %104, %cst_64 {dimension_numbers = #tpu.dot_dimension_numbers<[1], [0], [0], [1], [0, 0, 1, 1], [], []>} : vector<8x120xf32>, vector<120x60xf32>, vector<8x60xf32> -> vector<8x60xf32>
    %c0_65 = arith.constant 0 : index
    %c0_66 = arith.constant 0 : index
    %106 = vector.load %arg9[%c0_65, %c0_66] : memref<1x60xf32, #tpu.memory_space<vmem>>, vector<1x60xf32>
    %107 = vector.broadcast %106 : vector<1x60xf32> to vector<8x60xf32>
    %108 = arith.addf %105, %107 : vector<8x60xf32>
    %cst_67 = arith.constant 0.000000e+00 : f32
    %109 = vector.broadcast %cst_67 : f32 to vector<8x60xf32>
    %110 = arith.maximumf %108, %109 : vector<8x60xf32>
    %cst_68 = arith.constant dense<0xFF800000> : vector<8xf32>
    %111 = vector.multi_reduction <maximumf>, %110, %cst_68 [1] : vector<8x60xf32> to vector<8xf32>
    %112 = vector.shape_cast %111 : vector<8xf32> to vector<8x1xf32>
    %113 = vector.broadcast %112 : vector<8x1xf32> to vector<8x60xf32>
    %114 = arith.subf %110, %113 : vector<8x60xf32>
    %115 = math.exp %114 : vector<8x60xf32>
    %cst_69 = arith.constant dense<0.000000e+00> : vector<8xf32>
    %116 = vector.multi_reduction <add>, %115, %cst_69 [1] : vector<8x60xf32> to vector<8xf32>
    %117 = vector.shape_cast %116 : vector<8xf32> to vector<8x1xf32>
    %118 = math.log %117 : vector<8x1xf32>
    %119 = vector.broadcast %118 : vector<8x1xf32> to vector<8x60xf32>
    %120 = arith.subf %114, %119 : vector<8x60xf32>
    %c0_70 = arith.constant 0 : index
    %c0_71 = arith.constant 0 : index
    %121 = vector.load %arg10[%c0_70, %c0_71] : memref<8x60xf32, #tpu.memory_space<vmem>>, vector<8x60xf32>
    tpu.vector_store %arg10[%c0_70, %c0_71], %120 {strides = array<i32>} : memref<8x60xf32, #tpu.memory_space<vmem>>, vector<8x60xf32>,
    return
  }
  func.func @transform_0(%arg0: i32) -> (i32, i32, i32) {
    %c0_i32 = arith.constant 0 : i32
    %c0_i32_0 = arith.constant 0 : i32
    %c0_i32_1 = arith.constant 0 : i32
    return %c0_i32, %arg0, %c0_i32_0 : i32, i32, i32
  }
  func.func @transform_1(%arg0: i32) -> (i32, i32, i32) {
    %c0_i32 = arith.constant 0 : i32
    %c0_i32_0 = arith.constant 0 : i32
    %c0_i32_1 = arith.constant 0 : i32
    %c0_i32_2 = arith.constant 0 : i32
    return %c0_i32, %c0_i32_0, %c0_i32_1 : i32, i32, i32
  }
  func.func @transform_2(%arg0: i32) -> (i32, i32) {
    %c0_i32 = arith.constant 0 : i32
    %c0_i32_0 = arith.constant 0 : i32
    %c0_i32_1 = arith.constant 0 : i32
    return %c0_i32, %c0_i32_0 : i32, i32
  }
  func.func @transform_3(%arg0: i32) -> (i32, i32, i32) {
    %c0_i32 = arith.constant 0 : i32
    %c0_i32_0 = arith.constant 0 : i32
    %c0_i32_1 = arith.constant 0 : i32
    %c0_i32_2 = arith.constant 0 : i32
    return %c0_i32, %c0_i32_0, %c0_i32_1 : i32, i32, i32
  }
  func.func @transform_4(%arg0: i32) -> (i32, i32) {
    %c0_i32 = arith.constant 0 : i32
    %c0_i32_0 = arith.constant 0 : i32
    %c0_i32_1 = arith.constant 0 : i32
    return %c0_i32, %c0_i32_0 : i32, i32
  }
  func.func @transform_5(%arg0: i32) -> (i32, i32, i32) {
    %c0_i32 = arith.constant 0 : i32
    %c0_i32_0 = arith.constant 0 : i32
    %c0_i32_1 = arith.constant 0 : i32
    %c0_i32_2 = arith.constant 0 : i32
    return %c0_i32, %c0_i32_0, %c0_i32_1 : i32, i32, i32
  }
  func.func @transform_6(%arg0: i32) -> (i32, i32) {
    %c0_i32 = arith.constant 0 : i32
    %c0_i32_0 = arith.constant 0 : i32
    %c0_i32_1 = arith.constant 0 : i32
    return %c0_i32, %c0_i32_0 : i32, i32
  }
  func.func @transform_7(%arg0: i32) -> (i32, i32) {
    %c0_i32 = arith.constant 0 : i32
    %c0_i32_0 = arith.constant 0 : i32
    %c0_i32_1 = arith.constant 0 : i32
    return %c0_i32, %c0_i32_0 : i32, i32
  }
  func.func @transform_8(%arg0: i32) -> (i32, i32) {
    %c0_i32 = arith.constant 0 : i32
    %c0_i32_0 = arith.constant 0 : i32
    %c0_i32_1 = arith.constant 0 : i32
    return %c0_i32, %c0_i32_0 : i32, i32
  }
  func.func @transform_9(%arg0: i32) -> (i32, i32) {
    %c0_i32 = arith.constant 0 : i32
    %c0_i32_0 = arith.constant 0 : i32
    return %arg0, %c0_i32 : i32, i32
  }
}

</mosaic_0001>

<bundles_post_ra>
// kernel: tile.9
= control target key start
LH: loop header
LB: loop body
LE: loop exit
PB: predicated region body
PF: predicated region fallthrough
CT: control target
= control target key end

     0   :  { %s77_s10 = smov 96   ;;  %s78_s11 = smov 72   ;;  %vm3_vm0 = vcmask 97280   ;;  %vm9_vm1 = vcmask 884480   ;;  %vm15_vm2 = vcmask 786080   ;;  %vm21_vm3 = vcmask 687680   ;;  %s125_s0 = inlined_call_operand.vmem [shape: f32[9,12], index: 0, kind: input, shape index: {}]   ;;  %s126_s1 = inlined_call_operand.vmem [shape: f32[108], index: 1, kind: output, shape index: {}]  }
   0x1   :  { %v61_v0 = vld [vmem:[%s125_s0 + $0x8] sm:$0x1]   ;;  %v63_v1 = vld [vmem:[%s125_s0 + $0x6] sm:$0x1]   ;;  %v62_v2 = vld [vmem:[%s125_s0 + $0x7] sm:$0x1]  }
   0x2   :  { %7 = vrot.lane.b32.xlu0 %v61_v0, %s77_s10  ;;  %19 = vrot.lane.b32.xlu1 %v63_v1, %s78_s11  ;;  %v64_v3 = vld [vmem:[%s125_s0 + $0x5] sm:$0x1]   ;;  %v2_v4 = vld [vmem:[%s125_s0] sm:$0x1]   ;;  %s79_s18 = smov 84   ;;  %s80_s19 = smov 60  }
   0x3   :  { %4 = vst.msk [vmem:[#allocation0] sm:$0x1] %vm3_vm0, %v2_v4   ;;  %v65_v5 = vld [vmem:[%s125_s0 + $0x4] sm:$0x1]   ;;  %v66_v6 = vld [vmem:[%s125_s0 + $0x3] sm:$0x1]  }
   0x4   :  { %s81_s24 = smov 48   ;;  %s82_s25 = smov 36   ;;  %v67_v7 = vld [vmem:[%s125_s0 + $0x2] sm:$0x1]   ;;  %v68_v8 = vld [vmem:[%s125_s0 + $0x1] sm:$0x1]  }
   0x5   :  { %s83_s0 = smov 24   ;;  %s84_s30 = smov 12   ;;  %vm27_vm4 = vcmask 589280   ;;  %vm33_vm5 = vcmask 490880   ;;  %vm39_vm6 = vcmask 392480   ;;  %vm45_vm7 = vcmask 294080  }
   0x6   :  { %13 = vrot.lane.b32.xlu0 %v62_v2, %s79_s18  ;;  %25 = vrot.lane.b32.xlu1 %v64_v3, %s80_s19  ;;  %vm51_vm8 = vcmask 195680  }
   0xa   :  { %31 = vrot.lane.b32.xlu0 %v65_v5, %s81_s24  ;;  %37 = vrot.lane.b32.xlu1 %v66_v6, %s82_s25 }
   0xe   :  { %43 = vrot.lane.b32.xlu0 %v67_v7, %s83_s0  ;;  %49 = vrot.lane.b32.xlu1 %v68_v8, %s84_s30 }
  0x74   :  { %v8_v9 = vpop.permute.xlu0 %7   ;;  %v20_v10 = vpop.permute.xlu1 %19  }
  0x75   :  { %10 = vst.msk [vmem:[#allocation0] sm:$0x1] %vm9_vm1, %v8_v9  }
  0x78   :  { %v14_v11 = vpop.permute.xlu0 %13   ;;  %v26_v12 = vpop.permute.xlu1 %25  }
  0x79   :  { %16 = vst.msk [vmem:[#allocation0] sm:$0x1] %vm15_vm2, %v14_v11  }
  0x7a   :  { %22 = vst.msk [vmem:[#allocation0] sm:$0x1] %vm21_vm3, %v20_v10  }
  0x7b   :  { %28 = vst.msk [vmem:[#allocation0] sm:$0x1] %vm27_vm4, %v26_v12  }
  0x7c   :  { %v32_v13 = vpop.permute.xlu0 %31   ;;  %v38_v14 = vpop.permute.xlu1 %37  }
  0x7d   :  { %34 = vst.msk [vmem:[#allocation0] sm:$0x1] %vm33_vm5, %v32_v13  }
  0x7e   :  { %40 = vst.msk [vmem:[#allocation0] sm:$0x1] %vm39_vm6, %v38_v14  }
  0x80   :  { %v44_v15 = vpop.permute.xlu0 %43   ;;  %v50_v16 = vpop.permute.xlu1 %49  }
  0x81   :  { %46 = vst.msk [vmem:[#allocation0] sm:$0x1] %vm45_vm7, %v44_v15  }
  0x82   :  { %52 = vst.msk [vmem:[#allocation0] sm:$0x1] %vm51_vm8, %v50_v16  }
  0x89   :  { %v57_v17 = vld [vmem:[#allocation0] sm:$0x1] }
  0x8a   :  { %60 = vst [vmem:[%s126_s1] sm:$0x1] %v57_v17 }

// kernel: tile.10
= control target key start
LH: loop header
LB: loop body
LE: loop exit
PB: predicated region body
PF: predicated region fallthrough
CT: control target
= control target key end

     0   :  { %s22_s0 = inlined_call_operand.vmem [shape: f32[108], index: 0, kind: input, shape index: {}]   ;;  %s23_s1 = inlined_call_operand.vmem [shape: f32[2,108], index: 1, kind: output, shape index: {}]  }
   0x1   :  { %v4_v0 = vld [vmem:[%s22_s0] ss:$0 sm:$0xff] }
   0x2   :  { %5 = vst [vmem:[%s23_s1] sm:$0x3] %v4_v0 }

// kernel: tile.11
= control target key start
LH: loop header
LB: loop body
LE: loop exit
PB: predicated region body
PF: predicated region fallthrough
CT: control target
= control target key end

     0   :  { %vm14_vm0 = vcmask 162816   ;;  %vm8_vm1 = vcmask 883712   ;;  %vm18_vm2 = vcmask 719872   ;;  %vm21_vm3 = vcmask 1048416   ;;  %s59_s0 = inlined_call_operand.vmem [shape: f32[2,108], index: 0, kind: input, shape index: {}]   ;;  %s60_s1 = inlined_call_operand.vmem [shape: f32[1,216], index: 1, kind: output, shape index: {}]  }
   0x1   :  { %v5_v0 = vld [vmem:[%s59_s0] sm:$0x3]  ;;  %s39_s0 = smov 108  }
   0x2   :  { %6 = vst [vmem:[#allocation1] sm:$0x3] %v5_v0 }
   0x9   :  { %v11_v1 = vld [vmem:[#allocation1 + $0x1] sm:$0x1]   ;;  %v7_v3 = vld [vmem:[#allocation1] sm:$0x1]  }
   0xa   :  { %v13_v2 = vld [vmem:[#allocation1 + $0x1] sm:$0x1]   ;;  %9 = vst.msk [vmem:[#allocation0] sm:$0x1] %vm8_vm1, %v7_v3  }
   0xb   :  { %v15_v4 = vsel %vm14_vm0, %v13_v2, %v11_v1 }
   0xc   :  { %16 = vrot.lane.b32.xlu0 %v15_v4, %s39_s0 }
  0x7e   :  { %v17_v5 = vpop.permute.xlu0 %16  }
  0x7f   :  { %20 = vst.msk [vmem:[#allocation0 + $0x8] sm:$0x1] %vm18_vm2, %v17_v5  }
  0x80   :  { %22 = vst.msk [vmem:[#allocation0] sm:$0x1] %vm21_vm3, %v17_v5  }
  0x86   :  { %v32_v7 = vld [vmem:[#allocation0 + $0x8] sm:$0x1] }
  0x87   :  { %v27_v6 = vld [vmem:[#allocation0] sm:$0x1]  ;;  %37 = vst [vmem:[%s60_s1 + $0x1] sm:$0x1] %v32_v7 }
  0x88   :  { %30 = vst [vmem:[%s60_s1] sm:$0x1] %v27_v6 }

// kernel: tile.13
= control target key start
LH: loop header
LB: loop body
LE: loop exit
PB: predicated region body
PF: predicated region fallthrough
CT: control target
= control target key end

     0   :  { %s133_s10 = smov 60   ;;  %s134_s11 = smov 52   ;;  %vm3_vm0 = vcmask 31744   ;;  %vm9_vm1 = vcmask 523744   ;;  %vm15_vm2 = vcmask 490944   ;;  %vm21_vm3 = vcmask 458144   ;;  %s209_s0 = inlined_call_operand.vmem [shape: f32[16,4], index: 0, kind: input, shape index: {}]   ;;  %s210_s1 = inlined_call_operand.vmem [shape: f32[64], index: 1, kind: output, shape index: {}]  }
   0x1   :  { %v103_v0 = vld [vmem:[%s209_s0 + $0xf] sm:$0x1]   ;;  %v105_v1 = vld [vmem:[%s209_s0 + $0xd] sm:$0x1]   ;;  %v104_v2 = vld [vmem:[%s209_s0 + $0xe] sm:$0x1]  }
   0x2   :  { %7 = vrot.lane.b32.xlu0 %v103_v0, %s133_s10  ;;  %19 = vrot.lane.b32.xlu1 %v105_v1, %s134_s11  ;;  %v106_v3 = vld [vmem:[%s209_s0 + $0xc] sm:$0x1]   ;;  %s135_s16 = smov 56   ;;  %s136_s17 = smov 48   ;;  %v107_v4 = vld [vmem:[%s209_s0 + $0xb] sm:$0x1]  }
   0x3   :  { %v108_v5 = vld [vmem:[%s209_s0 + $0xa] sm:$0x1]   ;;  %v2_v6 = vld [vmem:[%s209_s0] sm:$0x1]   ;;  %s137_s24 = smov 44   ;;  %s138_s25 = smov 40  }
   0x4   :  { %4 = vst.msk [vmem:[#allocation0] sm:$0x1] %vm3_vm0, %v2_v6   ;;  %v109_v7 = vld [vmem:[%s209_s0 + $0x9] sm:$0x1]   ;;  %v110_v8 = vld [vmem:[%s209_s0 + $0x8] sm:$0x1]  }
   0x5   :  { %s139_s30 = smov 36   ;;  %s140_s2 = smov 32   ;;  %v111_v9 = vld [vmem:[%s209_s0 + $0x7] sm:$0x1]   ;;  %v112_v10 = vld [vmem:[%s209_s0 + $0x6] sm:$0x1]  }
   0x6   :  { %13 = vrot.lane.b32.xlu0 %v104_v2, %s135_s16  ;;  %25 = vrot.lane.b32.xlu1 %v106_v3, %s136_s17  ;;  %s141_s7 = smov 28   ;;  %s142_s8 = smov 24   ;;  %v113_v11 = vld [vmem:[%s209_s0 + $0x5] sm:$0x1]   ;;  %v114_v12 = vld [vmem:[%s209_s0 + $0x4] sm:$0x1]  }
   0x7   :  { %s143_s13 = smov 20   ;;  %s144_s14 = smov 16   ;;  %v115_v13 = vld [vmem:[%s209_s0 + $0x3] sm:$0x1]   ;;  %v116_v14 = vld [vmem:[%s209_s0 + $0x2] sm:$0x1]  }
   0x8   :  { %s145_s19 = smov 12   ;;  %s146_s20 = smov 8   ;;  %v117_v15 = vld [vmem:[%s209_s0 + $0x1] sm:$0x1]   ;;  %vm27_vm4 = vcmask 425344   ;;  %vm33_vm5 = vcmask 392544  }
   0x9   :  { %s147_s0 = smov 4   ;;  %vm39_vm6 = vcmask 359744   ;;  %vm45_vm7 = vcmask 326944   ;;  %vm51_vm8 = vcmask 294144   ;;  %vm57_vm9 = vcmask 261344  }
   0xa   :  { %31 = vrot.lane.b32.xlu0 %v107_v4, %s137_s24  ;;  %37 = vrot.lane.b32.xlu1 %v108_v5, %s138_s25  ;;  %vm63_vm10 = vcmask 228544   ;;  %vm69_vm11 = vcmask 195744   ;;  %vm75_vm12 = vcmask 162944   ;;  %vm81_vm13 = vcmask 130144  }
   0xb   :  { %vm87_vm14 = vcmask 97344   ;;  %vm93_vm15 = vcmask 64544  }
   0xe   :  { %43 = vrot.lane.b32.xlu0 %v109_v7, %s139_s30  ;;  %49 = vrot.lane.b32.xlu1 %v110_v8, %s140_s2 }
  0x12   :  { %55 = vrot.lane.b32.xlu0 %v111_v9, %s141_s7  ;;  %61 = vrot.lane.b32.xlu1 %v112_v10, %s142_s8 }
  0x16   :  { %67 = vrot.lane.b32.xlu0 %v113_v11, %s143_s13  ;;  %73 = vrot.lane.b32.xlu1 %v114_v12, %s144_s14 }
  0x1a   :  { %79 = vrot.lane.b32.xlu0 %v115_v13, %s145_s19  ;;  %85 = vrot.lane.b32.xlu1 %v116_v14, %s146_s20 }
  0x1e   :  { %91 = vrot.lane.b32.xlu0 %v117_v15, %s147_s0 }
  0x74   :  { %v8_v16 = vpop.permute.xlu0 %7   ;;  %v20_v17 = vpop.permute.xlu1 %19  }
  0x75   :  { %10 = vst.msk [vmem:[#allocation0] sm:$0x1] %vm9_vm1, %v8_v16  }
  0x78   :  { %v14_v18 = vpop.permute.xlu0 %13   ;;  %v26_v19 = vpop.permute.xlu1 %25  }
  0x79   :  { %16 = vst.msk [vmem:[#allocation0] sm:$0x1] %vm15_vm2, %v14_v18  }
  0x7a   :  { %22 = vst.msk [vmem:[#allocation0] sm:$0x1] %vm21_vm3, %v20_v17  }
  0x7b   :  { %28 = vst.msk [vmem:[#allocation0] sm:$0x1] %vm27_vm4, %v26_v19  }
  0x7c   :  { %v32_v20 = vpop.permute.xlu0 %31   ;;  %v38_v21 = vpop.permute.xlu1 %37  }
  0x7d   :  { %34 = vst.msk [vmem:[#allocation0] sm:$0x1] %vm33_vm5, %v32_v20  }
  0x7e   :  { %40 = vst.msk [vmem:[#allocation0] sm:$0x1] %vm39_vm6, %v38_v21  }
  0x80   :  { %v44_v22 = vpop.permute.xlu0 %43   ;;  %v50_v23 = vpop.permute.xlu1 %49  }
  0x81   :  { %46 = vst.msk [vmem:[#allocation0] sm:$0x1] %vm45_vm7, %v44_v22  }
  0x82   :  { %52 = vst.msk [vmem:[#allocation0] sm:$0x1] %vm51_vm8, %v50_v23  }
  0x84   :  { %v56_v24 = vpop.permute.xlu0 %55   ;;  %v62_v25 = vpop.permute.xlu1 %61  }
  0x85   :  { %58 = vst.msk [vmem:[#allocation0] sm:$0x1] %vm57_vm9, %v56_v24  }
  0x86   :  { %64 = vst.msk [vmem:[#allocation0] sm:$0x1] %vm63_vm10, %v62_v25  }
  0x88   :  { %v68_v26 = vpop.permute.xlu0 %67   ;;  %v74_v27 = vpop.permute.xlu1 %73  }
  0x89   :  { %70 = vst.msk [vmem:[#allocation0] sm:$0x1] %vm69_vm11, %v68_v26  }
  0x8a   :  { %76 = vst.msk [vmem:[#allocation0] sm:$0x1] %vm75_vm12, %v74_v27  }
  0x8c   :  { %v80_v28 = vpop.permute.xlu0 %79   ;;  %v86_v29 = vpop.permute.xlu1 %85  }
  0x8d   :  { %82 = vst.msk [vmem:[#allocation0] sm:$0x1] %vm81_vm13, %v80_v28  }
  0x8e   :  { %88 = vst.msk [vmem:[#allocation0] sm:$0x1] %vm87_vm14, %v86_v29  }
  0x90   :  { %v92_v30 = vpop.permute.xlu0 %91  }
  0x91   :  { %94 = vst.msk [vmem:[#allocation0] sm:$0x1] %vm93_vm15, %v92_v30  }
  0x98   :  { %v99_v31 = vld [vmem:[#allocation0] sm:$0x1] }
  0x99   :  { %102 = vst [vmem:[%s210_s1] sm:$0x1] %v99_v31 }

// kernel: tile.14
= control target key start
LH: loop header
LB: loop body
LE: loop exit
PB: predicated region body
PF: predicated region fallthrough
CT: control target
= control target key end

     0   :  { %s22_s0 = inlined_call_operand.vmem [shape: f32[64], index: 0, kind: input, shape index: {}]   ;;  %s23_s1 = inlined_call_operand.vmem [shape: f32[2,64], index: 1, kind: output, shape index: {}]  }
   0x1   :  { %v4_v0 = vld [vmem:[%s22_s0] ss:$0 sm:$0xff] }
   0x2   :  { %5 = vst [vmem:[%s23_s1] sm:$0x3] %v4_v0 }

// kernel: tile.15
= control target key start
LH: loop header
LB: loop body
LE: loop exit
PB: predicated region body
PF: predicated region fallthrough
CT: control target
= control target key end

     0   :  { %vm8_vm0 = vcmask 523264   ;;  %vm14_vm1 = vcmask 1048064   ;;  %s42_s0 = inlined_call_operand.vmem [shape: f32[2,64], index: 0, kind: input, shape index: {}]   ;;  %s43_s1 = inlined_call_operand.vmem [shape: f32[1,128], index: 1, kind: output, shape index: {}]  }
   0x1   :  { %v5_v0 = vld [vmem:[%s42_s0] sm:$0x3]  ;;  %s25_s0 = smov 64  }
   0x2   :  { %6 = vst [vmem:[#allocation1] sm:$0x3] %v5_v0 }
   0x9   :  { %v11_v1 = vld [vmem:[#allocation1 + $0x1] sm:$0x1]   ;;  %v7_v2 = vld [vmem:[#allocation1] sm:$0x1]  }
   0xa   :  { %12 = vrot.lane.b32.xlu0 %v11_v1, %s25_s0  ;;  %9 = vst.msk [vmem:[#allocation0] sm:$0x1] %vm8_vm0, %v7_v2  }
  0x7c   :  { %v13_v3 = vpop.permute.xlu0 %12  }
  0x7d   :  { %15 = vst.msk [vmem:[#allocation0] sm:$0x1] %vm14_vm1, %v13_v3  }
  0x84   :  { %v20_v4 = vld [vmem:[#allocation0] sm:$0x1] }
  0x85   :  { %23 = vst [vmem:[%s43_s1] sm:$0x1] %v20_v4 }

// kernel: net_forward.1
= control target key start
LH: loop header
LB: loop body
LE: loop exit
PB: predicated region body
PF: predicated region fallthrough
CT: control target
= control target key end

     0   :  { %vm150_vm0 = vcmask 1043456   ;;  %v5427_v3 = vmov 0.0   ;;  %vm77_vm1 = vcmask 228352   ;;  %s3609_s29 = smov 20   ;;  %vm1613_vm2 = vcmask 162816   ;;  %s5417_s1 = inlined_call_operand.vmem [shape: f32[5,28,216], index: 1, kind: input, shape index: {}]   ;;  %s5418_s0 = inlined_call_operand.vmem [shape: f32[28,8,28], index: 0, kind: input, shape index: {}]   ;;  %s5419_s3 = inlined_call_operand.vmem [shape: f32[5,108,128], index: 3, kind: input, shape index: {}]   ;;  %s5420_s2 = inlined_call_operand.vmem [shape: f32[1,216], index: 2, kind: input, shape index: {}]   ;;  %s5421_s5 = inlined_call_operand.vmem [shape: f32[4,64,120], index: 5, kind: input, shape index: {}]   ;;  %s5422_s4 = inlined_call_operand.vmem [shape: f32[1,128], index: 4, kind: input, shape index: {}]   ;;  %s5423_s7 = inlined_call_operand.vmem [shape: f32[120,60], index: 7, kind: input, shape index: {}]   ;;  %s5424_s6 = inlined_call_operand.vmem [shape: f32[1,120], index: 6, kind: input, shape index: {}]   ;;  %s5425_s8 = inlined_call_operand.vmem [shape: f32[1,60], index: 8, kind: input, shape index: {}]   ;;  %s5426_s9 = inlined_call_operand.vmem [shape: f32[8,60], index: 9, kind: output, shape index: {}]  }
   0x1   :  { %v2833_v0 = vld [vmem:[%s5417_s1 + $0x78] sm:$0xf]  ;;  %v2832_v1 = vld [vmem:[%s5417_s1 + $0x70] sm:$0xf]  ;;  %v2831_v2 = vld [vmem:[%s5417_s1 + $0x68] sm:$0xff]  ;;  %221 = vmatprep.mubr.f32.mxu0 %v5427_v3  ;;  %451 = vmatprep.mubr.f32.mxu1 %v5427_v3  ;;  %vm1679_vm3 = vcmask 883712  }
   0x2   :  { %2834 = vmatprep.subr.msk.mxu0 %vm150_vm0, %v2833_v0  ;;  %v2830_v4 = vld [vmem:[%s5417_s1 + $0x60] sm:$0xff]  ;;  %v2829_v5 = vld [vmem:[%s5417_s1 + $0x58] sm:$0xff]  ;;  %v2828_v6 = vld [vmem:[%s5417_s1 + $0x50] sm:$0xff]  ;;  %vm3610_vm4 = vmmov 0   ;;  %vm2389_vm5 = vcmask 523264   ;;  %vm2733_vm6 = vcmask 982016  }
   0x3   :  { %2835 = vmatpush1.msk.msra.mxu0 %vm150_vm0, %v2832_v1  ;;  %v67_v7 = vld [vmem:[%s5417_s1 + $0x38] sm:$0xf]  ;;  %v66_v8 = vld [vmem:[%s5417_s1 + $0x30] sm:$0xf]  ;;  %v65_v9 = vld [vmem:[%s5417_s1 + $0x28] sm:$0xff]  ;;  %vm2808_vm7 = vcmask 490496  }
   0x4   :  { %183 = vmatprep.subr.mxu0 %v2831_v2  ;;  %v2827_v10 = vld [vmem:[%s5417_s1 + $0x48] sm:$0xff]  ;;  %3592 = vmatprep.subr.msk.mxu1 %vm150_vm0, %v67_v7  ;;  %v64_v11 = vld [vmem:[%s5417_s1 + $0x20] sm:$0xff]  ;;  %v63_v13 = vld [vmem:[%s5417_s1 + $0x18] sm:$0xff] }
   0x5   :  { %184 = vmatpush1.msra.mxu0 %v2830_v4  ;;  %v2826_v12 = vld [vmem:[%s5417_s1 + $0x40] sm:$0xff]  ;;  %3596 = vmatpush1.msk.msra.mxu1 %vm150_vm0, %v66_v8  ;;  %v3710_v14 = vld [vmem:[%s5418_s0 + $0x8] sm:$0xff]  ;;  %v62_v15 = vld [vmem:[%s5417_s1 + $0x10] sm:$0xff] }
   0x6   :  { %185 = vmatprep.subr.mxu0 %v2829_v5  ;;  %3593 = vmatprep.subr.mxu1 %v65_v9  ;;  %v61_v16 = vld [vmem:[%s5417_s1 + $0x8] sm:$0xff]  ;;  %v3726_v17 = vld [vmem:[%s5418_s0 + $0x10] sm:$0xff]  ;;  %v60_v18 = vld [vmem:[%s5417_s1] sm:$0xff] }
   0x7   :  { %186 = vmatpush1.msra.mxu0 %v2828_v6  ;;  %3597 = vmatpush1.msra.mxu1 %v64_v11  ;;  %v3737_v19 = vld [vmem:[%s5418_s0 + $0x18] sm:$0xff]  ;;  %v2926_v22 = vld [vmem:[%s5417_s1 + $0xf0] sm:$0xf]  ;;  %v3758_v23 = vld [vmem:[%s5418_s0 + $0x20] sm:$0xff] }
   0x8   :  { %187 = vmatprep.subr.mxu0 %v2827_v10  ;;  %3594 = vmatprep.subr.mxu1 %v63_v13  ;;  %v2927_v20 = vld [vmem:[%s5417_s1 + $0xf8] sm:$0xf]  ;;  %v2925_v24 = vld [vmem:[%s5417_s1 + $0xe8] sm:$0xff]  ;;  %v2924_v25 = vld [vmem:[%s5417_s1 + $0xe0] sm:$0xff] }
   0x9   :  { %188 = vmatpush1.msra.mxu0 %v2826_v12  ;;  %3598 = vmatpush1.msra.mxu1 %v62_v15  ;;  %v2893_v21 = vld [vmem:[%s5417_s1 + $0xb8] sm:$0xf]  ;;  %v3780_v27 = vld [vmem:[%s5418_s0 + $0x28] sm:$0xff]  ;;  %v2922_v28 = vld [vmem:[%s5417_s1 + $0xd0] sm:$0xff] }
   0xa   :  { %2836 = vmatmul.mubr.msk.f32.vlgmr.msra.gmra.mxu0 %vm77_vm1, %v3710_v14  ;;  %2860 = vmatprep.subr.msk.mxu0 %vm150_vm0, %v67_v7  ;;  %v2923_v26 = vld [vmem:[%s5417_s1 + $0xd8] sm:$0xff]  ;;  %v2921_v29 = vld [vmem:[%s5417_s1 + $0xc8] sm:$0xff]  ;;  %v2920_v30 = vld [vmem:[%s5417_s1 + $0xc0] sm:$0xff] }
   0xb   :  { %2861 = vmatpush1.msk.msra.mxu0 %vm150_vm0, %v66_v8  ;;  %227 = vmatprep.mubr.f32.mxu0 %v5427_v3  ;;  %v3800_v31 = vld [vmem:[%s5418_s0 + $0x30] sm:$0xff]  ;;  %v3811_v32 = vld [vmem:[%s5418_s0 + $0x38] sm:$0xff]  ;;  %v3822_v33 = vld [vmem:[%s5418_s0 + $0x40] sm:$0xff] }
   0xc   :  { %401 = vmatprep.subr.mxu0 %v65_v9  ;;  %3595 = vmatprep.subr.mxu1 %v61_v16  ;;  %v3833_v34 = vld [vmem:[%s5418_s0 + $0x48] sm:$0xff]  ;;  %v3844_v35 = vld [vmem:[%s5418_s0 + $0x50] sm:$0xff]  ;;  %v3855_v36 = vld [vmem:[%s5418_s0 + $0x58] sm:$0xff] }
   0xd   :  { %402 = vmatpush1.msra.mxu0 %v64_v11  ;;  %3599 = vmatpush1.msra.mxu1 %v60_v18  ;;  %v3866_v37 = vld [vmem:[%s5418_s0 + $0x60] sm:$0xff]  ;;  %v3877_v38 = vld [vmem:[%s5418_s0 + $0x68] sm:$0xff]  ;;  %v3888_v39 = vld [vmem:[%s5418_s0 + $0x70] sm:$0xff] }
   0xe   :  { %2837 = vmatmul.mubr.msk.f32.gmra.mxu0 %vm77_vm1, %v3726_v17  ;;  %2864 = vmatmul.mubr.msk.f32.vlgmr.msra.gmra.mxu1 %vm77_vm1, %v3726_v17  ;;  %v3899_v40 = vld [vmem:[%s5418_s0 + $0x78] sm:$0xff]  ;;  %v3910_v41 = vld [vmem:[%s5418_s0 + $0x80] sm:$0xff]  ;;  %v3921_v42 = vld [vmem:[%s5418_s0 + $0x88] sm:$0xff] }
   0xf   :  { %233 = vmatprep.mubr.f32.mxu0 %v5427_v3  ;;  %457 = vmatprep.mubr.f32.mxu1 %v5427_v3  ;;  %v3932_v43 = vld [vmem:[%s5418_s0 + $0x90] sm:$0xff]  ;;  %v3943_v44 = vld [vmem:[%s5418_s0 + $0x98] sm:$0xff]  ;;  %v3954_v45 = vld [vmem:[%s5418_s0 + $0xa0] sm:$0xff] }
  0x10   :  { %403 = vmatprep.subr.mxu0 %v63_v13  ;;  %2928 = vmatprep.subr.msk.mxu1 %vm150_vm0, %v2927_v20  ;;  %v3965_v46 = vld [vmem:[%s5418_s0 + $0xa8] sm:$0xff]  ;;  %v3976_v47 = vld [vmem:[%s5418_s0 + $0xb0] sm:$0xff]  ;;  %v3987_v48 = vld [vmem:[%s5418_s0 + $0xb8] sm:$0xff] }
  0x11   :  { %404 = vmatpush1.msra.mxu0 %v62_v15  ;;  %2929 = vmatpush1.msk.msra.mxu1 %vm150_vm0, %v2926_v22  ;;  %v3998_v49 = vld [vmem:[%s5418_s0 + $0xc0] sm:$0xff]  ;;  %v2892_v51 = vld [vmem:[%s5417_s1 + $0xb0] sm:$0xf]  ;;  %v2891_v52 = vld [vmem:[%s5417_s1 + $0xa8] sm:$0xff] }
  0x12   :  { %2838 = vmatmul.mubr.msk.f32.gmra.mxu0 %vm77_vm1, %v3737_v19  ;;  %405 = vmatprep.subr.mxu0 %v61_v16  ;;  %v32_v50 = vld [vmem:[%s5418_s0] sm:$0xff]  ;;  %v2889_v54 = vld [vmem:[%s5417_s1 + $0x98] sm:$0xff]  ;;  %v2888_v55 = vld [vmem:[%s5417_s1 + $0x90] sm:$0xff] }
  0x13   :  { %239 = vmatprep.mubr.f32.mxu0 %v5427_v3  ;;  %2865 = vmatmul.mubr.msk.f32.gmra.mxu1 %vm77_vm1, %v3737_v19  ;;  %v2890_v53 = vld [vmem:[%s5417_s1 + $0xa0] sm:$0xff]  ;;  %v2887_v56 = vld [vmem:[%s5417_s1 + $0x88] sm:$0xff]  ;;  %v2961_v58 = vld [vmem:[%s5417_s1 + $0x138] sm:$0xf] }
  0x14   :  { %463 = vmatprep.mubr.f32.mxu1 %v5427_v3  ;;  %406 = vmatpush1.msra.mxu0 %v60_v18  ;;  %v2886_v57 = vld [vmem:[%s5417_s1 + $0x80] sm:$0xff]  ;;  %v2960_v59 = vld [vmem:[%s5417_s1 + $0x130] sm:$0xf]  ;;  %v2959_v60 = vld [vmem:[%s5417_s1 + $0x128] sm:$0xff] }
  0x15   :  { %2894 = vmatprep.subr.msk.mxu0 %vm150_vm0, %v2893_v21  ;;  %903 = vmatprep.subr.mxu1 %v2925_v24  ;;  %v2958_v61 = vld [vmem:[%s5417_s1 + $0x120] sm:$0xff]  ;;  %v2957_v62 = vld [vmem:[%s5417_s1 + $0x118] sm:$0xff]  ;;  %v2956_v63 = vld [vmem:[%s5417_s1 + $0x110] sm:$0xff] }
  0x16   :  { %2839 = vmatmul.mubr.msk.f32.gmra.mxu0 %vm77_vm1, %v3758_v23  ;;  %904 = vmatpush1.msra.mxu1 %v2924_v25  ;;  %v2955_v0 = vld [vmem:[%s5417_s1 + $0x108] sm:$0xff]  ;;  %v2954_v1 = vld [vmem:[%s5417_s1 + $0x100] sm:$0xff]  ;;  %v4199_v4 = vld [vmem:[%s5418_s0 + $0xd0] sm:$0xff] }
  0x17   :  { %245 = vmatprep.mubr.f32.mxu0 %v5427_v3  ;;  %2866 = vmatmul.mubr.msk.f32.gmra.mxu1 %vm77_vm1, %v3758_v23  ;;  %v4188_v2 = vld [vmem:[%s5418_s0 + $0xc8] sm:$0xff] }
  0x18   :  { %469 = vmatprep.mubr.f32.mxu1 %v5427_v3  ;;  %905 = vmatprep.subr.mxu1 %v2923_v26 }
  0x19   :  { %906 = vmatpush1.msra.mxu1 %v2922_v28 }
  0x1a   :  { %2840 = vmatmul.mubr.msk.f32.gmra.mxu0 %vm77_vm1, %v3780_v27  ;;  %907 = vmatprep.subr.mxu1 %v2921_v29 }
  0x1b   :  { %251 = vmatprep.mubr.f32.mxu0 %v5427_v3  ;;  %2867 = vmatmul.mubr.msk.f32.gmra.mxu1 %vm77_vm1, %v3780_v27 }
  0x1c   :  { %475 = vmatprep.mubr.f32.mxu1 %v5427_v3  ;;  %908 = vmatpush1.msra.mxu1 %v2920_v30 }
  0x1e   :  { %2841 = vmatmul.mubr.msk.f32.gmra.mxu0 %vm77_vm1, %v3800_v31 }
  0x1f   :  { %257 = vmatprep.mubr.f32.mxu0 %v5427_v3  ;;  %2868 = vmatmul.mubr.msk.f32.gmra.mxu1 %vm77_vm1, %v3800_v31 }
  0x20   :  { %481 = vmatprep.mubr.f32.mxu1 %v5427_v3 }
  0x22   :  { %2842 = vmatmul.mubr.msk.f32.gmra.mxu0 %vm77_vm1, %v3811_v32 }
  0x23   :  { %263 = vmatprep.mubr.f32.mxu0 %v5427_v3  ;;  %2869 = vmatmul.mubr.msk.f32.gmra.mxu1 %vm77_vm1, %v3811_v32 }
  0x24   :  { %487 = vmatprep.mubr.f32.mxu1 %v5427_v3 }
  0x26   :  { %2843 = vmatmul.mubr.msk.f32.gmra.mxu0 %vm77_vm1, %v3822_v33 }
  0x27   :  { %269 = vmatprep.mubr.f32.mxu0 %v5427_v3  ;;  %2870 = vmatmul.mubr.msk.f32.gmra.mxu1 %vm77_vm1, %v3822_v33 }
  0x28   :  { %493 = vmatprep.mubr.f32.mxu1 %v5427_v3 }
  0x2a   :  { %2844 = vmatmul.mubr.msk.f32.gmra.mxu0 %vm77_vm1, %v3833_v34 }
  0x2b   :  { %275 = vmatprep.mubr.f32.mxu0 %v5427_v3  ;;  %2871 = vmatmul.mubr.msk.f32.gmra.mxu1 %vm77_vm1, %v3833_v34 }
  0x2c   :  { %499 = vmatprep.mubr.f32.mxu1 %v5427_v3 }
  0x2e   :  { %2845 = vmatmul.mubr.msk.f32.gmra.mxu0 %vm77_vm1, %v3844_v35 }
  0x2f   :  { %281 = vmatprep.mubr.f32.mxu0 %v5427_v3  ;;  %2872 = vmatmul.mubr.msk.f32.gmra.mxu1 %vm77_vm1, %v3844_v35 }
  0x30   :  { %505 = vmatprep.mubr.f32.mxu1 %v5427_v3 }
  0x32   :  { %2846 = vmatmul.mubr.msk.f32.gmra.mxu0 %vm77_vm1, %v3855_v36 }
  0x33   :  { %287 = vmatprep.mubr.f32.mxu0 %v5427_v3  ;;  %2873 = vmatmul.mubr.msk.f32.gmra.mxu1 %vm77_vm1, %v3855_v36 }
  0x34   :  { %511 = vmatprep.mubr.f32.mxu1 %v5427_v3 }
  0x36   :  { %2847 = vmatmul.mubr.msk.f32.gmra.mxu0 %vm77_vm1, %v3866_v37 }
  0x37   :  { %293 = vmatprep.mubr.f32.mxu0 %v5427_v3  ;;  %2874 = vmatmul.mubr.msk.f32.gmra.mxu1 %vm77_vm1, %v3866_v37 }
  0x38   :  { %517 = vmatprep.mubr.f32.mxu1 %v5427_v3 }
  0x3a   :  { %2848 = vmatmul.mubr.msk.f32.gmra.mxu0 %vm77_vm1, %v3877_v38 }
  0x3b   :  { %299 = vmatprep.mubr.f32.mxu0 %v5427_v3  ;;  %2875 = vmatmul.mubr.msk.f32.gmra.mxu1 %vm77_vm1, %v3877_v38 }
  0x3c   :  { %523 = vmatprep.mubr.f32.mxu1 %v5427_v3 }
  0x3e   :  { %2849 = vmatmul.mubr.msk.f32.gmra.mxu0 %vm77_vm1, %v3888_v39 }
  0x3f   :  { %305 = vmatprep.mubr.f32.mxu0 %v5427_v3  ;;  %2876 = vmatmul.mubr.msk.f32.gmra.mxu1 %vm77_vm1, %v3888_v39 }
  0x40   :  { %529 = vmatprep.mubr.f32.mxu1 %v5427_v3 }
  0x42   :  { %2850 = vmatmul.mubr.msk.f32.gmra.mxu0 %vm77_vm1, %v3899_v40 }
  0x43   :  { %311 = vmatprep.mubr.f32.mxu0 %v5427_v3  ;;  %2877 = vmatmul.mubr.msk.f32.gmra.mxu1 %vm77_vm1, %v3899_v40 }
  0x44   :  { %535 = vmatprep.mubr.f32.mxu1 %v5427_v3 }
  0x46   :  { %2851 = vmatmul.mubr.msk.f32.gmra.mxu0 %vm77_vm1, %v3910_v41 }
  0x47   :  { %317 = vmatprep.mubr.f32.mxu0 %v5427_v3  ;;  %2878 = vmatmul.mubr.msk.f32.gmra.mxu1 %vm77_vm1, %v3910_v41 }
  0x48   :  { %541 = vmatprep.mubr.f32.mxu1 %v5427_v3 }
  0x4a   :  { %2852 = vmatmul.mubr.msk.f32.gmra.mxu0 %vm77_vm1, %v3921_v42 }
  0x4b   :  { %323 = vmatprep.mubr.f32.mxu0 %v5427_v3  ;;  %2879 = vmatmul.mubr.msk.f32.gmra.mxu1 %vm77_vm1, %v3921_v42 }
  0x4c   :  { %547 = vmatprep.mubr.f32.mxu1 %v5427_v3 }
  0x4e   :  { %2853 = vmatmul.mubr.msk.f32.gmra.mxu0 %vm77_vm1, %v3932_v43 }
  0x4f   :  { %329 = vmatprep.mubr.f32.mxu0 %v5427_v3  ;;  %2880 = vmatmul.mubr.msk.f32.gmra.mxu1 %vm77_vm1, %v3932_v43 }
  0x50   :  { %553 = vmatprep.mubr.f32.mxu1 %v5427_v3 }
  0x52   :  { %2854 = vmatmul.mubr.msk.f32.gmra.mxu0 %vm77_vm1, %v3943_v44 }
  0x53   :  { %335 = vmatprep.mubr.f32.mxu0 %v5427_v3  ;;  %2881 = vmatmul.mubr.msk.f32.gmra.mxu1 %vm77_vm1, %v3943_v44 }
  0x54   :  { %559 = vmatprep.mubr.f32.mxu1 %v5427_v3 }
  0x56   :  { %2855 = vmatmul.mubr.msk.f32.gmra.mxu0 %vm77_vm1, %v3954_v45 }
  0x57   :  { %341 = vmatprep.mubr.f32.mxu0 %v5427_v3  ;;  %2882 = vmatmul.mubr.msk.f32.gmra.mxu1 %vm77_vm1, %v3954_v45 }
  0x58   :  { %565 = vmatprep.mubr.f32.mxu1 %v5427_v3 }
  0x5a   :  { %2856 = vmatmul.mubr.msk.f32.gmra.mxu0 %vm77_vm1, %v3965_v46 }
  0x5b   :  { %347 = vmatprep.mubr.f32.mxu0 %v5427_v3  ;;  %2883 = vmatmul.mubr.msk.f32.gmra.mxu1 %vm77_vm1, %v3965_v46 }
  0x5c   :  { %571 = vmatprep.mubr.f32.mxu1 %v5427_v3 }
  0x5e   :  { %2857 = vmatmul.mubr.msk.f32.gmra.mxu0 %vm77_vm1, %v3976_v47 }
  0x5f   :  { %353 = vmatprep.mubr.f32.mxu0 %v5427_v3  ;;  %2884 = vmatmul.mubr.msk.f32.gmra.mxu1 %vm77_vm1, %v3976_v47 }
  0x60   :  { %577 = vmatprep.mubr.f32.mxu1 %v5427_v3 }
  0x62   :  { %2858 = vmatmul.mubr.msk.f32.gmra.mxu0 %vm77_vm1, %v3987_v48 }
  0x63   :  { %359 = vmatprep.mubr.f32.mxu0 %v5427_v3  ;;  %2885 = vmatmul.mubr.msk.f32.gmra.mxu1 %vm77_vm1, %v3987_v48 }
  0x64   :  { %941 = vmatprep.mubr.f32.mxu1 %v5427_v3 }
  0x66   :  { %2859 = vmatmul.mubr.msk.f32.gmra.mxu0 %vm77_vm1, %v3998_v49 }
  0x67   :  { %439 = vmatprep.mubr.f32.mxu0 %v5427_v3  ;;  %2930 = vmatmul.mubr.msk.f32.vlgmr.msra.gmra.mxu1 %vm77_vm1, %v3737_v19 }
  0x68   :  { %947 = vmatprep.mubr.f32.mxu1 %v5427_v3 }
  0x6a   :  { %2862 = vmatmul.mubr.msk.f32.vlgmr.msra.gmra.mxu0 %vm77_vm1, %v32_v50 }
  0x6b   :  { %2895 = vmatpush1.msk.msra.mxu0 %vm150_vm0, %v2892_v51  ;;  %445 = vmatprep.mubr.f32.mxu0 %v5427_v3 }
  0x6c   :  { %628 = vmatprep.subr.mxu0 %v2891_v52  ;;  %2931 = vmatmul.mubr.msk.f32.gmra.mxu1 %vm77_vm1, %v3758_v23 }
  0x6d   :  { %629 = vmatpush1.msra.mxu0 %v2890_v53  ;;  %953 = vmatprep.mubr.f32.mxu1 %v5427_v3 }
  0x6e   :  { %2863 = vmatmul.mubr.msk.f32.gmra.mxu0 %vm77_vm1, %v3710_v14  ;;  %630 = vmatprep.subr.mxu0 %v2889_v54 }
  0x6f   :  { %631 = vmatpush1.msra.mxu0 %v2888_v55  ;;  %666 = vmatprep.mubr.f32.mxu0 %v5427_v3 }
  0x70   :  { %632 = vmatprep.subr.mxu0 %v2887_v56  ;;  %2932 = vmatmul.mubr.msk.f32.gmra.mxu1 %vm77_vm1, %v3780_v27 }
  0x71   :  { %633 = vmatpush1.msra.mxu0 %v2886_v57  ;;  %959 = vmatprep.mubr.f32.mxu1 %v5427_v3 }
  0x72   :  { %2896 = vmatmul.mubr.msk.f32.vlgmr.msra.gmra.mxu0 %vm77_vm1, %v3726_v17  ;;  %2962 = vmatprep.subr.msk.mxu0 %vm150_vm0, %v2961_v58 }
  0x73   :  { %2963 = vmatpush1.msk.msra.mxu0 %vm150_vm0, %v2960_v59  ;;  %672 = vmatprep.mubr.f32.mxu0 %v5427_v3 }
  0x74   :  { %2933 = vmatmul.mubr.msk.f32.gmra.mxu1 %vm77_vm1, %v3800_v31  ;;  %1178 = vmatprep.subr.mxu0 %v2959_v60 }
  0x75   :  { %965 = vmatprep.mubr.f32.mxu1 %v5427_v3  ;;  %1179 = vmatpush1.msra.mxu0 %v2958_v61 }
  0x76   :  { %2897 = vmatmul.mubr.msk.f32.gmra.mxu0 %vm77_vm1, %v3737_v19  ;;  %1180 = vmatprep.subr.mxu0 %v2957_v62 }
  0x77   :  { %678 = vmatprep.mubr.f32.mxu0 %v5427_v3  ;;  %1181 = vmatpush1.msra.mxu0 %v2956_v63 }
  0x78   :  { %2934 = vmatmul.mubr.msk.f32.gmra.mxu1 %vm77_vm1, %v3811_v32  ;;  %1182 = vmatprep.subr.mxu0 %v2955_v0 }
  0x79   :  { %971 = vmatprep.mubr.f32.mxu1 %v5427_v3  ;;  %1183 = vmatpush1.msra.mxu0 %v2954_v1 }
  0x7a   :  { %2898 = vmatmul.mubr.msk.f32.gmra.mxu0 %vm77_vm1, %v3758_v23 }
  0x7b   :  { %684 = vmatprep.mubr.f32.mxu0 %v5427_v3 }
  0x7c   :  { %2935 = vmatmul.mubr.msk.f32.gmra.mxu1 %vm77_vm1, %v3822_v33 }
  0x7d   :  { %977 = vmatprep.mubr.f32.mxu1 %v5427_v3 }
  0x7e   :  { %2899 = vmatmul.mubr.msk.f32.gmra.mxu0 %vm77_vm1, %v3780_v27 }
  0x7f   :  { %690 = vmatprep.mubr.f32.mxu0 %v5427_v3 }
  0x80   :  { %2936 = vmatmul.mubr.msk.f32.gmra.mxu1 %vm77_vm1, %v3833_v34 }
  0x81   :  { %983 = vmatprep.mubr.f32.mxu1 %v5427_v3 }
  0x82   :  { %2900 = vmatmul.mubr.msk.f32.gmra.mxu0 %vm77_vm1, %v3800_v31 }
  0x83   :  { %696 = vmatprep.mubr.f32.mxu0 %v5427_v3 }
  0x84   :  { %2937 = vmatmul.mubr.msk.f32.gmra.mxu1 %vm77_vm1, %v3844_v35 }
  0x85   :  { %989 = vmatprep.mubr.f32.mxu1 %v5427_v3 }
  0x86   :  { %2901 = vmatmul.mubr.msk.f32.gmra.mxu0 %vm77_vm1, %v3811_v32 }
  0x87   :  { %702 = vmatprep.mubr.f32.mxu0 %v5427_v3 }
  0x88   :  { %2938 = vmatmul.mubr.msk.f32.gmra.mxu1 %vm77_vm1, %v3855_v36 }
  0x89   :  { %995 = vmatprep.mubr.f32.mxu1 %v5427_v3 }
  0x8a   :  { %2902 = vmatmul.mubr.msk.f32.gmra.mxu0 %vm77_vm1, %v3822_v33 }
  0x8b   :  { %708 = vmatprep.mubr.f32.mxu0 %v5427_v3 }
  0x8c   :  { %2939 = vmatmul.mubr.msk.f32.gmra.mxu1 %vm77_vm1, %v3866_v37 }
  0x8d   :  { %1001 = vmatprep.mubr.f32.mxu1 %v5427_v3 }
  0x8e   :  { %2903 = vmatmul.mubr.msk.f32.gmra.mxu0 %vm77_vm1, %v3833_v34 }
  0x8f   :  { %714 = vmatprep.mubr.f32.mxu0 %v5427_v3 }
  0x90   :  { %2940 = vmatmul.mubr.msk.f32.gmra.mxu1 %vm77_vm1, %v3877_v38 }
  0x91   :  { %1007 = vmatprep.mubr.f32.mxu1 %v5427_v3 }
  0x92   :  { %2904 = vmatmul.mubr.msk.f32.gmra.mxu0 %vm77_vm1, %v3844_v35 }
  0x93   :  { %720 = vmatprep.mubr.f32.mxu0 %v5427_v3 }
  0x94   :  { %2941 = vmatmul.mubr.msk.f32.gmra.mxu1 %vm77_vm1, %v3888_v39 }
  0x95   :  { %1013 = vmatprep.mubr.f32.mxu1 %v5427_v3 }
  0x96   :  { %2905 = vmatmul.mubr.msk.f32.gmra.mxu0 %vm77_vm1, %v3855_v36 }
  0x97   :  { %726 = vmatprep.mubr.f32.mxu0 %v5427_v3 }
  0x98   :  { %2942 = vmatmul.mubr.msk.f32.gmra.mxu1 %vm77_vm1, %v3899_v40 }
  0x99   :  { %1019 = vmatprep.mubr.f32.mxu1 %v5427_v3 }
  0x9a   :  { %2906 = vmatmul.mubr.msk.f32.gmra.mxu0 %vm77_vm1, %v3866_v37 }
  0x9b   :  { %732 = vmatprep.mubr.f32.mxu0 %v5427_v3 }
  0x9c   :  { %2943 = vmatmul.mubr.msk.f32.gmra.mxu1 %vm77_vm1, %v3910_v41 }
  0x9d   :  { %1025 = vmatprep.mubr.f32.mxu1 %v5427_v3 }
  0x9e   :  { %2907 = vmatmul.mubr.msk.f32.gmra.mxu0 %vm77_vm1, %v3877_v38 }
  0x9f   :  { %738 = vmatprep.mubr.f32.mxu0 %v5427_v3 }
  0xa0   :  { %2944 = vmatmul.mubr.msk.f32.gmra.mxu1 %vm77_vm1, %v3921_v42 }
  0xa1   :  { %1031 = vmatprep.mubr.f32.mxu1 %v5427_v3 }
  0xa2   :  { %2908 = vmatmul.mubr.msk.f32.gmra.mxu0 %vm77_vm1, %v3888_v39 }
  0xa3   :  { %744 = vmatprep.mubr.f32.mxu0 %v5427_v3 }
  0xa4   :  { %2945 = vmatmul.mubr.msk.f32.gmra.mxu1 %vm77_vm1, %v3932_v43 }
  0xa5   :  { %1037 = vmatprep.mubr.f32.mxu1 %v5427_v3 }
  0xa6   :  { %2909 = vmatmul.mubr.msk.f32.gmra.mxu0 %vm77_vm1, %v3899_v40 }
  0xa7   :  { %750 = vmatprep.mubr.f32.mxu0 %v5427_v3 }
  0xa8   :  { %2946 = vmatmul.mubr.msk.f32.gmra.mxu1 %vm77_vm1, %v3943_v44 }
  0xa9   :  { %1043 = vmatprep.mubr.f32.mxu1 %v5427_v3 }
  0xaa   :  { %2910 = vmatmul.mubr.msk.f32.gmra.mxu0 %vm77_vm1, %v3910_v41 }
  0xab   :  { %756 = vmatprep.mubr.f32.mxu0 %v5427_v3 }
  0xac   :  { %2947 = vmatmul.mubr.msk.f32.gmra.mxu1 %vm77_vm1, %v3954_v45 }
  0xad   :  { %1049 = vmatprep.mubr.f32.mxu1 %v5427_v3 }
  0xae   :  { %2911 = vmatmul.mubr.msk.f32.gmra.mxu0 %vm77_vm1, %v3921_v42 }
  0xaf   :  { %762 = vmatprep.mubr.f32.mxu0 %v5427_v3 }
  0xb0   :  { %2948 = vmatmul.mubr.msk.f32.gmra.mxu1 %vm77_vm1, %v3965_v46 }
  0xb1   :  { %1055 = vmatprep.mubr.f32.mxu1 %v5427_v3 }
  0xb2   :  { %2912 = vmatmul.mubr.msk.f32.gmra.mxu0 %vm77_vm1, %v3932_v43 }
  0xb3   :  { %768 = vmatprep.mubr.f32.mxu0 %v5427_v3 }
  0xb4   :  { %2949 = vmatmul.mubr.msk.f32.gmra.mxu1 %vm77_vm1, %v3976_v47 }
  0xb5   :  { %1061 = vmatprep.mubr.f32.mxu1 %v5427_v3 }
  0xb6   :  { %2913 = vmatmul.mubr.msk.f32.gmra.mxu0 %vm77_vm1, %v3943_v44 }
  0xb7   :  { %774 = vmatprep.mubr.f32.mxu0 %v5427_v3 }
  0xb8   :  { %2950 = vmatmul.mubr.msk.f32.gmra.mxu1 %vm77_vm1, %v3987_v48 }
  0xb9   :  { %1067 = vmatprep.mubr.f32.mxu1 %v5427_v3 }
  0xba   :  { %2914 = vmatmul.mubr.msk.f32.gmra.mxu0 %vm77_vm1, %v3954_v45 }
  0xbb   :  { %780 = vmatprep.mubr.f32.mxu0 %v5427_v3 }
  0xbc   :  { %2951 = vmatmul.mubr.msk.f32.gmra.mxu1 %vm77_vm1, %v3998_v49 }
  0xbd   :  { %1073 = vmatprep.mubr.f32.mxu1 %v5427_v3 }
  0xbe   :  { %2915 = vmatmul.mubr.msk.f32.gmra.mxu0 %vm77_vm1, %v3965_v46 }
  0xbf   :  { %786 = vmatprep.mubr.f32.mxu0 %v5427_v3 }
  0xc0   :  { %2952 = vmatmul.mubr.msk.f32.gmra.mxu1 %vm77_vm1, %v4188_v2 }
  0xc1   :  { %1079 = vmatprep.mubr.f32.mxu1 %v5427_v3 }
  0xc2   :  { %2916 = vmatmul.mubr.msk.f32.gmra.mxu0 %vm77_vm1, %v3976_v47 }
  0xc3   :  { %792 = vmatprep.mubr.f32.mxu0 %v5427_v3 }
  0xc4   :  { %2953 = vmatmul.mubr.msk.f32.gmra.mxu1 %vm77_vm1, %v4199_v4 }
  0xc6   :  { %2917 = vmatmul.mubr.msk.f32.gmra.mxu0 %vm77_vm1, %v3987_v48 }
  0xc7   :  { %798 = vmatprep.mubr.f32.mxu0 %v5427_v3 }
  0xca   :  { %v4209_v5 = vpop.f32.mrf.mxu0  ;;  %2918 = vmatmul.mubr.msk.f32.gmra.mxu0 %vm77_vm1, %v3998_v49 }
  0xcb   :  { %804 = vmatprep.mubr.f32.mxu0 %v5427_v3 }
  0xcc   :  { %v4214_v6 = vpop.f32.mrf.mxu0 }
  0xce   :  { %v4216_v7 = vpop.f32.mrf.mxu0  ;;  %2919 = vmatmul.mubr.msk.f32.gmra.mxu0 %vm77_vm1, %v4188_v2  ;;  %v453_v8 = vpop.f32.mrf.mxu1 }
  0xcf   :  { %1216 = vmatprep.mubr.f32.mxu0 %v5427_v3 }
  0xd0   :  { %v4221_v9 = vpop.f32.mrf.mxu0  ;;  %v4223_v10 = vpop.f32.mrf.mxu1 }
  0xd2   :  { %v235_v11 = vpop.f32.mrf.mxu0  ;;  %2964 = vmatmul.mubr.msk.f32.vlgmr.msra.gmra.mxu0 %vm77_vm1, %v3758_v23 }
  0xd3   :  { %v4227_v12 = vadd.f32 %v453_v8, %v235_v11  ;;  %1222 = vmatprep.mubr.f32.mxu0 %v5427_v3  ;;  %v459_v13 = vpop.f32.mrf.mxu1 }
  0xd4   :  { %v4230_v14 = vpop.f32.mrf.mxu0 }
  0xd5   :  { %v4232_v15 = vpop.f32.mrf.mxu1 }
  0xd6   :  { %v241_v16 = vpop.f32.mrf.mxu0  ;;  %2965 = vmatmul.mubr.msk.f32.gmra.mxu0 %vm77_vm1, %v3780_v27 }
  0xd7   :  { %v4236_v17 = vadd.f32 %v459_v13, %v241_v16  ;;  %1228 = vmatprep.mubr.f32.mxu0 %v5427_v3  ;;  %v465_v18 = vpop.f32.mrf.mxu1 }
  0xd8   :  { %v4239_v19 = vpop.f32.mrf.mxu0 }
  0xd9   :  { %v4241_v20 = vpop.f32.mrf.mxu1 }
  0xda   :  { %v247_v21 = vpop.f32.mrf.mxu0  ;;  %2966 = vmatmul.mubr.msk.f32.gmra.mxu0 %vm77_vm1, %v3800_v31 }
  0xdb   :  { %v4245_v22 = vadd.f32 %v465_v18, %v247_v21  ;;  %1234 = vmatprep.mubr.f32.mxu0 %v5427_v3  ;;  %v471_v23 = vpop.f32.mrf.mxu1 }
  0xdc   :  { %v4248_v24 = vpop.f32.mrf.mxu0 }
  0xdd   :  { %v4250_v25 = vpop.f32.mrf.mxu1 }
  0xde   :  { %v253_v26 = vpop.f32.mrf.mxu0  ;;  %2967 = vmatmul.mubr.msk.f32.gmra.mxu0 %vm77_vm1, %v3811_v32 }
  0xdf   :  { %v4254_v27 = vadd.f32 %v471_v23, %v253_v26  ;;  %1240 = vmatprep.mubr.f32.mxu0 %v5427_v3  ;;  %v477_v28 = vpop.f32.mrf.mxu1 }
  0xe0   :  { %v4257_v29 = vpop.f32.mrf.mxu0 }
  0xe1   :  { %v4259_v30 = vpop.f32.mrf.mxu1 }
  0xe2   :  { %v259_v31 = vpop.f32.mrf.mxu0  ;;  %2968 = vmatmul.mubr.msk.f32.gmra.mxu0 %vm77_vm1, %v3822_v33 }
  0xe3   :  { %v4263_v50 = vadd.f32 %v477_v28, %v259_v31  ;;  %1246 = vmatprep.mubr.f32.mxu0 %v5427_v3  ;;  %v483_v51 = vpop.f32.mrf.mxu1 }
  0xe4   :  { %v4266_v52 = vpop.f32.mrf.mxu0 }
  0xe5   :  { %v4268_v32 = vpop.f32.mrf.mxu1 }
  0xe6   :  { %v265_v53 = vpop.f32.mrf.mxu0  ;;  %2969 = vmatmul.mubr.msk.f32.gmra.mxu0 %vm77_vm1, %v3833_v34 }
  0xe7   :  { %v4272_v54 = vadd.f32 %v483_v51, %v265_v53  ;;  %1252 = vmatprep.mubr.f32.mxu0 %v5427_v3  ;;  %v489_v55 = vpop.f32.mrf.mxu1 }
  0xe8   :  { %v4275_v56 = vpop.f32.mrf.mxu0 }
  0xe9   :  { %v4277_v33 = vpop.f32.mrf.mxu1 }
  0xea   :  { %v271_v57 = vpop.f32.mrf.mxu0  ;;  %2970 = vmatmul.mubr.msk.f32.gmra.mxu0 %vm77_vm1, %v3844_v35 }
  0xeb   :  { %v4281_v58 = vadd.f32 %v489_v55, %v271_v57  ;;  %1258 = vmatprep.mubr.f32.mxu0 %v5427_v3  ;;  %v495_v59 = vpop.f32.mrf.mxu1 }
  0xec   :  { %v4284_v60 = vpop.f32.mrf.mxu0 }
  0xed   :  { %v4286_v34 = vpop.f32.mrf.mxu1 }
  0xee   :  { %v277_v61 = vpop.f32.mrf.mxu0  ;;  %2971 = vmatmul.mubr.msk.f32.gmra.mxu0 %vm77_vm1, %v3855_v36 }
  0xef   :  { %v4290_v62 = vadd.f32 %v495_v59, %v277_v61  ;;  %1264 = vmatprep.mubr.f32.mxu0 %v5427_v3  ;;  %v501_v63 = vpop.f32.mrf.mxu1 }
  0xf0   :  { %v4293_v0 = vpop.f32.mrf.mxu0 }
  0xf1   :  { %v4295_v35 = vpop.f32.mrf.mxu1 }
  0xf2   :  { %v283_v1 = vpop.f32.mrf.mxu0  ;;  %2972 = vmatmul.mubr.msk.f32.gmra.mxu0 %vm77_vm1, %v3866_v37 }
  0xf3   :  { %v4299_v8 = vadd.f32 %v501_v63, %v283_v1  ;;  %1270 = vmatprep.mubr.f32.mxu0 %v5427_v3  ;;  %v507_v11 = vpop.f32.mrf.mxu1 }
  0xf4   :  { %v4302_v13 = vpop.f32.mrf.mxu0 }
  0xf5   :  { %v509_v36 = vpop.f32.mrf.mxu1 }
  0xf6   :  { %v289_v16 = vpop.f32.mrf.mxu0  ;;  %2973 = vmatmul.mubr.msk.f32.gmra.mxu0 %vm77_vm1, %v3877_v38 }
  0xf7   :  { %v4306_v18 = vadd.f32 %v507_v11, %v289_v16  ;;  %1276 = vmatprep.mubr.f32.mxu0 %v5427_v3  ;;  %v513_v21 = vpop.f32.mrf.mxu1 }
  0xf8   :  { %v291_v23 = vpop.f32.mrf.mxu0 }
  0xf9   :  { %v4309_v26 = vadd.f32 %v509_v36, %v291_v23  ;;  %v515_v37 = vpop.f32.mrf.mxu1 }
  0xfa   :  { %v295_v28 = vpop.f32.mrf.mxu0  ;;  %2974 = vmatmul.mubr.msk.f32.gmra.mxu0 %vm77_vm1, %v3888_v39 }
  0xfb   :  { %v4313_v31 = vadd.f32 %v513_v21, %v295_v28  ;;  %1282 = vmatprep.mubr.f32.mxu0 %v5427_v3  ;;  %v519_v51 = vpop.f32.mrf.mxu1 }
  0xfc   :  { %v297_v53 = vpop.f32.mrf.mxu0 }
  0xfd   :  { %v4316_v38 = vadd.f32 %v515_v37, %v297_v53  ;;  %v521_v55 = vpop.f32.mrf.mxu1 }
  0xfe   :  { %v301_v57 = vpop.f32.mrf.mxu0  ;;  %2975 = vmatmul.mubr.msk.f32.gmra.mxu0 %vm77_vm1, %v3899_v40 }
  0xff   :  { %v4320_v59 = vadd.f32 %v519_v51, %v301_v57  ;;  %1288 = vmatprep.mubr.f32.mxu0 %v5427_v3  ;;  %v525_v61 = vpop.f32.mrf.mxu1 }
 0x100   :  { %v303_v63 = vpop.f32.mrf.mxu0 }
 0x101   :  { %v4323_v39 = vadd.f32 %v521_v55, %v303_v63  ;;  %v527_v1 = vpop.f32.mrf.mxu1 }
 0x102   :  { %v307_v11 = vpop.f32.mrf.mxu0  ;;  %2976 = vmatmul.mubr.msk.f32.gmra.mxu0 %vm77_vm1, %v3910_v41 }
 0x103   :  { %v4327_v36 = vadd.f32 %v525_v61, %v307_v11  ;;  %1294 = vmatprep.mubr.f32.mxu0 %v5427_v3  ;;  %v531_v16 = vpop.f32.mrf.mxu1 }
 0x104   :  { %v309_v21 = vpop.f32.mrf.mxu0 }
 0x105   :  { %v4330_v40 = vadd.f32 %v527_v1, %v309_v21  ;;  %v533_v23 = vpop.f32.mrf.mxu1 }
 0x106   :  { %v313_v37 = vpop.f32.mrf.mxu0  ;;  %2977 = vmatmul.mubr.msk.f32.gmra.mxu0 %vm77_vm1, %v3921_v42 }
 0x107   :  { %v4334_v28 = vadd.f32 %v531_v16, %v313_v37  ;;  %1300 = vmatprep.mubr.f32.mxu0 %v5427_v3  ;;  %v537_v51 = vpop.f32.mrf.mxu1 }
 0x108   :  { %v315_v53 = vpop.f32.mrf.mxu0 }
 0x109   :  { %v4337_v41 = vadd.f32 %v533_v23, %v315_v53  ;;  %v539_v55 = vpop.f32.mrf.mxu1 }
 0x10a   :  { %v319_v57 = vpop.f32.mrf.mxu0  ;;  %2978 = vmatmul.mubr.msk.f32.gmra.mxu0 %vm77_vm1, %v3932_v43 }
 0x10b   :  { %v4341_v61 = vadd.f32 %v537_v51, %v319_v57  ;;  %1306 = vmatprep.mubr.f32.mxu0 %v5427_v3  ;;  %v543_v63 = vpop.f32.mrf.mxu1 }
 0x10c   :  { %v321_v1 = vpop.f32.mrf.mxu0 }
 0x10d   :  { %v4344_v42 = vadd.f32 %v539_v55, %v321_v1  ;;  %v545_v11 = vpop.f32.mrf.mxu1 }
 0x10e   :  { %v325_v16 = vpop.f32.mrf.mxu0  ;;  %2979 = vmatmul.mubr.msk.f32.gmra.mxu0 %vm77_vm1, %v3943_v44 }
 0x10f   :  { %v4348_v21 = vadd.f32 %v543_v63, %v325_v16  ;;  %1312 = vmatprep.mubr.f32.mxu0 %v5427_v3  ;;  %v549_v23 = vpop.f32.mrf.mxu1 }
 0x110   :  { %v327_v37 = vpop.f32.mrf.mxu0 }
 0x111   :  { %5429 = vst [vmem:[#allocation2_spill] sm:$0xff] %v4348_v21  ;;  %v4351_v43 = vadd.f32 %v545_v11, %v327_v37  ;;  %v4353_v51 = vpop.f32.mrf.mxu1 }
 0x112   :  { %5431 = vst [vmem:[#allocation4_spill] sm:$0xff] %v4353_v51  ;;  %v331_v53 = vpop.f32.mrf.mxu0  ;;  %2980 = vmatmul.mubr.msk.f32.gmra.mxu0 %vm77_vm1, %v3954_v45 }
 0x113   :  { %5430 = vst [vmem:[#allocation3_spill] sm:$0xff] %v4351_v43  ;;  %v4357_v55 = vadd.f32 %v549_v23, %v331_v53  ;;  %1318 = vmatprep.mubr.f32.mxu0 %v5427_v3  ;;  %v555_v57 = vpop.f32.mrf.mxu1 }
 0x114   :  { %v4360_v44 = vpop.f32.mrf.mxu0 }
 0x115   :  { %5432 = vst [vmem:[#allocation5_spill] sm:$0xff] %v4357_v55  ;;  %5433 = vst [vmem:[#allocation6_spill] sm:$0xff] %v4360_v44  ;;  %v4362_v63 = vpop.f32.mrf.mxu1 }
 0x116   :  { %5434 = vst [vmem:[#allocation7_spill] sm:$0xff] %v4362_v63  ;;  %v337_v1 = vpop.f32.mrf.mxu0  ;;  %2981 = vmatmul.mubr.msk.f32.gmra.mxu0 %vm77_vm1, %v3965_v46 }
 0x117   :  { %v4366_v11 = vadd.f32 %v555_v57, %v337_v1  ;;  %1324 = vmatprep.mubr.f32.mxu0 %v5427_v3  ;;  %v561_v16 = vpop.f32.mrf.mxu1 }
 0x118   :  { %v4369_v37 = vpop.f32.mrf.mxu0 }
 0x119   :  { %5435 = vst [vmem:[#allocation8_spill] sm:$0xff] %v4366_v11  ;;  %5436 = vst [vmem:[#allocation9_spill] sm:$0xff] %v4369_v37  ;;  %v4371_v45 = vpop.f32.mrf.mxu1 }
 0x11a   :  { %5437 = vst [vmem:[#allocation10_spill] sm:$0xff] %v4371_v45  ;;  %v343_v23 = vpop.f32.mrf.mxu0  ;;  %2982 = vmatmul.mubr.msk.f32.gmra.mxu0 %vm77_vm1, %v3976_v47 }
 0x11b   :  { %v4375_v53 = vadd.f32 %v561_v16, %v343_v23  ;;  %1330 = vmatprep.mubr.f32.mxu0 %v5427_v3  ;;  %v567_v63 = vpop.f32.mrf.mxu1 }
 0x11c   :  { %v4378_v55 = vpop.f32.mrf.mxu0 }
 0x11d   :  { %5438 = vst [vmem:[#allocation11_spill] sm:$0xff] %v4375_v53  ;;  %5439 = vst [vmem:[#allocation12_spill] sm:$0xff] %v4378_v55  ;;  %v4380_v46 = vpop.f32.mrf.mxu1 }
 0x11e   :  { %5440 = vst [vmem:[#allocation13_spill] sm:$0xff] %v4380_v46  ;;  %v349_v57 = vpop.f32.mrf.mxu0  ;;  %2983 = vmatmul.mubr.msk.f32.gmra.mxu0 %vm77_vm1, %v3987_v48 }
 0x11f   :  { %v4384_v1 = vadd.f32 %v567_v63, %v349_v57  ;;  %1336 = vmatprep.mubr.f32.mxu0 %v5427_v3  ;;  %v573_v45 = vpop.f32.mrf.mxu1 }
 0x120   :  { %v4387_v11 = vpop.f32.mrf.mxu0 }
 0x121   :  { %5441 = vst [vmem:[#allocation14_spill] sm:$0xff] %v4384_v1  ;;  %5442 = vst [vmem:[#allocation15_spill] sm:$0xff] %v4387_v11  ;;  %v4389_v47 = vpop.f32.mrf.mxu1 }
 0x122   :  { %5443 = vst [vmem:[#allocation16_spill] sm:$0xff] %v4389_v47  ;;  %v355_v16 = vpop.f32.mrf.mxu0  ;;  %2984 = vmatmul.mubr.msk.f32.gmra.mxu0 %vm77_vm1, %v3998_v49 }
 0x123   :  { %v4393_v23 = vadd.f32 %v573_v45, %v355_v16  ;;  %1342 = vmatprep.mubr.f32.mxu0 %v5427_v3  ;;  %v579_v48 = vpop.f32.mrf.mxu1  ;;  %v59_v45 = vld [vmem:[%s5418_s0 + $0xd8] sm:$0xff] }
 0x124   :  { %v4396_v46 = vpop.f32.mrf.mxu0 }
 0x125   :  { %5444 = vst [vmem:[#allocation17_spill] sm:$0xff] %v4393_v23  ;;  %5445 = vst [vmem:[#allocation18_spill] sm:$0xff] %v4396_v46  ;;  %v4405_v1 = vpop.f32.mrf.mxu1 }
 0x126   :  { %v361_v63 = vpop.f32.mrf.mxu0  ;;  %2985 = vmatmul.mubr.msk.f32.gmra.mxu0 %vm77_vm1, %v4188_v2  ;;  %5448 = vst [vmem:[#allocation21_spill] sm:$0xff] %v4405_v1 }
 0x127   :  { %v4400_v57 = vadd.f32 %v579_v48, %v361_v63  ;;  %1348 = vmatprep.mubr.f32.mxu0 %v5427_v3  ;;  %v943_v2 = vpop.f32.mrf.mxu1 }
 0x128   :  { %v4403_v47 = vpop.f32.mrf.mxu0 }
 0x129   :  { %5446 = vst [vmem:[#allocation19_spill] sm:$0xff] %v4400_v57  ;;  %5447 = vst [vmem:[#allocation20_spill] sm:$0xff] %v4403_v47  ;;  %v945_v57 = vpop.f32.mrf.mxu1 }
 0x12a   :  { %v441_v49 = vpop.f32.mrf.mxu0  ;;  %2986 = vmatmul.mubr.msk.f32.gmra.mxu0 %vm77_vm1, %v4199_v4 }
 0x12b   :  { %1354 = vmatprep.mubr.f32.mxu0 %v5427_v3  ;;  %v442_v47 = vadd.f32 %v441_v49, %v4209_v5 }
 0x12c   :  { %v443_v16 = vpop.f32.mrf.mxu0  ;;  %v949_v11 = vpop.f32.mrf.mxu1 }
 0x12d   :  { %v444_v23 = vadd.f32 %v443_v16, %v4214_v6 }
 0x12e   :  { %v447_v48 = vpop.f32.mrf.mxu0  ;;  %2987 = vmatmul.mubr.msk.f32.gmra.mxu0 %vm77_vm1, %v59_v45  ;;  %v951_v21 = vpop.f32.mrf.mxu1 }
 0x12f   :  { %v448_v3 = vadd.f32 %v447_v48, %v4216_v7 }
 0x130   :  { %v449_v63 = vpop.f32.mrf.mxu0 }
 0x131   :  { %v450_v51 = vadd.f32 %v449_v63, %v4221_v9  ;;  %v462_v9 = vadd.f32 %v4232_v15, %v4239_v19 }
 0x132   :  { %v668_v1 = vpop.f32.mrf.mxu0 }
 0x133   :  { %v811_v46 = vadd.f32 %v668_v1, %v442_v47  ;;  %v456_v1 = vadd.f32 %v4223_v10, %v4230_v14 }
 0x134   :  { %v670_v4 = vpop.f32.mrf.mxu0 }
 0x135   :  { %v812_v53 = vadd.f32 %v670_v4, %v444_v23  ;;  %v4417_v55 = vadd.f32 %v943_v2, %v811_v46 }
 0x136   :  { %v674_v37 = vpop.f32.mrf.mxu0 }
 0x137   :  { %v813_v44 = vadd.f32 %v674_v37, %v448_v3  ;;  %v4420_v45 = vadd.f32 %v945_v57, %v812_v53 }
 0x138   :  { %v676_v43 = vpop.f32.mrf.mxu0 }
 0x139   :  { %v814_v5 = vadd.f32 %v676_v43, %v450_v51  ;;  %v4422_v49 = vadd.f32 %v949_v11, %v813_v44  ;;  %v4438_v51 = vpop.f32.mrf.mxu1 }
 0x13a   :  { %v680_v6 = vpop.f32.mrf.mxu0 }
 0x13b   :  { %v4427_v7 = vadd.f32 %v680_v6, %v4227_v12  ;;  %v4429_v46 = vadd.f32 %v951_v21, %v814_v5  ;;  %v468_v12 = vadd.f32 %v4241_v20, %v4248_v24  ;;  %v4447_v21 = vpop.f32.mrf.mxu1 }
 0x13c   :  { %v682_v47 = vpop.f32.mrf.mxu0 }
 0x13d   :  { %v4431_v23 = vadd.f32 %v682_v47, %v456_v1  ;;  %v4456_v57 = vpop.f32.mrf.mxu1 }
 0x13e   :  { %v686_v3 = vpop.f32.mrf.mxu0 }
 0x13f   :  { %v4436_v43 = vadd.f32 %v686_v3, %v4236_v17  ;;  %v474_v17 = vadd.f32 %v4250_v25, %v4257_v29  ;;  %v4465_v48 = vpop.f32.mrf.mxu1 }
 0x140   :  { %v688_v44 = vpop.f32.mrf.mxu0 }
 0x141   :  { %v4440_v11 = vadd.f32 %v688_v44, %v462_v9  ;;  %v4474_v5 = vpop.f32.mrf.mxu1 }
 0x142   :  { %v692_v10 = vpop.f32.mrf.mxu0 }
 0x143   :  { %v4445_v14 = vadd.f32 %v692_v10, %v4245_v22  ;;  %v480_v22 = vadd.f32 %v4259_v30, %v4266_v52  ;;  %v4483_v47 = vpop.f32.mrf.mxu1 }
 0x144   :  { %v694_v37 = vpop.f32.mrf.mxu0 }
 0x145   :  { %v4449_v53 = vadd.f32 %v694_v37, %v468_v12  ;;  %v4492_v44 = vpop.f32.mrf.mxu1 }
 0x146   :  { %v698_v15 = vpop.f32.mrf.mxu0 }
 0x147   :  { %v4454_v19 = vadd.f32 %v698_v15, %v4254_v27  ;;  %v486_v27 = vadd.f32 %v4268_v32, %v4275_v56  ;;  %v4501_v37 = vpop.f32.mrf.mxu1 }
 0x148   :  { %v700_v16 = vpop.f32.mrf.mxu0 }
 0x149   :  { %v4458_v2 = vadd.f32 %v700_v16, %v474_v17 }
 0x14a   :  { %v704_v20 = vpop.f32.mrf.mxu0 }
 0x14b   :  { %v4463_v24 = vadd.f32 %v704_v20, %v4263_v50  ;;  %v492_v50 = vadd.f32 %v4277_v33, %v4284_v60 }
 0x14c   :  { %v706_v63 = vpop.f32.mrf.mxu0 }
 0x14d   :  { %v4467_v4 = vadd.f32 %v706_v63, %v480_v22 }
 0x14e   :  { %v710_v25 = vpop.f32.mrf.mxu0 }
 0x14f   :  { %v4472_v29 = vadd.f32 %v710_v25, %v4272_v54  ;;  %v498_v54 = vadd.f32 %v4286_v34, %v4293_v0  ;;  %v4508_v0 = vpop.f32.mrf.mxu1 }
 0x150   :  { %v712_v6 = vpop.f32.mrf.mxu0 }
 0x151   :  { %v4476_v1 = vadd.f32 %v712_v6, %v486_v27 }
 0x152   :  { %v716_v30 = vpop.f32.mrf.mxu0 }
 0x153   :  { %v4481_v52 = vadd.f32 %v716_v30, %v4281_v58  ;;  %v504_v58 = vadd.f32 %v4295_v35, %v4302_v13 }
 0x154   :  { %v718_v3 = vpop.f32.mrf.mxu0 }
 0x155   :  { %v4485_v9 = vadd.f32 %v718_v3, %v492_v50  ;;  %v3000_v50 = vld [vmem:[%s5419_s3 + $0xd0] sm:$0xff] }
 0x156   :  { %v722_v32 = vpop.f32.mrf.mxu0 }
 0x157   :  { %v4490_v56 = vadd.f32 %v722_v32, %v4290_v62 }
 0x158   :  { %v724_v10 = vpop.f32.mrf.mxu0 }
 0x159   :  { %v4494_v12 = vadd.f32 %v724_v10, %v498_v54 }
 0x15a   :  { %v728_v33 = vpop.f32.mrf.mxu0 }
 0x15b   :  { %v4499_v60 = vadd.f32 %v728_v33, %v4299_v8  ;;  %v4516_v8 = vpop.f32.mrf.mxu1 }
 0x15c   :  { %v730_v15 = vpop.f32.mrf.mxu0 }
 0x15d   :  { %v4503_v17 = vadd.f32 %v730_v15, %v504_v58 }
 0x15e   :  { %v734_v34 = vpop.f32.mrf.mxu0 }
 0x15f   :  { %v4506_v62 = vadd.f32 %v734_v34, %v4306_v18  ;;  %v3001_v18 = vld [vmem:[%s5419_s3 + $0xd8] sm:$0xf] }
 0x160   :  { %v736_v16 = vpop.f32.mrf.mxu0  ;;  %3283 = vmatprep.subr.msk.mxu1 %vm150_vm0, %v3001_v18 }
 0x161   :  { %v4511_v20 = vadd.f32 %v736_v16, %v4309_v26  ;;  %v4528_v26 = vpop.f32.mrf.mxu1  ;;  %3284 = vmatpush3.msk.msra.mxu1 %vm150_vm0, %v3001_v18 }
 0x162   :  { %v740_v22 = vpop.f32.mrf.mxu0  ;;  %3285 = vmatprep.subr.mxu1 %v3000_v50 }
 0x163   :  { %v4514_v35 = vadd.f32 %v740_v22, %v4313_v31  ;;  %3286 = vmatpush3.msra.mxu1 %v3000_v50  ;;  %v2996_v50 = vld [vmem:[%s5419_s3 + $0xb0] sm:$0xff] }
 0x164   :  { %v742_v13 = vpop.f32.mrf.mxu0 }
 0x165   :  { %v4519_v63 = vadd.f32 %v742_v13, %v4316_v38 }
 0x166   :  { %v746_v25 = vpop.f32.mrf.mxu0 }
 0x167   :  { %v4525_v27 = vadd.f32 %v746_v25, %v4320_v59  ;;  %v4540_v59 = vpop.f32.mrf.mxu1 }
 0x168   :  { %v748_v31 = vpop.f32.mrf.mxu0 }
 0x169   :  { %5449 = vst [vmem:[#allocation22_spill] sm:$0xff] %v4525_v27  ;;  %v4532_v6 = vadd.f32 %v748_v31, %v4323_v39  ;;  %v4548_v10 = vpop.f32.mrf.mxu1  ;;  %v5459_v31 = vld [vmem:[#allocation3_spill] sm:$0xff] }
 0x16a   :  { %v752_v38 = vpop.f32.mrf.mxu0  ;;  %v5488_v27 = vld [vmem:[#allocation19_spill] sm:$0xff] }
 0x16b   :  { %5450 = vst [vmem:[#allocation23_spill] sm:$0xff] %v4532_v6  ;;  %v4535_v30 = vadd.f32 %v752_v38, %v4327_v36  ;;  %v4559_v34 = vpop.f32.mrf.mxu1 }
 0x16c   :  { %v754_v3 = vpop.f32.mrf.mxu0 }
 0x16d   :  { %5451 = vst [vmem:[#allocation24_spill] sm:$0xff] %v4535_v30  ;;  %v4543_v32 = vadd.f32 %v754_v3, %v4330_v40  ;;  %v2999_v40 = vld [vmem:[%s5419_s3 + $0xc8] sm:$0xff]  ;;  %v4570_v25 = vpop.f32.mrf.mxu1  ;;  %v5483_v30 = vld [vmem:[#allocation17_spill] sm:$0xff] }
 0x16e   :  { %v758_v54 = vpop.f32.mrf.mxu0  ;;  %3287 = vmatprep.subr.mxu1 %v2999_v40 }
 0x16f   :  { %5452 = vst [vmem:[#allocation25_spill] sm:$0xff] %v4543_v32  ;;  %v4546_v39 = vadd.f32 %v758_v54, %v4334_v28  ;;  %3288 = vmatpush3.msra.mxu1 %v2999_v40  ;;  %v5461_v54 = vld [vmem:[#allocation6_spill] sm:$0xff]  ;;  %v5463_v40 = vld [vmem:[#allocation5_spill] sm:$0xff] }
 0x170   :  { %v760_v36 = vpop.f32.mrf.mxu0 }
 0x171   :  { %5453 = vst [vmem:[#allocation26_spill] sm:$0xff] %v4546_v39  ;;  %v4551_v33 = vadd.f32 %v760_v36, %v4337_v41  ;;  %v2998_v41 = vld [vmem:[%s5419_s3 + $0xc0] sm:$0xff]  ;;  %v5462_v36 = vld [vmem:[#allocation4_spill] sm:$0xff]  ;;  %v5477_v39 = vld [vmem:[#allocation13_spill] sm:$0xff] }
 0x172   :  { %v764_v58 = vpop.f32.mrf.mxu0  ;;  %3289 = vmatprep.subr.mxu1 %v2998_v41 }
 0x173   :  { %5454 = vst [vmem:[#allocation27_spill] sm:$0xff] %v4551_v33  ;;  %v4554_v15 = vadd.f32 %v764_v58, %v4341_v61  ;;  %v5457_v61 = vld [vmem:[#allocation2_spill] sm:$0xff]  ;;  %3290 = vmatpush3.msra.mxu1 %v2998_v41  ;;  %v552_v58 = vadd.f32 %v5462_v36, %v5461_v54  ;;  %v2995_v41 = vld [vmem:[%s5419_s3 + $0xa8] sm:$0xff] }
 0x174   :  { %v766_v16 = vpop.f32.mrf.mxu0  ;;  %v5467_v36 = vld [vmem:[#allocation7_spill] sm:$0xff] }
 0x175   :  { %5455 = vst [vmem:[#allocation28_spill] sm:$0xff] %v4554_v15  ;;  %v4562_v28 = vadd.f32 %v766_v16, %v4344_v42  ;;  %v2997_v42 = vld [vmem:[%s5419_s3 + $0xb8] sm:$0xff]  ;;  %v5476_v33 = vld [vmem:[#allocation15_spill] sm:$0xff] }
 0x176   :  { %v770_v22 = vpop.f32.mrf.mxu0  ;;  %3291 = vmatprep.subr.mxu1 %v2997_v42 }
 0x177   :  { %5456 = vst [vmem:[#allocation29_spill] sm:$0xff] %v4562_v28  ;;  %v4568_v13 = vadd.f32 %v770_v22, %v5457_v61  ;;  %3292 = vmatpush3.msra.mxu1 %v2997_v42  ;;  %v4589_v22 = vpop.f32.mrf.mxu1  ;;  %v5472_v28 = vld [vmem:[#allocation10_spill] sm:$0xff] }
 0x178   :  { %v772_v18 = vpop.f32.mrf.mxu0  ;;  %3293 = vmatprep.subr.mxu1 %v2996_v50 }
 0x179   :  { %5458 = vst [vmem:[#allocation2_spill] sm:$0xff] %v4568_v13  ;;  %v4573_v38 = vadd.f32 %v772_v18, %v5459_v31  ;;  %3294 = vmatpush3.msra.mxu1 %v2996_v50  ;;  %v2994_v31 = vld [vmem:[%s5419_s3 + $0xa0] sm:$0xff]  ;;  %v5471_v13 = vld [vmem:[#allocation12_spill] sm:$0xff] }
 0x17a   :  { %v776_v3 = vpop.f32.mrf.mxu0  ;;  %3295 = vmatprep.subr.mxu1 %v2995_v41 }
 0x17b   :  { %5460 = vst [vmem:[#allocation3_spill] sm:$0xff] %v4573_v38  ;;  %v4584_v16 = vadd.f32 %v776_v3, %v5463_v40  ;;  %v5466_v3 = vld [vmem:[#allocation9_spill] sm:$0xff]  ;;  %v5468_v40 = vld [vmem:[#allocation8_spill] sm:$0xff]  ;;  %3296 = vmatpush3.msra.mxu1 %v2995_v41 }
 0x17c   :  { %v778_v61 = vpop.f32.mrf.mxu0  ;;  %v558_v42 = vadd.f32 %v5467_v36, %v5466_v3  ;;  %v2993_v38 = vld [vmem:[%s5419_s3 + $0x98] sm:$0xff]  ;;  %3297 = vmatprep.subr.mxu1 %v2994_v31  ;;  %v564_v3 = vadd.f32 %v5472_v28, %v5471_v13  ;;  %v5473_v36 = vld [vmem:[#allocation11_spill] sm:$0xff] }
 0x17d   :  { %5464 = vst [vmem:[#allocation6_spill] sm:$0xff] %v4584_v16  ;;  %v4591_v18 = vadd.f32 %v778_v61, %v552_v58  ;;  %v4604_v58 = vpop.f32.mrf.mxu1  ;;  %3298 = vmatpush3.msra.mxu1 %v2994_v31 }
 0x17e   :  { %v782_v54 = vpop.f32.mrf.mxu0  ;;  %3299 = vmatprep.subr.mxu1 %v2993_v38 }
 0x17f   :  { %5465 = vst [vmem:[#allocation4_spill] sm:$0xff] %v4591_v18  ;;  %v4599_v16 = vadd.f32 %v782_v54, %v5468_v40  ;;  %3300 = vmatpush3.msra.mxu1 %v2993_v38  ;;  %v4613_v41 = vpop.f32.mrf.mxu1  ;;  %v5481_v38 = vld [vmem:[#allocation18_spill] sm:$0xff] }
 0x180   :  { %v784_v50 = vpop.f32.mrf.mxu0 }
 0x181   :  { %5469 = vst [vmem:[#allocation5_spill] sm:$0xff] %v4599_v16  ;;  %v4606_v61 = vadd.f32 %v784_v50, %v558_v42  ;;  %v570_v42 = vadd.f32 %v5477_v39, %v5476_v33  ;;  %v5478_v50 = vld [vmem:[#allocation14_spill] sm:$0xff]  ;;  %v4622_v32 = vpop.f32.mrf.mxu1 }
 0x182   :  { %v788_v18 = vpop.f32.mrf.mxu0 }
 0x183   :  { %5470 = vst [vmem:[#allocation9_spill] sm:$0xff] %v4606_v61  ;;  %v4611_v54 = vadd.f32 %v788_v18, %v5473_v36  ;;  %v1411_v61 = vlaneseq  ;;  %v5482_v36 = vld [vmem:[#allocation16_spill] sm:$0xff] }
 0x184   :  { %v790_v40 = vpop.f32.mrf.mxu0 }
 0x185   :  { %5474 = vst [vmem:[#allocation7_spill] sm:$0xff] %v4611_v54  ;;  %v4615_v16 = vadd.f32 %v790_v40, %v564_v3  ;;  %v576_v54 = vadd.f32 %v5482_v36, %v5481_v38  ;;  %v1412_v40 = vshrl.u32 %v1411_v61, 7 }
 0x186   :  { %v794_v15 = vpop.f32.mrf.mxu0 }
 0x187   :  { %5475 = vst [vmem:[#allocation8_spill] sm:$0xff] %v4615_v16  ;;  %v4620_v31 = vadd.f32 %v794_v15, %v5478_v50  ;;  %v4631_v16 = vpop.f32.mrf.mxu1  ;;  %v5486_v50 = vld [vmem:[#allocation20_spill] sm:$0xff] }
 0x188   :  { %v796_v28 = vpop.f32.mrf.mxu0 }
 0x189   :  { %5479 = vst [vmem:[#allocation12_spill] sm:$0xff] %v4620_v31  ;;  %v4624_v13 = vadd.f32 %v796_v28, %v570_v42  ;;  %v5487_v31 = vld [vmem:[#allocation21_spill] sm:$0xff]  ;;  %v1413_v28 = vsub.s32 0, %v1412_v40 }
 0x18a   :  { %v800_v18 = vpop.f32.mrf.mxu0  ;;  %v582_v6 = vadd.f32 %v5487_v31, %v5486_v50 }
 0x18b   :  { %5480 = vst [vmem:[#allocation10_spill] sm:$0xff] %v4624_v13  ;;  %v4629_v3 = vadd.f32 %v800_v18, %v5483_v30  ;;  %v4640_v13 = vpop.f32.mrf.mxu1  ;;  %v1409_v30 = vld [vmem:[%s5420_s2] sm:$0x3]  ;;  %v1417_v18 = vsub.s32 1, %v1412_v40 }
 0x18c   :  { %v802_v39 = vpop.f32.mrf.mxu0 }
 0x18d   :  { %5484 = vst [vmem:[#allocation11_spill] sm:$0xff] %v4629_v3  ;;  %v4633_v33 = vadd.f32 %v802_v39, %v576_v54  ;;  %v4648_v39 = vrot.slane %v1409_v30, %v1413_v28  ;;  %v4650_v31 = vpop.f32.mrf.mxu1  ;;  %v4653_v50 = vrot.slane %v1409_v30, %v1417_v18 }
 0x18e   :  { %v806_v15 = vpop.f32.mrf.mxu0 }
 0x18f   :  { %5485 = vst [vmem:[#allocation15_spill] sm:$0xff] %v4633_v33  ;;  %v4638_v42 = vadd.f32 %v806_v15, %v5488_v27 }
 0x190   :  { %v808_v38 = vpop.f32.mrf.mxu0 }
 0x191   :  { %5489 = vst [vmem:[#allocation13_spill] sm:$0xff] %v4638_v42  ;;  %v4645_v61 = vadd.f32 %v808_v38, %v582_v6  ;;  %v4657_v6 = vpop.f32.mrf.mxu1 }
 0x192   :  { %v1218_v54 = vpop.f32.mrf.mxu0  ;;  %5491 = vst [vmem:[#allocation18_spill] sm:$0xff] %v4657_v6 }
 0x193   :  { %5490 = vst [vmem:[#allocation14_spill] sm:$0xff] %v4645_v61  ;;  %v1361_v36 = vadd.f32 %v1218_v54, %v4417_v55  ;;  %v1090_v55 = vadd.f32 %v4438_v51, %v4427_v7  ;;  %v4669_v61 = vpop.f32.mrf.mxu1 }
 0x194   :  { %v1220_v27 = vpop.f32.mrf.mxu0 }
 0x195   :  { %v1362_v15 = vadd.f32 %v1220_v27, %v4420_v45  ;;  %v1421_v33 = vadd.f32 %v4648_v39, %v1361_v36  ;;  %v1091_v45 = vadd.f32 %v4447_v21, %v4431_v23  ;;  %v1092_v27 = vadd.f32 %v4456_v57, %v4436_v43  ;;  %v2992_v23 = vld [vmem:[%s5419_s3 + $0x90] sm:$0xff]  ;;  %v2991_v57 = vld [vmem:[%s5419_s3 + $0x88] sm:$0xff] }
 0x196   :  { %v1224_v42 = vpop.f32.mrf.mxu0  ;;  %v1093_v21 = vadd.f32 %v4465_v48, %v4440_v11  ;;  %3301 = vmatprep.subr.mxu1 %v2992_v23 }
 0x197   :  { %v1363_v3 = vadd.f32 %v1224_v42, %v4422_v49  ;;  %v1422_v28 = vadd.f32 %v4653_v50, %v1362_v15  ;;  %v1469_v18 = vmax.f32 %v1421_v33, 0.0  ;;  %3302 = vmatpush3.msra.mxu1 %v2992_v23 }
 0x198   :  { %v1226_v40 = vpop.f32.mrf.mxu0  ;;  %3303 = vmatprep.subr.mxu1 %v2991_v57 }
 0x199   :  { %v1423_v38 = vadd.f32 %v4648_v39, %v1363_v3  ;;  %v1364_v54 = vadd.f32 %v1226_v40, %v4429_v46  ;;  %v1470_v51 = vmax.f32 %v1422_v28, 0.0  ;;  %3304 = vmatpush3.msra.mxu1 %v2991_v57 }
 0x19a   :  { %v1230_v30 = vpop.f32.mrf.mxu0 }
 0x19b   :  { %v1471_v36 = vmax.f32 %v1423_v38, 0.0  ;;  %v1424_v49 = vadd.f32 %v4653_v50, %v1364_v54  ;;  %v1365_v42 = vadd.f32 %v1230_v30, %v1090_v55  ;;  %v4684_v55 = vpop.f32.mrf.mxu1  ;;  %v1094_v38 = vadd.f32 %v4474_v5, %v4445_v14  ;;  %v3079_v30 = vld [vmem:[%s5419_s3 + $0x228] sm:$0xf]  ;;  %v2989_v14 = vld [vmem:[%s5419_s3 + $0x78] sm:$0xff]  ;;  %v3078_v5 = vld [vmem:[%s5419_s3 + $0x220] sm:$0xff] }
 0x19c   :  { %v1232_v7 = vpop.f32.mrf.mxu0  ;;  %3443 = vmatprep.subr.msk.mxu0 %vm150_vm0, %v3079_v30 }
 0x19d   :  { %v1472_v15 = vmax.f32 %v1424_v49, 0.0  ;;  %v1366_v3 = vadd.f32 %v1232_v7, %v1091_v45  ;;  %v4671_v6 = vmax.f32 %v1469_v18, %v1471_v36  ;;  %v1425_v33 = vadd.f32 %v4648_v39, %v1365_v42  ;;  %v2990_v45 = vld [vmem:[%s5419_s3 + $0x80] sm:$0xff]  ;;  %3444 = vmatpush3.msk.msra.mxu0 %vm150_vm0, %v3079_v30  ;;  %v3075_v30 = vld [vmem:[%s5419_s3 + $0x208] sm:$0xff] }
 0x19e   :  { %v1236_v46 = vpop.f32.mrf.mxu0  ;;  %v1095_v18 = vadd.f32 %v4483_v47, %v4449_v53  ;;  %3305 = vmatprep.subr.mxu1 %v2990_v45  ;;  %v1096_v53 = vadd.f32 %v4492_v44, %v4454_v19  ;;  %v4709_v47 = vpop.f32.mrf.mxu1  ;;  %3445 = vmatprep.subr.mxu0 %v3078_v5  ;;  %v2988_v19 = vld [vmem:[%s5419_s3 + $0x70] sm:$0xff]  ;;  %v3077_v44 = vld [vmem:[%s5419_s3 + $0x218] sm:$0xff] }
 0x19f   :  { %v1367_v40 = vadd.f32 %v1236_v46, %v1092_v27  ;;  %v4679_v43 = vmax.f32 %v1470_v51, %v1472_v15  ;;  %v1426_v54 = vadd.f32 %v4653_v50, %v1366_v3  ;;  %v1473_v49 = vmax.f32 %v1425_v33, 0.0  ;;  %3306 = vmatpush3.msra.mxu1 %v2990_v45  ;;  %3446 = vmatpush3.msra.mxu0 %v3078_v5 }
 0x1a0   :  { %v1238_v28 = vpop.f32.mrf.mxu0  ;;  %3307 = vmatprep.subr.mxu1 %v2989_v14  ;;  %3447 = vmatprep.subr.mxu0 %v3077_v44 }
 0x1a1   :  { %v1427_v11 = vadd.f32 %v4648_v39, %v1367_v40  ;;  %v1368_v48 = vadd.f32 %v1238_v28, %v1093_v21  ;;  %v1474_v15 = vmax.f32 %v1426_v54, 0.0  ;;  %v1097_v21 = vadd.f32 %v4501_v37, %v4458_v2  ;;  %3308 = vmatpush3.msra.mxu1 %v2989_v14  ;;  %v4724_v2 = vpop.f32.mrf.mxu1  ;;  %3448 = vmatpush3.msra.mxu0 %v3077_v44 }
 0x1a2   :  { %v1242_v36 = vpop.f32.mrf.mxu0  ;;  %3309 = vmatprep.subr.mxu1 %v2988_v19  ;;  %v1098_v54 = vadd.f32 %v4508_v0, %v4463_v24  ;;  %v1100_v0 = vadd.f32 %v4528_v26, %v4472_v29  ;;  %v3073_v29 = vld [vmem:[%s5419_s3 + $0x1f8] sm:$0xff] }
 0x1a3   :  { %v1475_v42 = vmax.f32 %v1427_v11, 0.0  ;;  %v1428_v27 = vadd.f32 %v4653_v50, %v1368_v48  ;;  %v1369_v7 = vadd.f32 %v1242_v36, %v1094_v38  ;;  %3310 = vmatpush3.msra.mxu1 %v2988_v19  ;;  %v3076_v38 = vld [vmem:[%s5419_s3 + $0x210] sm:$0xff] }
 0x1a4   :  { %v1244_v51 = vpop.f32.mrf.mxu0  ;;  %3449 = vmatprep.subr.mxu0 %v3076_v38 }
 0x1a5   :  { %v1476_v3 = vmax.f32 %v1428_v27, 0.0  ;;  %v1370_v46 = vadd.f32 %v1244_v51, %v1095_v18  ;;  %v4711_v23 = vmax.f32 %v1473_v49, %v1475_v42  ;;  %v1429_v40 = vadd.f32 %v4648_v39, %v1369_v7  ;;  %3450 = vmatpush3.msra.mxu0 %v3076_v38  ;;  %v4742_v42 = vpop.f32.mrf.mxu1 }
 0x1a6   :  { %v1248_v33 = vpop.f32.mrf.mxu0  ;;  %v1099_v18 = vadd.f32 %v4516_v8, %v4467_v4  ;;  %3451 = vmatprep.subr.mxu0 %v3075_v30  ;;  %v3074_v4 = vld [vmem:[%s5419_s3 + $0x200] sm:$0xff] }
 0x1a7   :  { %v1371_v57 = vadd.f32 %v1248_v33, %v1096_v53  ;;  %1569 = vrot.lane.b32.xlu0 %v4711_v23, %s3609_s29  ;;  %v1520_v28 = vmax.f32 %v1474_v15, %v1476_v3  ;;  %v1430_v11 = vadd.f32 %v4653_v50, %v1370_v46  ;;  %v1477_v14 = vmax.f32 %v1429_v40, 0.0  ;;  %3452 = vmatpush3.msra.mxu0 %v3075_v30  ;;  %v3072_v33 = vld [vmem:[%s5419_s3 + $0x1f0] sm:$0xff]  ;;  %v4760_v19 = vpop.f32.mrf.mxu1 }
 0x1a8   :  { %v1250_v37 = vpop.f32.mrf.mxu0  ;;  %v1101_v15 = vadd.f32 %v4540_v59, %v4476_v1  ;;  %3453 = vmatprep.subr.mxu0 %v3074_v4  ;;  %v1102_v59 = vadd.f32 %v4548_v10, %v4481_v52  ;;  %v1104_v10 = vadd.f32 %v4570_v25, %v4490_v56  ;;  %v3069_v56 = vld [vmem:[%s5419_s3 + $0x1d8] sm:$0xff] }
 0x1a9   :  { %v1431_v48 = vadd.f32 %v4648_v39, %v1371_v57  ;;  %v1372_v45 = vadd.f32 %v1250_v37, %v1097_v21  ;;  %v1478_v8 = vmax.f32 %v1430_v11, 0.0  ;;  %3454 = vmatpush3.msra.mxu0 %v3074_v4  ;;  %v1103_v37 = vadd.f32 %v4559_v34, %v4485_v9  ;;  %v3070_v9 = vld [vmem:[%s5419_s3 + $0x1e0] sm:$0xff] }
 0x1aa   :  { %v1254_v36 = vpop.f32.mrf.mxu0  ;;  %3455 = vmatprep.subr.mxu0 %v3073_v29 }
 0x1ab   :  { %v1479_v5 = vmax.f32 %v1431_v48, 0.0  ;;  %v1432_v49 = vadd.f32 %v4653_v50, %v1372_v45  ;;  %v1373_v24 = vadd.f32 %v1254_v36, %v1098_v54  ;;  %1571 = vrot.lane.b32.xlu0 %v1520_v28, %s3609_s29  ;;  %3456 = vmatpush3.msra.mxu0 %v3073_v29  ;;  %v3071_v28 = vld [vmem:[%s5419_s3 + $0x1e8] sm:$0xff]  ;;  %v4775_v45 = vpop.f32.mrf.mxu1 }
 0x1ac   :  { %v1256_v27 = vpop.f32.mrf.mxu0  ;;  %3457 = vmatprep.subr.mxu0 %v3072_v33 }
 0x1ad   :  { %v1480_v7 = vmax.f32 %v1432_v49, 0.0  ;;  %v1374_v53 = vadd.f32 %v1256_v27, %v1099_v18  ;;  %v4747_v51 = vmax.f32 %v1477_v14, %v1479_v5  ;;  %v1433_v26 = vadd.f32 %v4648_v39, %v1373_v24  ;;  %3458 = vmatpush3.msra.mxu0 %v3072_v33  ;;  %v3068_v27 = vld [vmem:[%s5419_s3 + $0x1d0] sm:$0xff] }
 0x1ae   :  { %v1260_v3 = vpop.f32.mrf.mxu0  ;;  %3459 = vmatprep.subr.mxu0 %v3071_v28  ;;  %v1105_v5 = vadd.f32 %v4589_v22, %v4494_v12  ;;  %v1106_v12 = vadd.f32 %v4604_v58, %v4499_v60  ;;  %v4795_v22 = vpop.f32.mrf.mxu1 }
 0x1af   :  { %v1375_v46 = vadd.f32 %v1260_v3, %v1100_v0  ;;  %1573 = vrot.lane.b32.xlu1 %v4747_v51, %s3609_s29  ;;  %v1522_v21 = vmax.f32 %v1478_v8, %v1480_v7  ;;  %v1434_v44 = vadd.f32 %v4653_v50, %v1374_v53  ;;  %v1481_v54 = vmax.f32 %v1433_v26, 0.0  ;;  %3460 = vmatpush3.msra.mxu0 %v3071_v28 }
 0x1b0   :  { %v1262_v1 = vpop.f32.mrf.mxu0  ;;  %3461 = vmatprep.subr.mxu0 %v3070_v9  ;;  %v1107_v3 = vadd.f32 %v4613_v41, %v4503_v17  ;;  %v4808_v33 = vpop.f32.mrf.mxu1 }
 0x1b1   :  { %v1435_v40 = vadd.f32 %v4648_v39, %v1375_v46  ;;  %v1376_v57 = vadd.f32 %v1262_v1, %v1101_v15  ;;  %v1482_v34 = vmax.f32 %v1434_v44, 0.0  ;;  %3462 = vmatpush3.msra.mxu0 %v3070_v9  ;;  %v3067_v15 = vld [vmem:[%s5419_s3 + $0x1c8] sm:$0xff] }
 0x1b2   :  { %v1266_v38 = vpop.f32.mrf.mxu0  ;;  %3463 = vmatprep.subr.mxu0 %v3069_v56 }
 0x1b3   :  { %v1483_v11 = vmax.f32 %v1435_v40, 0.0  ;;  %v1436_v48 = vadd.f32 %v4653_v50, %v1376_v57  ;;  %v1377_v52 = vadd.f32 %v1266_v38, %v1102_v59  ;;  %1575 = vrot.lane.b32.xlu1 %v1522_v21, %s3609_s29  ;;  %3464 = vmatpush3.msra.mxu0 %v3069_v56  ;;  %v1108_v21 = vadd.f32 %v4622_v32, %v4506_v62  ;;  %v3066_v59 = vld [vmem:[%s5419_s3 + $0x1c0] sm:$0xff]  ;;  %v4820_v62 = vld [vmem:[%s5419_s3 + $0x68] sm:$0xf] }
 0x1b4   :  { %v1268_v30 = vpop.f32.mrf.mxu0  ;;  %3465 = vmatprep.subr.mxu0 %v3068_v27  ;;  %v1109_v57 = vadd.f32 %v4631_v16, %v4511_v20  ;;  %3323 = vmatprep.subr.msk.mxu1 %vm150_vm0, %v4820_v62  ;;  %v5492_v20 = vmov 0.0   ;;  %v1110_v16 = vadd.f32 %v4640_v13, %v4514_v35  ;;  %v5494_v56 = vld [vmem:[#allocation18_spill] sm:$0xff] }
 0x1b5   :  { %v1484_v18 = vmax.f32 %v1436_v48, 0.0  ;;  %v1378_v36 = vadd.f32 %v1268_v30, %v1103_v37  ;;  %v4780_v14 = vmax.f32 %v1481_v54, %v1483_v11  ;;  %v1437_v25 = vadd.f32 %v4648_v39, %v1377_v52  ;;  %3466 = vmatpush3.msra.mxu0 %v3068_v27  ;;  %v4825_v54 = vpop.f32.mrf.mxu1 }
 0x1b6   :  { %v1272_v49 = vpop.f32.mrf.mxu0  ;;  %3467 = vmatprep.subr.mxu0 %v3067_v15  ;;  %v1111_v30 = vadd.f32 %v4650_v31, %v4519_v63 }
 0x1b7   :  { %v1379_v24 = vadd.f32 %v1272_v49, %v1104_v10  ;;  %1577 = vrot.lane.b32.xlu0 %v4780_v14, %s3609_s29  ;;  %v1524_v0 = vmax.f32 %v1482_v34, %v1484_v18  ;;  %v1438_v8 = vadd.f32 %v4653_v50, %v1378_v36  ;;  %v1485_v58 = vmax.f32 %v1437_v25, 0.0  ;;  %3468 = vmatpush3.msra.mxu0 %v3067_v15  ;;  %v5493_v49 = vld [vmem:[#allocation22_spill] sm:$0xff]  ;;  %v4840_v35 = vpop.f32.mrf.mxu1 }
 0x1b8   :  { %v1274_v4 = vpop.f32.mrf.mxu0  ;;  %3469 = vmatprep.subr.mxu0 %v3066_v59  ;;  %v1112_v25 = vadd.f32 %v5494_v56, %v5493_v49 }
 0x1b9   :  { %v1439_v7 = vadd.f32 %v4648_v39, %v1379_v24  ;;  %v1380_v53 = vadd.f32 %v1274_v4, %v1105_v5  ;;  %1579 = vrot.lane.b32.xlu1 %v1524_v0, %s3609_s29  ;;  %v1486_v17 = vmax.f32 %v1438_v8, 0.0  ;;  %3470 = vmatpush3.msra.mxu0 %v3066_v59  ;;  %v5495_v8 = vld [vmem:[#allocation23_spill] sm:$0xff]  ;;  %v4849_v15 = vpop.f32.mrf.mxu1 }
 0x1ba   :  { %v1278_v60 = vpop.f32.mrf.mxu0  ;;  %3502 = vmatprep.subr.mxu0 %v5492_v20  ;;  %v1113_v63 = vadd.f32 %v4669_v61, %v5495_v8  ;;  %v5497_v61 = vld [vmem:[#allocation25_spill] sm:$0xff]  ;;  %v5502_v8 = vld [vmem:[#allocation2_spill] sm:$0xff] }
 0x1bb   :  { %v1487_v29 = vmax.f32 %v1439_v7, 0.0  ;;  %v1440_v26 = vadd.f32 %v4653_v50, %v1380_v53  ;;  %v1381_v46 = vadd.f32 %v1278_v60, %v1106_v12  ;;  %v5496_v60 = vld [vmem:[#allocation24_spill] sm:$0xff] }
 0x1bc   :  { %v1280_v1 = vpop.f32.mrf.mxu0 }
 0x1bd   :  { %v1488_v41 = vmax.f32 %v1440_v26, 0.0  ;;  %v1382_v44 = vadd.f32 %v1280_v1, %v1107_v3  ;;  %v4813_v40 = vmax.f32 %v1485_v58, %v1487_v29  ;;  %v1441_v32 = vadd.f32 %v4648_v39, %v1381_v46 }
 0x1be   :  { %v1284_v28 = vpop.f32.mrf.mxu0  ;;  %v1114_v58 = vadd.f32 %v4684_v55, %v5496_v60  ;;  %v1059_v55 = vpop.f32.mrf.mxu1 }
 0x1bf   :  { %v1383_v37 = vadd.f32 %v1284_v28, %v1108_v21  ;;  %1581 = vrot.lane.b32.xlu0 %v4813_v40, %s3609_s29  ;;  %v1526_v38 = vmax.f32 %v1486_v17, %v1488_v41  ;;  %v1442_v48 = vadd.f32 %v4653_v50, %v1382_v44  ;;  %v1489_v34 = vmax.f32 %v1441_v32, 0.0 }
 0x1c0   :  { %v1286_v11 = vpop.f32.mrf.mxu0  ;;  %v1115_v21 = vadd.f32 %v4709_v47, %v5497_v61 }
 0x1c1   :  { %v1443_v52 = vadd.f32 %v4648_v39, %v1383_v37  ;;  %v1384_v10 = vadd.f32 %v1286_v11, %v1109_v57  ;;  %1583 = vrot.lane.b32.xlu1 %v1526_v38, %s3609_s29  ;;  %v1490_v24 = vmax.f32 %v1442_v48, 0.0  ;;  %v5498_v57 = vld [vmem:[#allocation26_spill] sm:$0xff] }
 0x1c2   :  { %v1290_v9 = vpop.f32.mrf.mxu0  ;;  %v1116_v28 = vadd.f32 %v4724_v2, %v5498_v57 }
 0x1c3   :  { %v1491_v18 = vmax.f32 %v1443_v52, 0.0  ;;  %v1444_v36 = vadd.f32 %v4653_v50, %v1384_v10  ;;  %v1385_v5 = vadd.f32 %v1290_v9, %v1110_v16  ;;  %v5499_v52 = vld [vmem:[#allocation27_spill] sm:$0xff] }
 0x1c4   :  { %v1292_v13 = vpop.f32.mrf.mxu0  ;;  %v1117_v47 = vadd.f32 %v4742_v42, %v5499_v52  ;;  %v5501_v42 = vld [vmem:[#allocation29_spill] sm:$0xff] }
 0x1c5   :  { %v1492_v0 = vmax.f32 %v1444_v36, 0.0  ;;  %v1386_v27 = vadd.f32 %v1292_v13, %v1111_v30  ;;  %v4842_v12 = vmax.f32 %v1489_v34, %v1491_v18  ;;  %v1445_v31 = vadd.f32 %v4648_v39, %v1385_v5  ;;  %v1063_v34 = vpop.f32.mrf.mxu1  ;;  %v5500_v18 = vld [vmem:[#allocation28_spill] sm:$0xff] }
 0x1c6   :  { %v1296_v4 = vpop.f32.mrf.mxu0  ;;  %v1118_v36 = vadd.f32 %v4760_v19, %v5500_v18 }
 0x1c7   :  { %v1387_v7 = vadd.f32 %v1296_v4, %v1112_v25  ;;  %1585 = vrot.lane.b32.xlu0 %v4842_v12, %s3609_s29  ;;  %v1528_v53 = vmax.f32 %v1490_v24, %v1492_v0  ;;  %v1446_v29 = vadd.f32 %v4653_v50, %v1386_v27  ;;  %v1493_v59 = vmax.f32 %v1445_v31, 0.0  ;;  %v1065_v19 = vpop.f32.mrf.mxu1 }
 0x1c8   :  { %v1298_v3 = vpop.f32.mrf.mxu0  ;;  %v1119_v25 = vadd.f32 %v4775_v45, %v5501_v42 }
 0x1c9   :  { %v1447_v26 = vadd.f32 %v4648_v39, %v1387_v7  ;;  %v1388_v46 = vadd.f32 %v1298_v3, %v1113_v63  ;;  %1587 = vrot.lane.b32.xlu1 %v1528_v53, %s3609_s29  ;;  %v1494_v37 = vmax.f32 %v1446_v29, 0.0  ;;  %v1120_v63 = vadd.f32 %v4795_v22, %v5502_v8  ;;  %v5503_v29 = vld [vmem:[#allocation3_spill] sm:$0xff] }
 0x1ca   :  { %v1302_v1 = vpop.f32.mrf.mxu0  ;;  %v1121_v45 = vadd.f32 %v4808_v33, %v5503_v29  ;;  %v5505_v33 = vld [vmem:[#allocation4_spill] sm:$0xff] }
 0x1cb   :  { %v1495_v17 = vmax.f32 %v1447_v26, 0.0  ;;  %v1448_v41 = vadd.f32 %v4653_v50, %v1388_v46  ;;  %v1389_v44 = vadd.f32 %v1302_v1, %v1114_v58  ;;  %v5504_v1 = vld [vmem:[#allocation6_spill] sm:$0xff]  ;;  %v1123_v57 = vadd.f32 %v4840_v35, %v5505_v33  ;;  %v5512_v33 = vld [vmem:[#allocation11_spill] sm:$0xff] }
 0x1cc   :  { %v1304_v32 = vpop.f32.mrf.mxu0 }
 0x1cd   :  { %v1496_v38 = vmax.f32 %v1448_v41, 0.0  ;;  %v1390_v11 = vadd.f32 %v1304_v32, %v1115_v21  ;;  %v4861_v16 = vmax.f32 %v1493_v59, %v1495_v17  ;;  %v1449_v10 = vadd.f32 %v4648_v39, %v1389_v44  ;;  %v1069_v21 = vpop.f32.mrf.mxu1 }
 0x1ce   :  { %v1308_v48 = vpop.f32.mrf.mxu0  ;;  %v1122_v59 = vadd.f32 %v4825_v54, %v5504_v1 }
 0x1cf   :  { %v1391_v30 = vadd.f32 %v1308_v48, %v1116_v28  ;;  %1589 = vrot.lane.b32.xlu0 %v4861_v16, %s3609_s29  ;;  %v1530_v9 = vmax.f32 %v1494_v37, %v1496_v38  ;;  %v1450_v5 = vadd.f32 %v4653_v50, %v1390_v11  ;;  %v1497_v24 = vmax.f32 %v1449_v10, 0.0  ;;  %v5506_v48 = vld [vmem:[#allocation5_spill] sm:$0xff]  ;;  %v1071_v54 = vpop.f32.mrf.mxu1 }
 0x1d0   :  { %v1310_v2 = vpop.f32.mrf.mxu0  ;;  %v1124_v52 = vadd.f32 %v4849_v15, %v5506_v48  ;;  %v5508_v15 = vld [vmem:[#allocation7_spill] sm:$0xff] }
 0x1d1   :  { %v1451_v49 = vadd.f32 %v4648_v39, %v1391_v30  ;;  %v1392_v56 = vadd.f32 %v1310_v2, %v1117_v47  ;;  %1591 = vrot.lane.b32.xlu1 %v1530_v9, %s3609_s29  ;;  %v1498_v7 = vmax.f32 %v1450_v5, 0.0  ;;  %v1075_v42 = vpop.f32.mrf.mxu1 }
 0x1d2   :  { %v1314_v13 = vpop.f32.mrf.mxu0 }
 0x1d3   :  { %v1499_v0 = vmax.f32 %v1451_v49, 0.0  ;;  %v1452_v27 = vadd.f32 %v4653_v50, %v1392_v56  ;;  %v1393_v4 = vadd.f32 %v1314_v13, %v1118_v36  ;;  %v5507_v36 = vld [vmem:[#allocation9_spill] sm:$0xff]  ;;  %v1126_v13 = vadd.f32 %v1063_v34, %v5508_v15 }
 0x1d4   :  { %v1316_v31 = vpop.f32.mrf.mxu0  ;;  %v1125_v5 = vadd.f32 %v1059_v55, %v5507_v36 }
 0x1d5   :  { %v1500_v53 = vmax.f32 %v1452_v27, 0.0  ;;  %v1394_v3 = vadd.f32 %v1316_v31, %v1119_v25  ;;  %v4878_v60 = vmax.f32 %v1497_v24, %v1499_v0  ;;  %v1453_v26 = vadd.f32 %v4648_v39, %v1393_v4  ;;  %v5509_v4 = vld [vmem:[#allocation8_spill] sm:$0xff] }
 0x1d6   :  { %v1320_v58 = vpop.f32.mrf.mxu0  ;;  %v1127_v55 = vadd.f32 %v1065_v19, %v5509_v4 }
 0x1d7   :  { %v1395_v46 = vadd.f32 %v1320_v58, %v1120_v63  ;;  %1593 = vrot.lane.b32.xlu0 %v4878_v60, %s3609_s29  ;;  %v1532_v61 = vmax.f32 %v1498_v7, %v1500_v53  ;;  %v1454_v17 = vadd.f32 %v4653_v50, %v1394_v3  ;;  %v1501_v32 = vmax.f32 %v1453_v26, 0.0  ;;  %v5510_v3 = vld [vmem:[#allocation12_spill] sm:$0xff]  ;;  %v1077_v58 = vpop.f32.mrf.mxu1 }
 0x1d8   :  { %v1322_v22 = vpop.f32.mrf.mxu0  ;;  %v1128_v34 = vadd.f32 %v1069_v21, %v5510_v3 }
 0x1d9   :  { %v1455_v41 = vadd.f32 %v4648_v39, %v1395_v46  ;;  %v1396_v44 = vadd.f32 %v1322_v22, %v1121_v45  ;;  %1595 = vrot.lane.b32.xlu1 %v1532_v61, %s3609_s29  ;;  %v1502_v10 = vmax.f32 %v1454_v17, 0.0  ;;  %v5511_v22 = vld [vmem:[#allocation10_spill] sm:$0xff] }
 0x1da   :  { %v1326_v28 = vpop.f32.mrf.mxu0  ;;  %v1129_v1 = vadd.f32 %v1071_v54, %v5511_v22  ;;  %v1662_v22 = vld [vmem:[%s5419_s3 + $0x60] sm:$0xff] }
 0x1db   :  { %v1503_v37 = vmax.f32 %v1455_v41, 0.0  ;;  %v1456_v38 = vadd.f32 %v4653_v50, %v1396_v44  ;;  %v1397_v11 = vadd.f32 %v1326_v28, %v1122_v59  ;;  %v1081_v41 = vpop.f32.mrf.mxu1 }
 0x1dc   :  { %v1328_v47 = vpop.f32.mrf.mxu0 }
 0x1dd   :  { %v1504_v30 = vmax.f32 %v1456_v38, 0.0  ;;  %v1398_v9 = vadd.f32 %v1328_v47, %v1123_v57  ;;  %v4895_v2 = vmax.f32 %v1501_v32, %v1503_v37  ;;  %v1457_v35 = vadd.f32 %v4648_v39, %v1397_v11  ;;  %v5513_v37 = vld [vmem:[#allocation15_spill] sm:$0xff] }
 0x1de   :  { %v1332_v18 = vpop.f32.mrf.mxu0  ;;  %v1130_v57 = vadd.f32 %v1075_v42, %v5512_v33  ;;  %v1131_v38 = vadd.f32 %v1077_v58, %v5513_v37  ;;  %v5515_v42 = vld [vmem:[#allocation14_spill] sm:$0xff] }
 0x1df   :  { %v1399_v49 = vadd.f32 %v1332_v18, %v1124_v52  ;;  %1597 = vrot.lane.b32.xlu0 %v4895_v2, %s3609_s29  ;;  %v1534_v56 = vmax.f32 %v1502_v10, %v1504_v30  ;;  %v1458_v24 = vadd.f32 %v4653_v50, %v1398_v9  ;;  %v1505_v63 = vmax.f32 %v1457_v35, 0.0  ;;  %v5514_v10 = vld [vmem:[#allocation13_spill] sm:$0xff]  ;;  %v1083_v9 = vpop.f32.mrf.mxu1 }
 0x1e0   :  { %v1334_v25 = vpop.f32.mrf.mxu0  ;;  %v1132_v30 = vadd.f32 %v1081_v41, %v5514_v10  ;;  %v1658_v41 = vld [vmem:[%s5419_s3 + $0x40] sm:$0xff] }
 0x1e1   :  { %v1459_v0 = vadd.f32 %v4648_v39, %v1399_v49  ;;  %v1400_v27 = vadd.f32 %v1334_v25, %v1125_v5  ;;  %1599 = vrot.lane.b32.xlu1 %v1534_v56, %s3609_s29  ;;  %v1506_v45 = vmax.f32 %v1458_v24, 0.0  ;;  %v1133_v25 = vadd.f32 %v1083_v9, %v5515_v42 }
 0x1e2   :  { %v1338_v8 = vpop.f32.mrf.mxu0 }
 0x1e3   :  { %v1507_v31 = vmax.f32 %v1459_v0, 0.0  ;;  %v1460_v7 = vadd.f32 %v4653_v50, %v1400_v27  ;;  %v1401_v53 = vadd.f32 %v1338_v8, %v1126_v13  ;;  %1565 = vrot.lane.b32.xlu0 %v4671_v6, %s3609_s29 }
 0x1e4   :  { %v1340_v29 = vpop.f32.mrf.mxu0 }
 0x1e5   :  { %v1508_v26 = vmax.f32 %v1460_v7, 0.0  ;;  %v1402_v46 = vadd.f32 %v1340_v29, %v1127_v55  ;;  %1567 = vrot.lane.b32.xlu1 %v4679_v43, %s3609_s29  ;;  %v4912_v19 = vmax.f32 %v1505_v63, %v1507_v31  ;;  %v1461_v59 = vadd.f32 %v4648_v39, %v1401_v53 }
 0x1e6   :  { %v1344_v61 = vpop.f32.mrf.mxu0 }
 0x1e7   :  { %v1403_v17 = vadd.f32 %v1344_v61, %v1128_v34  ;;  %1601 = vrot.lane.b32.xlu0 %v4912_v19, %s3609_s29  ;;  %v1536_v21 = vmax.f32 %v1506_v45, %v1508_v26  ;;  %v1462_v28 = vadd.f32 %v4653_v50, %v1402_v46  ;;  %v1509_v48 = vmax.f32 %v1461_v59, 0.0 }
 0x1e8   :  { %v1346_v44 = vpop.f32.mrf.mxu0 }
 0x1e9   :  { %v1463_v43 = vadd.f32 %v4648_v39, %v1403_v17  ;;  %v1404_v32 = vadd.f32 %v1346_v44, %v1129_v1  ;;  %1603 = vrot.lane.b32.xlu1 %v1536_v21, %s3609_s29  ;;  %v1510_v36 = vmax.f32 %v1462_v28, 0.0  ;;  %v1660_v17 = vld [vmem:[%s5419_s3 + $0x50] sm:$0xff] }
 0x1ea   :  { %v1350_v11 = vpop.f32.mrf.mxu0 }
 0x1eb   :  { %v1511_v52 = vmax.f32 %v1463_v43, 0.0  ;;  %v1464_v54 = vadd.f32 %v4653_v50, %v1404_v32  ;;  %v1405_v47 = vadd.f32 %v1350_v11, %v1130_v57  ;;  %v1656_v43 = vld [vmem:[%s5419_s3 + $0x30] sm:$0xff]  ;;  %v1655_v32 = vld [vmem:[%s5419_s3 + $0x28] sm:$0xff]  ;;  %v1653_v11 = vld [vmem:[%s5419_s3 + $0x18] sm:$0xff] }
 0x1ec   :  { %v1352_v18 = vpop.f32.mrf.mxu0 }
 0x1ed   :  { %v1512_v5 = vmax.f32 %v1464_v54, 0.0  ;;  %v1406_v35 = vadd.f32 %v1352_v18, %v1131_v38  ;;  %v4925_v49 = vmax.f32 %v1509_v48, %v1511_v52  ;;  %v1465_v15 = vadd.f32 %v4648_v39, %v1405_v47  ;;  %v1652_v54 = vld [vmem:[%s5419_s3 + $0x10] sm:$0xff]  ;;  %v1651_v47 = vld [vmem:[%s5419_s3 + $0x8] sm:$0xff] }
 0x1ee   :  { %v1356_v56 = vpop.f32.mrf.mxu0 }
 0x1ef   :  { %v1407_v13 = vadd.f32 %v1356_v56, %v1132_v30  ;;  %1605 = vrot.lane.b32.xlu0 %v4925_v49, %s3609_s29  ;;  %v1538_v24 = vmax.f32 %v1510_v36, %v1512_v5  ;;  %v1466_v27 = vadd.f32 %v4653_v50, %v1406_v35  ;;  %v1513_v8 = vmax.f32 %v1465_v15, 0.0  ;;  %v3033_v36 = vld [vmem:[%s5419_s3 + $0x148] sm:$0xf] }
 0x1f0   :  { %v1358_v0 = vpop.f32.mrf.mxu0 }
 0x1f1   :  { %v1467_v4 = vadd.f32 %v4648_v39, %v1407_v13  ;;  %v1408_v55 = vadd.f32 %v1358_v0, %v1133_v25  ;;  %1607 = vrot.lane.b32.xlu1 %v1538_v24, %s3609_s29  ;;  %v1514_v7 = vmax.f32 %v1466_v27, 0.0 }
 0x1f3   :  { %v1515_v63 = vmax.f32 %v1467_v4, 0.0  ;;  %v1468_v31 = vadd.f32 %v4653_v50, %v1408_v55 }
 0x1f5   :  { %v1516_v53 = vmax.f32 %v1468_v31, 0.0  ;;  %v4935_v3 = vmax.f32 %v1513_v8, %v1515_v63  ;;  %v3030_v31 = vld [vmem:[%s5419_s3 + $0x130] sm:$0xff] }
 0x1f7   :  { %1609 = vrot.lane.b32.xlu0 %v4935_v3, %s3609_s29  ;;  %v1540_v34 = vmax.f32 %v1514_v7, %v1516_v53 }
 0x1f9   :  { %1611 = vrot.lane.b32.xlu1 %v1540_v34, %s3609_s29  ;;  %v3028_v34 = vld [vmem:[%s5419_s3 + $0x120] sm:$0xff] }
 0x219   :  { %v1570_v58 = vpop.permute.xlu0 %1569 }
 0x21d   :  { %v1572_v39 = vpop.permute.xlu0 %1571 }
 0x21e   :  { %v1615_v29 = vsel %vm1613_vm2, %v1570_v58, %v1572_v39 }
 0x21f   :  { %v4942_v45 = vmax.f32 %v4711_v23, %v1615_v29  ;;  %v1661_v23 = vld [vmem:[%s5419_s3 + $0x58] sm:$0xff] }
 0x220   :  { %v3027_v29 = vld [vmem:[%s5419_s3 + $0x118] sm:$0xff] }
 0x221   :  { %3311 = vmatprep.mubr.msk.f32.mxu1 %vm1679_vm3, %v4942_v45  ;;  %v1574_v50 = vpop.permute.xlu1 %1573 }
 0x225   :  { %v1576_v26 = vpop.permute.xlu1 %1575 }
 0x226   :  { %v1616_v46 = vsel %vm1613_vm2, %v1574_v50, %v1576_v26 }
 0x227   :  { %v4948_v61 = vmax.f32 %v4747_v51, %v1616_v46  ;;  %v3024_v46 = vld [vmem:[%s5419_s3 + $0x100] sm:$0xff] }
 0x229   :  { %3312 = vmatmul.mubr.msk.f32.vlgmr.msra.gmra.mxu1 %vm1679_vm3, %v4948_v61  ;;  %v1578_v1 = vpop.permute.xlu0 %1577 }
 0x22a   :  { %3324 = vmatpush3.msk.msra.mxu1 %vm150_vm0, %v4820_v62  ;;  %v1659_v62 = vld [vmem:[%s5419_s3 + $0x48] sm:$0xff] }
 0x22b   :  { %v1580_v59 = vpop.permute.xlu1 %1579  ;;  %3325 = vmatprep.subr.mxu1 %v1662_v22 }
 0x22c   :  { %v1617_v51 = vsel %vm1613_vm2, %v1578_v1, %v1580_v59  ;;  %3326 = vmatpush3.msra.mxu1 %v1662_v22  ;;  %v3022_v1 = vld [vmem:[%s5419_s3 + $0xf0] sm:$0xff]  ;;  %v3021_v59 = vld [vmem:[%s5419_s3 + $0xe8] sm:$0xff] }
 0x22d   :  { %v4965_v21 = vmax.f32 %v4780_v14, %v1617_v51  ;;  %3327 = vmatprep.subr.mxu1 %v1661_v23  ;;  %v1657_v14 = vld [vmem:[%s5419_s3 + $0x38] sm:$0xff] }
 0x22e   :  { %3328 = vmatpush3.msra.mxu1 %v1661_v23  ;;  %v3056_v51 = vld [vmem:[%s5419_s3 + $0x1b8] sm:$0xf] }
 0x22f   :  { %3314 = vmatprep.mubr.msk.f32.mxu1 %vm1679_vm3, %v4965_v21  ;;  %3329 = vmatprep.subr.mxu1 %v1660_v17 }
 0x230   :  { %3330 = vmatpush3.msra.mxu1 %v1660_v17  ;;  %v3055_v17 = vld [vmem:[%s5419_s3 + $0x1b0] sm:$0xff] }
 0x231   :  { %3331 = vmatprep.subr.mxu1 %v1659_v62  ;;  %v1582_v44 = vpop.permute.xlu0 %1581 }
 0x232   :  { %3332 = vmatpush3.msra.mxu1 %v1659_v62  ;;  %v3054_v62 = vld [vmem:[%s5419_s3 + $0x1a8] sm:$0xff] }
 0x233   :  { %v1584_v33 = vpop.permute.xlu1 %1583  ;;  %3333 = vmatprep.subr.mxu1 %v1658_v41 }
 0x234   :  { %v1618_v57 = vsel %vm1613_vm2, %v1582_v44, %v1584_v33  ;;  %3334 = vmatpush3.msra.mxu1 %v1658_v41  ;;  %v3053_v41 = vld [vmem:[%s5419_s3 + $0x1a0] sm:$0xff]  ;;  %v3051_v44 = vld [vmem:[%s5419_s3 + $0x190] sm:$0xff]  ;;  %v3050_v33 = vld [vmem:[%s5419_s3 + $0x188] sm:$0xff] }
 0x235   :  { %v4980_v28 = vmax.f32 %v4813_v40, %v1618_v57  ;;  %3335 = vmatprep.subr.mxu1 %v1657_v14  ;;  %v1654_v40 = vld [vmem:[%s5419_s3 + $0x20] sm:$0xff] }
 0x236   :  { %3336 = vmatpush3.msra.mxu1 %v1657_v14  ;;  %v3052_v14 = vld [vmem:[%s5419_s3 + $0x198] sm:$0xff]  ;;  %v3049_v57 = vld [vmem:[%s5419_s3 + $0x180] sm:$0xff] }
 0x237   :  { %3315 = vmatmul.mubr.msk.f32.gmra.mxu1 %vm1679_vm3, %v4980_v28  ;;  %3471 = vmatprep.mubr.msk.f32.mxu0 %vm1679_vm3, %v4980_v28 }
 0x238   :  { %3337 = vmatprep.subr.mxu1 %v1656_v43 }
 0x239   :  { %3338 = vmatpush3.msra.mxu1 %v1656_v43  ;;  %v1586_v37 = vpop.permute.xlu0 %1585  ;;  %v3048_v43 = vld [vmem:[%s5419_s3 + $0x178] sm:$0xff] }
 0x23a   :  { %3339 = vmatprep.subr.mxu1 %v1655_v32 }
 0x23b   :  { %v1588_v38 = vpop.permute.xlu1 %1587  ;;  %3340 = vmatpush3.msra.mxu1 %v1655_v32  ;;  %v3047_v32 = vld [vmem:[%s5419_s3 + $0x170] sm:$0xff] }
 0x23c   :  { %v1619_v48 = vsel %vm1613_vm2, %v1586_v37, %v1588_v38  ;;  %3341 = vmatprep.subr.mxu1 %v1654_v40  ;;  %v3044_v37 = vld [vmem:[%s5419_s3 + $0x158] sm:$0xff]  ;;  %v3043_v38 = vld [vmem:[%s5419_s3 + $0x150] sm:$0xff] }
 0x23d   :  { %v5000_v52 = vmax.f32 %v4842_v12, %v1619_v48  ;;  %3342 = vmatpush3.msra.mxu1 %v1654_v40  ;;  %v1650_v12 = vld [vmem:[%s5419_s3] sm:$0xff]  ;;  %v3046_v40 = vld [vmem:[%s5419_s3 + $0x168] sm:$0xff]  ;;  %v3097_v48 = vld [vmem:[%s5421_s5 + $0x78] sm:$0xff] }
 0x23e   :  { %3343 = vmatprep.subr.mxu1 %v1653_v11 }
 0x23f   :  { %3317 = vmatprep.mubr.msk.f32.mxu1 %vm1679_vm3, %v5000_v52  ;;  %3472 = vmatmul.mubr.msk.f32.vlgmr.msra.gmra.mxu0 %vm1679_vm3, %v5000_v52 }
 0x240   :  { %3344 = vmatpush3.msra.mxu1 %v1653_v11  ;;  %v2378_v11 = vld [vmem:[%s5421_s5 + $0x30] sm:$0xff] }
 0x241   :  { %3345 = vmatprep.subr.mxu1 %v1652_v54  ;;  %v1590_v10 = vpop.permute.xlu0 %1589 }
 0x242   :  { %3346 = vmatpush3.msra.mxu1 %v1652_v54  ;;  %v2377_v54 = vld [vmem:[%s5421_s5 + $0x28] sm:$0xff] }
 0x243   :  { %v1592_v30 = vpop.permute.xlu1 %1591  ;;  %3347 = vmatprep.subr.mxu1 %v1651_v47 }
 0x244   :  { %v1620_v9 = vsel %vm1613_vm2, %v1590_v10, %v1592_v30  ;;  %3348 = vmatpush3.msra.mxu1 %v1651_v47  ;;  %v3095_v47 = vld [vmem:[%s5421_s5 + $0x68] sm:$0xff]  ;;  %v3094_v10 = vld [vmem:[%s5421_s5 + $0x60] sm:$0xff]  ;;  %v2375_v30 = vld [vmem:[%s5421_s5 + $0x18] sm:$0xff] }
 0x245   :  { %v5017_v18 = vmax.f32 %v4861_v16, %v1620_v9  ;;  %3349 = vmatprep.subr.mxu1 %v1650_v12  ;;  %v3093_v9 = vld [vmem:[%s5421_s5 + $0x58] sm:$0xff] }
 0x246   :  { %3350 = vmatpush3.msra.mxu1 %v1650_v12  ;;  %v2376_v12 = vld [vmem:[%s5421_s5 + $0x20] sm:$0xff] }
 0x247   :  { %3318 = vmatmul.mubr.msk.f32.gmra.mxu1 %vm1679_vm3, %v5017_v18  ;;  %3474 = vmatprep.mubr.msk.f32.mxu0 %vm1679_vm3, %v5017_v18 }
 0x248   :  { %3363 = vmatprep.subr.msk.mxu1 %vm150_vm0, %v3033_v36 }
 0x249   :  { %v1594_v5 = vpop.permute.xlu0 %1593 }
 0x24b   :  { %v1596_v35 = vpop.permute.xlu1 %1595 }
 0x24c   :  { %v1621_v56 = vsel %vm1613_vm2, %v1594_v5, %v1596_v35 }
 0x24d   :  { %v5029_v16 = vmax.f32 %v4878_v60, %v1621_v56 }
 0x24f   :  { %3320 = vmatprep.mubr.msk.f32.mxu1 %vm1679_vm3, %v5029_v16  ;;  %3475 = vmatmul.mubr.msk.f32.gmra.mxu0 %vm1679_vm3, %v5029_v16 }
 0x251   :  { %v1598_v42 = vpop.permute.xlu0 %1597 }
 0x253   :  { %v1600_v25 = vpop.permute.xlu1 %1599 }
 0x254   :  { %v1622_v15 = vsel %vm1613_vm2, %v1598_v42, %v1600_v25 }
 0x255   :  { %v5037_v13 = vmax.f32 %v4895_v2, %v1622_v15  ;;  %v1566_v24 = vpop.permute.xlu0 %1565  ;;  %v3032_v2 = vld [vmem:[%s5419_s3 + $0x140] sm:$0xff] }
 0x257   :  { %3321 = vmatmul.mubr.msk.f32.gmra.mxu1 %vm1679_vm3, %v5037_v13  ;;  %3477 = vmatprep.mubr.msk.f32.mxu0 %vm1679_vm3, %v5037_v13  ;;  %v1568_v60 = vpop.permute.xlu1 %1567 }
 0x258   :  { %v1614_v0 = vsel %vm1613_vm2, %v1566_v24, %v1568_v60 }
 0x259   :  { %v1638_v27 = vmax.f32 %v4671_v6, %v1614_v0  ;;  %v1602_v4 = vpop.permute.xlu0 %1601  ;;  %v3031_v6 = vld [vmem:[%s5419_s3 + $0x138] sm:$0xff] }
 0x25b   :  { %v1604_v55 = vpop.permute.xlu1 %1603  ;;  %3351 = vmatprep.mubr.msk.f32.mxu1 %vm1679_vm3, %v1638_v27 }
 0x25c   :  { %v1623_v8 = vsel %vm1613_vm2, %v1602_v4, %v1604_v55  ;;  %3352 = vmatmul.mubr.msk.f32.vlgmr.msra.gmra.mxu1 %vm1679_vm3, %v4942_v45  ;;  %v3026_v45 = vld [vmem:[%s5419_s3 + $0x110] sm:$0xff] }
 0x25d   :  { %v5053_v63 = vmax.f32 %v4912_v19, %v1623_v8  ;;  %3364 = vmatpush3.msk.msra.mxu1 %vm150_vm0, %v3033_v36  ;;  %3354 = vmatprep.mubr.msk.f32.mxu1 %vm1679_vm3, %v4948_v61  ;;  %v3029_v19 = vld [vmem:[%s5419_s3 + $0x128] sm:$0xff] }
 0x25e   :  { %3365 = vmatprep.subr.mxu1 %v3032_v2  ;;  %v2373_v36 = vld [vmem:[%s5421_s5 + $0x8] sm:$0xff] }
 0x25f   :  { %3366 = vmatpush3.msra.mxu1 %v3032_v2  ;;  %3478 = vmatmul.mubr.msk.f32.gmra.mxu0 %vm1679_vm3, %v5053_v63 }
 0x260   :  { %3367 = vmatprep.subr.mxu1 %v3031_v6  ;;  %3355 = vmatmul.mubr.msk.f32.gmra.mxu1 %vm1679_vm3, %v4965_v21 }
 0x261   :  { %3368 = vmatpush3.msra.mxu1 %v3031_v6  ;;  %3357 = vmatprep.mubr.msk.f32.mxu1 %vm1679_vm3, %v4980_v28  ;;  %v1606_v7 = vpop.permute.xlu0 %1605 }
 0x262   :  { %3369 = vmatprep.subr.mxu1 %v3030_v31 }
 0x263   :  { %3370 = vmatpush3.msra.mxu1 %v3030_v31  ;;  %v1608_v53 = vpop.permute.xlu1 %1607 }
 0x264   :  { %v1624_v58 = vsel %vm1613_vm2, %v1606_v7, %v1608_v53  ;;  %3371 = vmatprep.subr.mxu1 %v3029_v19  ;;  %3358 = vmatmul.mubr.msk.f32.gmra.mxu1 %vm1679_vm3, %v5000_v52 }
 0x265   :  { %v5080_v39 = vmax.f32 %v4925_v49, %v1624_v58  ;;  %3372 = vmatpush3.msra.mxu1 %v3029_v19  ;;  %3360 = vmatprep.mubr.msk.f32.mxu1 %vm1679_vm3, %v5017_v18  ;;  %v3025_v49 = vld [vmem:[%s5419_s3 + $0x108] sm:$0xff] }
 0x266   :  { %3373 = vmatprep.subr.mxu1 %v3028_v34 }
 0x267   :  { %3374 = vmatpush3.msra.mxu1 %v3028_v34  ;;  %3480 = vmatprep.mubr.msk.f32.mxu0 %vm1679_vm3, %v5080_v39 }
 0x268   :  { %3375 = vmatprep.subr.mxu1 %v3027_v29  ;;  %3361 = vmatmul.mubr.msk.f32.gmra.mxu1 %vm1679_vm3, %v5029_v16 }
 0x269   :  { %3376 = vmatpush3.msra.mxu1 %v3027_v29  ;;  %3391 = vmatprep.mubr.msk.f32.mxu1 %vm1679_vm3, %v4948_v61  ;;  %v1610_v50 = vpop.permute.xlu0 %1609  ;;  %v3023_v61 = vld [vmem:[%s5419_s3 + $0xf8] sm:$0xff] }
 0x26a   :  { %3377 = vmatprep.subr.mxu1 %v3026_v45 }
 0x26b   :  { %3378 = vmatpush3.msra.mxu1 %v3026_v45  ;;  %v1612_v26 = vpop.permute.xlu1 %1611 }
 0x26c   :  { %v1625_v22 = vsel %vm1613_vm2, %v1610_v50, %v1612_v26  ;;  %3379 = vmatprep.subr.mxu1 %v3025_v49 }
 0x26d   :  { %v1649_v23 = vmax.f32 %v4935_v3, %v1625_v22  ;;  %3380 = vmatpush3.msra.mxu1 %v3025_v49  ;;  %v3020_v3 = vld [vmem:[%s5419_s3 + $0xe0] sm:$0xff]  ;;  %v3092_v22 = vld [vmem:[%s5421_s5 + $0x50] sm:$0xff] }
 0x26e   :  { %3381 = vmatprep.subr.mxu1 %v3024_v46 }
 0x26f   :  { %3382 = vmatpush3.msra.mxu1 %v3024_v46  ;;  %3481 = vmatmul.mubr.msk.f32.gmra.mxu0 %vm1679_vm3, %v1649_v23  ;;  %v2372_v23 = vld [vmem:[%s5421_s5] sm:$0xff] }
 0x270   :  { %3383 = vmatprep.subr.mxu1 %v3023_v61  ;;  %3518 = vmatprep.mubr.msk.f32.mxu0 %vm3610_vm4, %v5492_v20 }
 0x271   :  { %3384 = vmatpush3.msra.mxu1 %v3023_v61 }
 0x272   :  { %3385 = vmatprep.subr.mxu1 %v3022_v1 }
 0x273   :  { %3386 = vmatpush3.msra.mxu1 %v3022_v1 }
 0x274   :  { %3387 = vmatprep.subr.mxu1 %v3021_v59 }
 0x275   :  { %3388 = vmatpush3.msra.mxu1 %v3021_v59 }
 0x276   :  { %3389 = vmatprep.subr.mxu1 %v3020_v3 }
 0x277   :  { %3390 = vmatpush3.msra.mxu1 %v3020_v3  ;;  %v3091_v3 = vld [vmem:[%s5421_s5 + $0x48] sm:$0xff] }
 0x278   :  { %3392 = vmatmul.mubr.msk.f32.vlgmr.msra.gmra.mxu1 %vm1679_vm3, %v4965_v21  ;;  %3403 = vmatprep.subr.msk.mxu1 %vm150_vm0, %v3056_v51 }
 0x279   :  { %3394 = vmatprep.mubr.msk.f32.mxu1 %vm1679_vm3, %v4980_v28  ;;  %3404 = vmatpush3.msk.msra.mxu1 %vm150_vm0, %v3056_v51 }
 0x27a   :  { %3405 = vmatprep.subr.mxu1 %v3055_v17 }
 0x27b   :  { %3406 = vmatpush3.msra.mxu1 %v3055_v17 }
 0x27c   :  { %3395 = vmatmul.mubr.msk.f32.gmra.mxu1 %vm1679_vm3, %v5000_v52  ;;  %3407 = vmatprep.subr.mxu1 %v3054_v62 }
 0x27d   :  { %3397 = vmatprep.mubr.msk.f32.mxu1 %vm1679_vm3, %v5017_v18  ;;  %3408 = vmatpush3.msra.mxu1 %v3054_v62 }
 0x27e   :  { %3409 = vmatprep.subr.mxu1 %v3053_v41 }
 0x27f   :  { %3410 = vmatpush3.msra.mxu1 %v3053_v41 }
 0x280   :  { %3398 = vmatmul.mubr.msk.f32.gmra.mxu1 %vm1679_vm3, %v5029_v16  ;;  %3411 = vmatprep.subr.mxu1 %v3052_v14 }
 0x281   :  { %3400 = vmatprep.mubr.msk.f32.mxu1 %vm1679_vm3, %v5037_v13  ;;  %3412 = vmatpush3.msra.mxu1 %v3052_v14  ;;  %v3089_v14 = vld [vmem:[%s5422_s4] ss:$0 sm:$0xff]  ;;  %s3611_s4 = smov 64  }
 0x282   :  { %3413 = vmatprep.subr.mxu1 %v3051_v44 }
 0x283   :  { %3414 = vmatpush3.msra.mxu1 %v3051_v44 }
 0x284   :  { %3401 = vmatmul.mubr.msk.f32.gmra.mxu1 %vm1679_vm3, %v5053_v63  ;;  %3415 = vmatprep.subr.mxu1 %v3050_v33 }
 0x285   :  { %3416 = vmatpush3.msra.mxu1 %v3050_v33  ;;  %3431 = vmatprep.mubr.msk.f32.mxu1 %vm1679_vm3, %v4965_v21  ;;  %v3045_v21 = vld [vmem:[%s5419_s3 + $0x160] sm:$0xff] }
 0x286   :  { %3417 = vmatprep.subr.mxu1 %v3049_v57 }
 0x287   :  { %3418 = vmatpush3.msra.mxu1 %v3049_v57 }
 0x288   :  { %3419 = vmatprep.subr.mxu1 %v3048_v43 }
 0x289   :  { %3420 = vmatpush3.msra.mxu1 %v3048_v43 }
 0x28a   :  { %3421 = vmatprep.subr.mxu1 %v3047_v32 }
 0x28b   :  { %3422 = vmatpush3.msra.mxu1 %v3047_v32 }
 0x28c   :  { %3423 = vmatprep.subr.mxu1 %v3046_v40 }
 0x28d   :  { %3424 = vmatpush3.msra.mxu1 %v3046_v40 }
 0x28e   :  { %3425 = vmatprep.subr.mxu1 %v3045_v21 }
 0x28f   :  { %3426 = vmatpush3.msra.mxu1 %v3045_v21 }
 0x290   :  { %3427 = vmatprep.subr.mxu1 %v3044_v37 }
 0x291   :  { %3428 = vmatpush3.msra.mxu1 %v3044_v37  ;;  %v3090_v37 = vld [vmem:[%s5421_s5 + $0x40] sm:$0xff] }
 0x292   :  { %3429 = vmatprep.subr.mxu1 %v3043_v38 }
 0x293   :  { %3430 = vmatpush3.msra.mxu1 %v3043_v38 }
 0x294   :  { %3432 = vmatmul.mubr.msk.f32.vlgmr.msra.gmra.mxu1 %vm1679_vm3, %v4980_v28  ;;  %3483 = vmatprep.subr.mxu1 %v5492_v20  ;;  %v2379_v28 = vld [vmem:[%s5421_s5 + $0x38] sm:$0xff] }
 0x295   :  { %3434 = vmatprep.mubr.msk.f32.mxu1 %vm1679_vm3, %v5000_v52  ;;  %3503 = vmatpush3.msra.mxu0 %v2379_v28  ;;  %v3096_v52 = vld [vmem:[%s5421_s5 + $0x70] sm:$0xff] }
 0x296   :  { %3484 = vmatpush3.msra.mxu1 %v3097_v48  ;;  %3504 = vmatprep.subr.mxu0 %v5492_v20 }
 0x297   :  { %3485 = vmatprep.subr.mxu1 %v5492_v20  ;;  %3505 = vmatpush3.msra.mxu0 %v2378_v11 }
 0x298   :  { %3435 = vmatmul.mubr.msk.f32.gmra.mxu1 %vm1679_vm3, %v5017_v18  ;;  %3506 = vmatprep.subr.mxu0 %v5492_v20  ;;  %v2374_v18 = vld [vmem:[%s5421_s5 + $0x10] sm:$0xff] }
 0x299   :  { %3437 = vmatprep.mubr.msk.f32.mxu1 %vm1679_vm3, %v5029_v16  ;;  %3486 = vmatpush3.msra.mxu1 %v3096_v52 }
 0x29a   :  { %3487 = vmatprep.subr.mxu1 %v5492_v20  ;;  %3507 = vmatpush3.msra.mxu0 %v2377_v54 }
 0x29b   :  { %3488 = vmatpush3.msra.mxu1 %v3095_v47  ;;  %3508 = vmatprep.subr.mxu0 %v5492_v20 }
 0x29c   :  { %3438 = vmatmul.mubr.msk.f32.gmra.mxu1 %vm1679_vm3, %v5037_v13  ;;  %3489 = vmatprep.subr.mxu1 %v5492_v20 }
 0x29d   :  { %3440 = vmatprep.mubr.msk.f32.mxu1 %vm1679_vm3, %v5053_v63  ;;  %3509 = vmatpush3.msra.mxu0 %v2376_v12 }
 0x29e   :  { %3490 = vmatpush3.msra.mxu1 %v3094_v10  ;;  %3510 = vmatprep.subr.mxu0 %v5492_v20 }
 0x29f   :  { %3491 = vmatprep.subr.mxu1 %v5492_v20  ;;  %3511 = vmatpush3.msra.mxu0 %v2375_v30 }
 0x2a0   :  { %3441 = vmatmul.mubr.msk.f32.gmra.mxu1 %vm1679_vm3, %v5080_v39  ;;  %3512 = vmatprep.subr.mxu0 %v5492_v20 }
 0x2a1   :  { %3492 = vmatpush3.msra.mxu1 %v3093_v9  ;;  %3513 = vmatpush3.msra.mxu0 %v2374_v18 }
 0x2a2   :  { %3493 = vmatprep.subr.mxu1 %v5492_v20  ;;  %3514 = vmatprep.subr.mxu0 %v5492_v20 }
 0x2a3   :  { %3515 = vmatpush3.msra.mxu0 %v2373_v36  ;;  %3494 = vmatpush3.msra.mxu1 %v3092_v22 }
 0x2a4   :  { %3516 = vmatprep.subr.mxu0 %v5492_v20  ;;  %3495 = vmatprep.subr.mxu1 %v5492_v20 }
 0x2a5   :  { %3517 = vmatpush3.msra.mxu0 %v2372_v23  ;;  %3496 = vmatpush3.msra.mxu1 %v3091_v3  ;;  %v3116_v3 = vld [vmem:[%s5421_s5 + $0xf8] sm:$0xff] }
 0x2a6   :  { %3540 = vmatprep.subr.mxu0 %v5492_v20  ;;  %3497 = vmatprep.subr.mxu1 %v5492_v20 }
 0x2a7   :  { %3499 = vmatprep.mubr.msk.f32.mxu1 %vm3610_vm4, %v5492_v20  ;;  %3498 = vmatpush3.msra.mxu1 %v3090_v37  ;;  %v3110_v37 = vld [vmem:[%s5421_s5 + $0xc8] sm:$0xff] }
 0x2a8   :  { %3521 = vmatprep.subr.mxu1 %v5492_v20 }
 0x2e9   :  { %v3313_v5 = vpop.f32.mrf.mxu1 }
 0x2eb   :  { %v1773_v35 = vpop.f32.mrf.mxu1 }
 0x2f7   :  { %v3316_v56 = vpop.f32.mrf.mxu1 }
 0x2f9   :  { %v1783_v16 = vpop.f32.mrf.mxu1 }
 0x2ff   :  { %v3473_v34 = vpop.f32.mrf.mxu0 }
 0x301   :  { %v2278_v29 = vpop.f32.mrf.mxu0 }
 0x307   :  { %v3319_v42 = vpop.f32.mrf.mxu1 }
 0x309   :  { %v1793_v25 = vpop.f32.mrf.mxu1 }
 0x30f   :  { %v3476_v26 = vpop.f32.mrf.mxu0 }
 0x311   :  { %v2288_v33 = vpop.f32.mrf.mxu0 }
 0x317   :  { %v5240_v15 = vpop.f32.mrf.mxu1 }
 0x319   :  { %v5242_v13 = vpop.f32.mrf.mxu1 }
 0x31c   :  { %v3353_v24 = vpop.f32.mrf.mxu1 }
 0x31d   :  { %v1890_v39 = vadd.f32 %v3353_v24, %v3313_v5 }
 0x31e   :  { %v1884_v60 = vpop.f32.mrf.mxu1 }
 0x31f   :  { %v1885_v49 = vadd.f32 %v1884_v60, %v1773_v35  ;;  %v3479_v38 = vpop.f32.mrf.mxu0 }
 0x320   :  { %v3356_v0 = vpop.f32.mrf.mxu1 }
 0x321   :  { %v1900_v61 = vadd.f32 %v3356_v0, %v3316_v56  ;;  %v2298_v35 = vpop.f32.mrf.mxu0 }
 0x322   :  { %v1894_v27 = vpop.f32.mrf.mxu1 }
 0x323   :  { %v1895_v51 = vadd.f32 %v1894_v27, %v1783_v16 }
 0x324   :  { %v3359_v4 = vpop.f32.mrf.mxu1 }
 0x325   :  { %v1910_v43 = vadd.f32 %v3359_v4, %v3319_v42 }
 0x326   :  { %v1904_v55 = vpop.f32.mrf.mxu1 }
 0x327   :  { %v1905_v28 = vadd.f32 %v1904_v55, %v1793_v25 }
 0x328   :  { %v3362_v2 = vpop.f32.mrf.mxu1 }
 0x329   :  { %v1920_v10 = vadd.f32 %v3362_v2, %v5240_v15 }
 0x32a   :  { %v1914_v8 = vpop.f32.mrf.mxu1 }
 0x32b   :  { %v1915_v56 = vadd.f32 %v1914_v8, %v5242_v13 }
 0x32f   :  { %v3482_v4 = vpop.f32.mrf.mxu0 }
 0x338   :  { %v3393_v63 = vpop.f32.mrf.mxu1 }
 0x339   :  { %v2050_v50 = vadd.f32 %v3393_v63, %v1890_v39  ;;  %v2308_v39 = vpop.f32.mrf.mxu0 }
 0x33a   :  { %v2010_v6 = vpop.f32.mrf.mxu1 }
 0x33b   :  { %v2049_v1 = vadd.f32 %v2010_v6, %v1885_v49 }
 0x33c   :  { %v3396_v31 = vpop.f32.mrf.mxu1 }
 0x33d   :  { %v2052_v62 = vadd.f32 %v3396_v31, %v1900_v61 }
 0x33e   :  { %v2020_v19 = vpop.f32.mrf.mxu1 }
 0x33f   :  { %v2051_v32 = vadd.f32 %v2020_v19, %v1895_v51  ;;  %v3115_v51 = vld [vmem:[%s5421_s5 + $0xf0] sm:$0xff] }
 0x340   :  { %v3399_v7 = vpop.f32.mrf.mxu1 }
 0x341   :  { %v2054_v52 = vadd.f32 %v3399_v7, %v1910_v43  ;;  %v3112_v43 = vld [vmem:[%s5421_s5 + $0xd8] sm:$0xff] }
 0x342   :  { %v2030_v53 = vpop.f32.mrf.mxu1 }
 0x343   :  { %v2053_v9 = vadd.f32 %v2030_v53, %v1905_v28  ;;  %v3102_v28 = vld [vmem:[%s5421_s5 + $0x90] sm:$0xff] }
 0x344   :  { %v3402_v58 = vpop.f32.mrf.mxu1 }
 0x345   :  { %v2056_v24 = vadd.f32 %v3402_v58, %v1920_v10  ;;  %v2725_v10 = vld [vmem:[%s5423_s7 + $0x70] sm:$0xff] }
 0x346   :  { %v2040_v45 = vpop.f32.mrf.mxu1 }
 0x347   :  { %v2055_v55 = vadd.f32 %v2040_v45, %v1915_v56  ;;  %v2718_v56 = vld [vmem:[%s5423_s7 + $0x38] sm:$0xff] }
 0x354   :  { %v3433_v46 = vpop.f32.mrf.mxu1 }
 0x355   :  { %v2184_v59 = vadd.f32 %v3433_v46, %v2050_v50 }
 0x356   :  { %v2144_v17 = vpop.f32.mrf.mxu1 }
 0x357   :  { %v2318_v41 = vadd.f32 %v3473_v34, %v2184_v59  ;;  %v2183_v44 = vadd.f32 %v2144_v17, %v2049_v1 }
 0x358   :  { %v3436_v57 = vpop.f32.mrf.mxu1 }
 0x359   :  { %v2317_v40 = vadd.f32 %v2278_v29, %v2183_v44  ;;  %v2186_v21 = vadd.f32 %v3436_v57, %v2052_v62  ;;  %v2333_v11 = vadd.f32 %v3089_v14, %v2318_v41  ;;  %v3107_v41 = vld [vmem:[%s5421_s5 + $0xb8] sm:$0xff]  ;;  %v3106_v44 = vld [vmem:[%s5421_s5 + $0xb0] sm:$0xff]  ;;  %v3105_v57 = vld [vmem:[%s5421_s5 + $0xa8] sm:$0xff] }
 0x35a   :  { %v2154_v48 = vpop.f32.mrf.mxu1 }
 0x35b   :  { %v2332_v54 = vadd.f32 %v3089_v14, %v2317_v40  ;;  %v2320_v47 = vadd.f32 %v3476_v26, %v2186_v21  ;;  %v2185_v12 = vadd.f32 %v2154_v48, %v2051_v32  ;;  %v2341_v16 = vmax.f32 %v2333_v11, 0.0  ;;  %v3104_v32 = vld [vmem:[%s5421_s5 + $0xa0] sm:$0xff]  ;;  %v3111_v40 = vld [vmem:[%s5421_s5 + $0xd0] sm:$0xff]  ;;  %v3103_v21 = vld [vmem:[%s5421_s5 + $0x98] sm:$0xff] }
 0x35c   :  { %v3439_v30 = vpop.f32.mrf.mxu1  ;;  %v3109_v11 = vld [vmem:[%s5421_s5 + $0xc0] sm:$0xff] }
 0x35d   :  { %v2340_v18 = vmax.f32 %v2332_v54, 0.0  ;;  %v2319_v36 = vadd.f32 %v2288_v33, %v2185_v12  ;;  %v2188_v5 = vadd.f32 %v3439_v30, %v2054_v52  ;;  %v2335_v42 = vadd.f32 %v3089_v14, %v2320_v47  ;;  %v3113_v33 = vld [vmem:[%s5421_s5 + $0xe0] sm:$0xff]  ;;  %v3101_v52 = vld [vmem:[%s5421_s5 + $0x88] sm:$0xff] }
 0x35e   :  { %v2164_v25 = vpop.f32.mrf.mxu1  ;;  %v3100_v47 = vld [vmem:[%s5421_s5 + $0x80] sm:$0xff]  ;;  %v2724_v30 = vld [vmem:[%s5423_s7 + $0x68] sm:$0xff] }
 0x35f   :  { %v2334_v60 = vadd.f32 %v3089_v14, %v2319_v36  ;;  %v2322_v0 = vadd.f32 %v3479_v38, %v2188_v5  ;;  %v2187_v27 = vadd.f32 %v2164_v25, %v2053_v9  ;;  %v2348_v6 = vmax.f32 %v2340_v18, %v2341_v16  ;;  %v2723_v9 = vld [vmem:[%s5423_s7 + $0x60] sm:$0xff]  ;;  %v2722_v18 = vld [vmem:[%s5423_s7 + $0x58] sm:$0xff]  ;;  %v2721_v36 = vld [vmem:[%s5423_s7 + $0x50] sm:$0xff] }
 0x360   :  { %v3442_v63 = vpop.f32.mrf.mxu1  ;;  %v2343_v7 = vmax.f32 %v2335_v42, 0.0  ;;  %v2720_v5 = vld [vmem:[%s5423_s7 + $0x48] sm:$0xff]  ;;  %v2717_v16 = vld [vmem:[%s5423_s7 + $0x30] sm:$0xff]  ;;  %v2715_v25 = vld [vmem:[%s5423_s7 + $0x20] sm:$0xff] }
 0x361   :  { %v2342_v15 = vmax.f32 %v2334_v60, 0.0  ;;  %v2337_v2 = vadd.f32 %v3089_v14, %v2322_v0  ;;  %v2321_v31 = vadd.f32 %v2298_v35, %v2187_v27  ;;  %v2190_v19 = vadd.f32 %v3442_v63, %v2056_v24  ;;  %2356 = vrot.lane.b32.xlu1 %v2348_v6, %s3611_s4  ;;  %v2719_v35 = vld [vmem:[%s5423_s7 + $0x40] sm:$0xff]  ;;  %v2716_v42 = vld [vmem:[%s5423_s7 + $0x28] sm:$0xff]  ;;  %v2714_v24 = vld [vmem:[%s5423_s7 + $0x18] sm:$0xff] }
 0x362   :  { %v2174_v53 = vpop.f32.mrf.mxu1  ;;  %v2713_v60 = vld [vmem:[%s5423_s7 + $0x10] sm:$0xff]  ;;  %v2712_v0 = vld [vmem:[%s5423_s7 + $0x8] sm:$0xff]  ;;  %v2711_v27 = vld [vmem:[%s5423_s7] sm:$0xff] }
 0x363   :  { %v2336_v13 = vadd.f32 %v3089_v14, %v2321_v31  ;;  %v2324_v8 = vadd.f32 %v3482_v4, %v2190_v19  ;;  %v2189_v34 = vadd.f32 %v2174_v53, %v2055_v55  ;;  %v2349_v58 = vmax.f32 %v2342_v15, %v2343_v7  ;;  %v3118_v53 = vld [vmem:[%s5424_s6] ss:$0 sm:$0xff] }
 0x364   :  { %v2345_v29 = vmax.f32 %v2337_v2, 0.0 }
 0x365   :  { %v2344_v49 = vmax.f32 %v2336_v13, 0.0  ;;  %v2339_v50 = vadd.f32 %v3089_v14, %v2324_v8  ;;  %v2323_v26 = vadd.f32 %v2308_v39, %v2189_v34  ;;  %2358 = vrot.lane.b32.xlu0 %v2349_v58, %s3611_s4  ;;  %v3119_v39 = vld [vmem:[%s5425_s8] ss:$0 sm:$0xff] }
 0x367   :  { %v2338_v45 = vadd.f32 %v3089_v14, %v2323_v26  ;;  %v5269_v46 = vmax.f32 %v2344_v49, %v2345_v29  ;;  %v2347_v22 = vmax.f32 %v2339_v50, 0.0  ;;  %v3114_v14 = vld [vmem:[%s5421_s5 + $0xe8] sm:$0xff] }
 0x369   :  { %v2346_v23 = vmax.f32 %v2338_v45, 0.0  ;;  %2360 = vrot.lane.b32.xlu0 %v5269_v46, %s3611_s4 }
 0x36b   :  { %v2351_v61 = vmax.f32 %v2346_v23, %v2347_v22 }
 0x36d   :  { %2362 = vrot.lane.b32.xlu1 %v2351_v61, %s3611_s4 }
 0x3d3   :  { %v2357_v1 = vpop.permute.xlu1 %2356 }
 0x3d4   :  { %v2368_v59 = vmax.f32 %v2348_v6, %v2357_v1 }
 0x3d6   :  { %3519 = vmatmul.mubr.msk.f32.vlgmr.msra.gmra.mxu0 %vm2389_vm5, %v2368_v59 }
 0x3d7   :  { %3541 = vmatpush3.msra.mxu0 %v3116_v3  ;;  %v2359_v17 = vpop.permute.xlu0 %2358  ;;  %3556 = vmatprep.mubr.msk.f32.mxu0 %vm3610_vm4, %v5492_v20 }
 0x3d8   :  { %3542 = vmatprep.subr.mxu0 %v5492_v20  ;;  %v2369_v62 = vmax.f32 %v2349_v58, %v2359_v17 }
 0x3d9   :  { %3543 = vmatpush3.msra.mxu0 %v3115_v51 }
 0x3da   :  { %3544 = vmatprep.subr.mxu0 %v5492_v20  ;;  %3500 = vmatmul.mubr.msk.f32.vlgmr.msra.gmra.mxu1 %vm2389_vm5, %v2369_v62 }
 0x3db   :  { %3522 = vmatpush3.msra.mxu1 %v3107_v41  ;;  %3545 = vmatpush3.msra.mxu0 %v3114_v14  ;;  %v2361_v54 = vpop.permute.xlu0 %2360 }
 0x3dc   :  { %3523 = vmatprep.subr.mxu1 %v5492_v20  ;;  %3546 = vmatprep.subr.mxu0 %v5492_v20  ;;  %v2370_v12 = vmax.f32 %v5269_v46, %v2361_v54 }
 0x3dd   :  { %3524 = vmatpush3.msra.mxu1 %v3106_v44  ;;  %3547 = vmatpush3.msra.mxu0 %v3113_v33 }
 0x3de   :  { %3525 = vmatprep.subr.mxu1 %v5492_v20  ;;  %3548 = vmatprep.subr.mxu0 %v5492_v20 }
 0x3df   :  { %3526 = vmatpush3.msra.mxu1 %v3105_v57  ;;  %3549 = vmatpush3.msra.mxu0 %v3112_v43  ;;  %v2363_v38 = vpop.permute.xlu1 %2362 }
 0x3e0   :  { %3550 = vmatprep.subr.mxu0 %v5492_v20  ;;  %3527 = vmatprep.subr.mxu1 %v5492_v20  ;;  %v2371_v48 = vmax.f32 %v2351_v61, %v2363_v38 }
 0x3e1   :  { %3528 = vmatpush3.msra.mxu1 %v3104_v32  ;;  %3551 = vmatpush3.msra.mxu0 %v3111_v40 }
 0x3e2   :  { %3529 = vmatprep.subr.mxu1 %v5492_v20  ;;  %3552 = vmatprep.subr.mxu0 %v5492_v20 }
 0x3e3   :  { %3530 = vmatpush3.msra.mxu1 %v3103_v21  ;;  %3553 = vmatpush3.msra.mxu0 %v3110_v37 }
 0x3e4   :  { %3531 = vmatprep.subr.mxu1 %v5492_v20  ;;  %3554 = vmatprep.subr.mxu0 %v5492_v20 }
 0x3e5   :  { %3532 = vmatpush3.msra.mxu1 %v3102_v28  ;;  %3555 = vmatpush3.msra.mxu0 %v3109_v11 }
 0x3e6   :  { %3533 = vmatprep.subr.mxu1 %v5492_v20  ;;  %3557 = vmatmul.mubr.msk.f32.vlgmr.msra.gmra.mxu0 %vm2389_vm5, %v2371_v48 }
 0x3e7   :  { %3534 = vmatpush3.msra.mxu1 %v3101_v52  ;;  %3537 = vmatprep.mubr.msk.f32.mxu1 %vm3610_vm4, %v5492_v20 }
 0x3e8   :  { %3535 = vmatprep.subr.mxu1 %v5492_v20 }
 0x3e9   :  { %3536 = vmatpush3.msra.mxu1 %v3100_v47 }
 0x3ea   :  { %3538 = vmatmul.mubr.msk.f32.vlgmr.msra.gmra.mxu1 %vm2389_vm5, %v2370_v12  ;;  %3559 = vmatprep.subr.mxu1 %v5492_v20 }
 0x3eb   :  { %3560 = vmatpush3.msra.mxu1 %v2725_v10  ;;  %3589 = vmatprep.mubr.msk.f32.mxu1 %vm3610_vm4, %v5492_v20 }
 0x3ec   :  { %3561 = vmatprep.subr.mxu1 %v5492_v20 }
 0x3ed   :  { %3562 = vmatpush3.msra.mxu1 %v2724_v30 }
 0x3ee   :  { %3563 = vmatprep.subr.mxu1 %v5492_v20 }
 0x3ef   :  { %3564 = vmatpush3.msra.mxu1 %v2723_v9 }
 0x3f0   :  { %3565 = vmatprep.subr.mxu1 %v5492_v20 }
 0x3f1   :  { %3566 = vmatpush3.msra.mxu1 %v2722_v18 }
 0x3f2   :  { %3567 = vmatprep.subr.mxu1 %v5492_v20 }
 0x3f3   :  { %3568 = vmatpush3.msra.mxu1 %v2721_v36 }
 0x3f4   :  { %3569 = vmatprep.subr.mxu1 %v5492_v20 }
 0x3f5   :  { %3570 = vmatpush3.msra.mxu1 %v2720_v5 }
 0x3f6   :  { %3571 = vmatprep.subr.mxu1 %v5492_v20 }
 0x3f7   :  { %3572 = vmatpush3.msra.mxu1 %v2719_v35 }
 0x3f8   :  { %3573 = vmatprep.subr.mxu1 %v5492_v20 }
 0x3f9   :  { %3574 = vmatpush3.msra.mxu1 %v2718_v56 }
 0x3fa   :  { %3575 = vmatprep.subr.mxu1 %v5492_v20 }
 0x3fb   :  { %3576 = vmatpush3.msra.mxu1 %v2717_v16 }
 0x3fc   :  { %3577 = vmatprep.subr.mxu1 %v5492_v20 }
 0x3fd   :  { %3578 = vmatpush3.msra.mxu1 %v2716_v42 }
 0x3fe   :  { %3579 = vmatprep.subr.mxu1 %v5492_v20 }
 0x3ff   :  { %3580 = vmatpush3.msra.mxu1 %v2715_v25 }
 0x400   :  { %3581 = vmatprep.subr.mxu1 %v5492_v20 }
 0x401   :  { %3582 = vmatpush3.msra.mxu1 %v2714_v24 }
 0x402   :  { %3583 = vmatprep.subr.mxu1 %v5492_v20 }
 0x403   :  { %3584 = vmatpush3.msra.mxu1 %v2713_v60 }
 0x404   :  { %3585 = vmatprep.subr.mxu1 %v5492_v20 }
 0x405   :  { %3586 = vmatpush3.msra.mxu1 %v2712_v0 }
 0x406   :  { %3587 = vmatprep.subr.mxu1 %v5492_v20 }
 0x407   :  { %3588 = vmatpush3.msra.mxu1 %v2711_v27 }
 0x496   :  { %v2532_v4 = vpop.f32.mrf.mxu0 }
 0x498   :  { %v3520_v55 = vpop.f32.mrf.mxu0 }
 0x49a   :  { %v2459_v63 = vpop.f32.mrf.mxu1 }
 0x49b   :  { %v2533_v31 = vadd.f32 %v2532_v4, %v2459_v63 }
 0x49c   :  { %v3501_v6 = vpop.f32.mrf.mxu1 }
 0x4a6   :  { %v2697_v15 = vpop.f32.mrf.mxu0 }
 0x4a8   :  { %v3558_v2 = vpop.f32.mrf.mxu0 }
 0x4aa   :  { %v2614_v19 = vpop.f32.mrf.mxu1 }
 0x4ab   :  { %v2618_v7 = vadd.f32 %v2614_v19, %v2533_v31 }
 0x4ac   :  { %v3539_v13 = vpop.f32.mrf.mxu1 }
 0x4ad   :  { %v2701_v20 = vadd.f32 %v2697_v15, %v2618_v7 }
 0x4af   :  { %v2709_v8 = vadd.f32 %v3118_v53, %v2701_v20 }
 0x4b1   :  { %v2710_v34 = vmax.f32 %v2709_v8, 0.0 }
 0x4b3   :  { %3590 = vmatmul.mubr.msk.f32.vlgmr.msra.gmra.mxu1 %vm2733_vm6, %v2710_v34 }
 0x573   :  { %v2803_v58 = vpop.f32.mrf.mxu1 }
 0x574   :  { %v2804_v29 = vadd.f32 %v3119_v39, %v2803_v58 }
 0x575   :  { %v3591_v49 = vpop.f32.mrf.mxu1 }
 0x576   :  { %v2807_v50 = vmax.f32 %v2804_v29, 0.0 }
 0x578   :  { %v2809_v26 = vsel %vm2808_vm7, %v2807_v50, -inf }
 0x579   :  { %2810 = vmax.xlane.f32.xlu0 %v2809_v26 }
 0x602   :  { %v2811_v45 = vpop.xlane.xlu0 %2810 }
 0x603   :  { %v2812_v46 = vsub.f32 %v2807_v50, %v2811_v45 }
 0x605   :  { %v2813_v22 = vmul.f32 1.442695, %v2812_v46 }
 0x607   :  { %3604 = vpow2.f32 %v2813_v22 }
 0x614   :  { %v3605_v23 = vpop.eup %3604 }
 0x615   :  { %v2815_v61 = vsel %vm2808_vm7, %v3605_v23, 0.0 }
 0x616   :  { %2816 = vadd.xlane.f32.xlu1 %v2815_v61 }
 0x69f   :  { %v2817_v1 = vpop.xlane.xlu1 %2816 }
 0x6a0   :  { %3606 = vlog2.f32 %v2817_v1 }
 0x6ad   :  { %v3607_v59 = vpop.eup %3606 }
 0x6ae   :  { %v2819_v3 = vmul.f32 0.6931472, %v3607_v59 }
 0x6b0   :  { %v2820_v51 = vsub.f32 %v2812_v46, %v2819_v3 }
 0x6b2   :  { %2821 = vst.msk [vmem:[%s5426_s9] sm:$0xff] %vm2808_vm7, %v2820_v51 }

</bundles_post_ra>
